<compile_context>
chip_gen: v7x
topology: tpu7x:2x2x1
jax: 0.10.0
libtpu: 0.0.40
codegen_flags: <defaults>
</compile_context>

<pallas_src>
import functools
import math

import jax
import jax.numpy as jnp
from jax.experimental import pallas as pl
from jax.experimental.pallas import tpu as pltpu


# ----------------------------- in-kernel helpers -----------------------------

def _mm(x, w):
    """MXU matmul: bf16 operands, f32 accumulation (v6e/v7x friendly, fine on v5e)."""
    return jnp.dot(x.astype(jnp.bfloat16), w.astype(jnp.bfloat16),
                   preferred_element_type=jnp.float32)


def _dot_nt(a, b):
    """a (M, K) x b (N, K) -> (M, N): contract the last dims (no explicit transpose)."""
    return jax.lax.dot_general(a, b, (((1,), (1,)), ((), ())),
                               preferred_element_type=jnp.float32)


def _layer_norm(x, g, b, eps=1e-5):
    x = x.astype(jnp.float32)
    mu = jnp.mean(x, axis=-1, keepdims=True)
    var = jnp.mean(jnp.square(x - mu), axis=-1, keepdims=True)
    return (x - mu) * jax.lax.rsqrt(var + eps) * g + b


def _gelu(x):
    # TODO(synk): PyTorch nn.GELU defaults to the exact erf form; tanh approx used in-kernel.
    return 0.5 * x * (1.0 + jnp.tanh(0.7978845608028654 * (x + 0.044715 * x * x * x)))


def _mha_proj(q2, k2, v2, w_o, b_o, *, num_heads, want_scores):
    """Multi-head attention fused with its output projection, all 2-D (per batch).

    q2 (Sq, D), k2/v2 (Sk, D) f32; w_o (D, Do) value; b_o (1, Do) f32.
    Heads are static lane slices; the head-merge is folded into the projection:
        out = sum_h softmax(q_h k_h^T * scale) v_h @ W_o[h*dh:(h+1)*dh] + b_o
    Returns (out (Sq, Do) f32, head-averaged PRE-softmax scores (Sq, Sk) or None).
    """
    Sq, Dm = q2.shape
    Sk = k2.shape[0]
    dh = Dm // num_heads
    scale = 1.0 / math.sqrt(dh)
    out = jnp.zeros((Sq, b_o.shape[-1]), jnp.float32)
    s_sum = jnp.zeros((Sq, Sk), jnp.float32) if want_scores else None
    for h in range(num_heads):
        lo, hi = h * dh, (h + 1) * dh
        qh = q2[:, lo:hi]
        kh = k2[:, lo:hi]
        vh = v2[:, lo:hi]
        s = _dot_nt(qh, kh) * scale                       # (Sq, Sk) pre-softmax scores
        if want_scores:
            s_sum = s_sum + s
        m = jnp.max(s, axis=-1, keepdims=True)
        p = jnp.exp(s - m)
        p = p / jnp.sum(p, axis=-1, keepdims=True)
        ctx = jnp.dot(p, vh, preferred_element_type=jnp.float32)      # (Sq, dh)
        out = out + _mm(ctx, w_o[lo:hi, :])                            # fused head-merge + proj
    out = out + b_o
    if want_scores:
        return out, s_sum * (1.0 / num_heads)
    return out, None


# ------------------------------ fused encoder --------------------------------

def _encoder_kernel(patches_ref, patch_w_ref, patch_b_ref, cls_ref, pos_ref,
                    ln_ref, qkv_w_ref, qkv_b_ref, proj_w_ref, proj_b_ref,
                    fc1_w_ref, fc1_b_ref, fc2_w_ref, fc2_b_ref,
                    feat_ref, tok_scr, *, num_heads):
    layer = pl.program_id(1)
    S, D = tok_scr.shape
    hw = patches_ref.shape[1]

    # Patch embed + positional embedding only at the first layer; tokens stay in VMEM.
    # Token layout: rows [0:hw] = patch tokens (row-major spatial), row hw = cls token
    # (permutation-equivalent to cls-first; pos_embed follows the same convention).
    @pl.when(layer == 0)
    def _init_tokens():
        pe = _mm(patches_ref[0], patch_w_ref[...]) + patch_b_ref[...]      # (hw, D)
        tok_scr[0:hw, :] = pe + pos_ref[0:hw, :]
        tok_scr[hw:S, :] = cls_ref[...] + pos_ref[hw:S, :]

    x = tok_scr[...]                                                        # (S, D)
    ln = ln_ref[0]                                                          # (4, D)

    # pre-norm self-attention: LN1 -> QKV -> per-head attn -> out-proj (fused)
    y = _layer_norm(x, ln[0:1, :], ln[1:2, :])
    qkv = _mm(y, qkv_w_ref[0]) + qkv_b_ref[0]                               # (S, 3D)
    o, _ = _mha_proj(qkv[:, 0:D], qkv[:, D:2 * D], qkv[:, 2 * D:3 * D],
                     proj_w_ref[0], proj_b_ref[0],
                     num_heads=num_heads, want_scores=False)
    x = x + o

    # pre-norm MLP: LN2 -> FC1 -> GELU -> FC2 (fused)
    y = _layer_norm(x, ln[2:3, :], ln[3:4, :])
    ff = _gelu(_mm(y, fc1_w_ref[0]) + fc1_b_ref[0])
    x = x + _mm(ff, fc2_w_ref[0]) + fc2_b_ref[0]

    tok_scr[...] = x
    feat_ref[0, 0] = x.astype(feat_ref.dtype)


def vit_encoder(x, p, cfg):
    # TODO(synk): shrink_idx token shrinking never triggers at this small depth; omitted.
    # TODO(synk): drop_rate / attn_drop / drop_path are 0.0 in the default config; dropout omitted.
    B, C, H, W = x.shape
    P, D, L = cfg["patch_size"], cfg["enc_dim"], cfg["enc_layers"]
    mlp = cfg["mlp_ratio"] * D
    h, w = H // P, W // P
    hw = h * w
    S = hw + 1
    CPP = C * P * P
    # patch-embed conv (kernel==stride==P) == im2col + in-kernel matmul; im2col is XLA glue.
    patches = x.reshape(B, C, h, P, w, P).transpose(0, 2, 4, 1, 3, 5).reshape(B, hw, CPP)

    return pl.pallas_call(
        functools.partial(_encoder_kernel, num_heads=cfg["enc_heads"]),
        grid=(B, L),
        in_specs=[
            pl.BlockSpec((1, hw, CPP), lambda b, l: (b, 0, 0)),
            pl.BlockSpec((CPP, D), lambda b, l: (0, 0)),
            pl.BlockSpec((1, D), lambda b, l: (0, 0)),
            pl.BlockSpec((1, D), lambda b, l: (0, 0)),
            pl.BlockSpec((S, D), lambda b, l: (0, 0)),
            pl.BlockSpec((1, 4, D), lambda b, l: (l, 0, 0)),
            pl.BlockSpec((1, D, 3 * D), lambda b, l: (l, 0, 0)),
            pl.BlockSpec((1, 1, 3 * D), lambda b, l: (l, 0, 0)),
            pl.BlockSpec((1, D, D), lambda b, l: (l, 0, 0)),
            pl.BlockSpec((1, 1, D), lambda b, l: (l, 0, 0)),
            pl.BlockSpec((1, D, mlp), lambda b, l: (l, 0, 0)),
            pl.BlockSpec((1, 1, mlp), lambda b, l: (l, 0, 0)),
            pl.BlockSpec((1, mlp, D), lambda b, l: (l, 0, 0)),
            pl.BlockSpec((1, 1, D), lambda b, l: (l, 0, 0)),
        ],
        out_specs=pl.BlockSpec((1, 1, S, D), lambda b, l: (l, b, 0, 0)),
        out_shape=jax.ShapeDtypeStruct((L, B, S, D), jnp.float32),
        scratch_shapes=[pltpu.VMEM((S, D), jnp.float32)],
        compiler_params=pltpu.CompilerParams(
            dimension_semantics=("parallel", "arbitrary")),
    )(patches, p["patch_w"], p["patch_b"], p["cls_token"], p["pos_embed"],
      p["enc_ln"], p["enc_qkv_w"], p["enc_qkv_b"], p["enc_proj_w"], p["enc_proj_b"],
      p["enc_fc1_w"], p["enc_fc1_b"], p["enc_fc2_w"], p["enc_fc2_b"])


# --------------------------- fused ATM decoder stage --------------------------

def _decoder_kernel(feat_ref, inw_ref, inaff_ref, query_ref, clsw_ref, clsb_ref,
                    saqkv_w_ref, saqkv_b_ref, saout_w_ref, saout_b_ref,
                    caqkv_w_ref, caqkv_b_ref, caproj_w_ref, caproj_b_ref,
                    ff1_w_ref, ff1_b_ref, ff2_w_ref, ff2_b_ref, ln_ref,
                    cls_out_ref, attn_out_ref, q_scr, mem_scr, *, num_heads):
    stage = pl.program_id(1)
    layer = pl.program_id(2)
    Dd = q_scr.shape[-1]

    @pl.when(jnp.logical_and(stage == 0, layer == 0))
    def _init_queries():
        q_scr[...] = query_ref[...].astype(jnp.float32)

    # per-stage lateral: input projection + LN into VMEM-resident memory
    @pl.when(layer == 0)
    def _project_lateral():
        aff = inaff_ref[0]                                   # (3, Dd): [bias, gamma, beta]
        lat = _mm(feat_ref[0, 0], inw_ref[0]) + aff[0:1, :]
        mem_scr[...] = _layer_norm(lat, aff[1:2, :], aff[2:3, :])

    q = q_scr[...]                                           # (nq, Dd)
    mem = mem_scr[...]                                       # (hw, Dd)
    ln = ln_ref[0, 0]                                        # (6, Dd)

    # 1) self-attention over queries (post-norm, torch TransformerDecoderLayer style)
    qkv = _mm(q, saqkv_w_ref[0, 0]) + saqkv_b_ref[0, 0]      # (nq, 3Dd)
    o, _ = _mha_proj(qkv[:, 0:Dd], qkv[:, Dd:2 * Dd], qkv[:, 2 * Dd:3 * Dd],
                     saout_w_ref[0, 0], saout_b_ref[0, 0],
                     num_heads=num_heads, want_scores=False)
    q = _layer_norm(q + o, ln[0:1, :], ln[1:2, :])

    # 2) ATM cross-attention: output + head-averaged PRE-softmax similarity (the mask)
    caw = caqkv_w_ref[0, 0]                                  # (Dd, 3Dd) bf16
    cab = caqkv_b_ref[0, 0]                                  # (1, 3Dd)  f32
    cq = _mm(q, caw[:, 0:Dd]) + cab[:, 0:Dd]
    ck = _mm(mem, caw[:, Dd:2 * Dd]) + cab[:, Dd:2 * Dd]
    cv = _mm(mem, caw[:, 2 * Dd:3 * Dd]) + cab[:, 2 * Dd:3 * Dd]
    o, attn = _mha_proj(cq, ck, cv, caproj_w_ref[0, 0], caproj_b_ref[0, 0],
                        num_heads=num_heads, want_scores=True)
    q = _layer_norm(q + o, ln[2:3, :], ln[3:4, :])

    # 3) feed-forward (ReLU, torch default)
    ff = jnp.maximum(_mm(q, ff1_w_ref[0, 0]) + ff1_b_ref[0, 0], 0.0)
    q = _layer_norm(q + _mm(ff, ff2_w_ref[0, 0]) + ff2_b_ref[0, 0],
                    ln[4:5, :], ln[5:6, :])

    q_scr[...] = q
    # fused class head + ATM mask; the write of the last decoder layer in a stage
    # is the one that lands in HBM (output block resident across the layer axis).
    cls_out_ref[0, 0] = (_mm(q, clsw_ref[...]) + clsb_ref[...]).astype(cls_out_ref.dtype)
    attn_out_ref[0, 0] = attn.astype(attn_out_ref.dtype)


# ----------------------- semantic-inference epilogue --------------------------

def _seg_inference_kernel(cls_ref, mask_ref, out_ref):
    cls_t = cls_ref[0].astype(jnp.float32)                   # (nc, nq) softmax'd probs^T
    m = mask_ref[0].astype(jnp.float32)                      # (nq, HW)
    m = 1.0 / (1.0 + jnp.exp(-m))                            # sigmoid fused with the matmul
    out_ref[0] = jnp.dot(cls_t.astype(jnp.bfloat16), m.astype(jnp.bfloat16),
                         preferred_element_type=jnp.float32).astype(out_ref.dtype)


def atm_head(feats, p, cfg):
    L, B, S, D = feats.shape
    Dd, nq, img = cfg["dec_dim"], cfg["num_classes"], cfg["img_size"]
    use_stages, Lps = cfg["use_stages"], cfg["dec_layers_per_stage"]
    hw = S - 1
    h = w = int(math.isqrt(hw))
    ffd = 4 * Dd
    nc1 = nq + 1

    # stage features: out_indices order, first `use_stages`, deepest first, cls dropped
    outs = jnp.stack([feats[i] for i in cfg["out_indices"]], axis=0)[:use_stages]
    lat = outs[::-1][:, :, :hw, :]                            # (use_stages, B, hw, D)

    cls_logits, attns = pl.pallas_call(
        functools.partial(_decoder_kernel, num_heads=cfg["dec_heads"]),
        grid=(B, use_stages, Lps),
        in_specs=[
            pl.BlockSpec((1, 1, hw, D), lambda b, s, l: (s, b, 0, 0)),
            pl.BlockSpec((1, D, Dd), lambda b, s, l: (s, 0, 0)),
            pl.BlockSpec((1, 3, Dd), lambda b, s, l: (s, 0, 0)),
            pl.BlockSpec((nq, Dd), lambda b, s, l: (0, 0)),
            pl.BlockSpec((Dd, nc1), lambda b, s, l: (0, 0)),
            pl.BlockSpec((1, nc1), lambda b, s, l: (0, 0)),
            pl.BlockSpec((1, 1, Dd, 3 * Dd), lambda b, s, l: (s, l, 0, 0)),
            pl.BlockSpec((1, 1, 1, 3 * Dd), lambda b, s, l: (s, l, 0, 0)),
            pl.BlockSpec((1, 1, Dd, Dd), lambda b, s, l: (s, l, 0, 0)),
            pl.BlockSpec((1, 1, 1, Dd), lambda b, s, l: (s, l, 0, 0)),
            pl.BlockSpec((1, 1, Dd, 3 * Dd), lambda b, s, l: (s, l, 0, 0)),
            pl.BlockSpec((1, 1, 1, 3 * Dd), lambda b, s, l: (s, l, 0, 0)),
            pl.BlockSpec((1, 1, Dd, Dd), lambda b, s, l: (s, l, 0, 0)),
            pl.BlockSpec((1, 1, 1, Dd), lambda b, s, l: (s, l, 0, 0)),
            pl.BlockSpec((1, 1, Dd, ffd), lambda b, s, l: (s, l, 0, 0)),
            pl.BlockSpec((1, 1, 1, ffd), lambda b, s, l: (s, l, 0, 0)),
            pl.BlockSpec((1, 1, ffd, Dd), lambda b, s, l: (s, l, 0, 0)),
            pl.BlockSpec((1, 1, 1, Dd), lambda b, s, l: (s, l, 0, 0)),
            pl.BlockSpec((1, 1, 6, Dd), lambda b, s, l: (s, l, 0, 0)),
        ],
        out_specs=(
            pl.BlockSpec((1, 1, nq, nc1), lambda b, s, l: (s, b, 0, 0)),
            pl.BlockSpec((1, 1, nq, hw), lambda b, s, l: (s, b, 0, 0)),
        ),
        out_shape=(
            jax.ShapeDtypeStruct((use_stages, B, nq, nc1), jnp.float32),
            jax.ShapeDtypeStruct((use_stages, B, nq, hw), jnp.float32),
        ),
        scratch_shapes=[pltpu.VMEM((nq, Dd), jnp.float32),
                        pltpu.VMEM((hw, Dd), jnp.float32)],
        compiler_params=pltpu.CompilerParams(
            dimension_semantics=("parallel", "arbitrary", "arbitrary")),
    )(lat, p["in_proj_w"], p["in_aff"], p["query"], p["class_w"], p["class_b"],
      p["sa_qkv_w"], p["sa_qkv_b"], p["sa_out_w"], p["sa_out_b"],
      p["ca_qkv_w"], p["ca_qkv_b"], p["ca_proj_w"], p["ca_proj_b"],
      p["ff1_w"], p["ff1_b"], p["ff2_w"], p["ff2_b"], p["dec_ln"])

    # cumulative mask maps (stage-wise running sum)
    seg_cum = jnp.cumsum(attns, axis=0)                       # (stages, B, nq, hw)
    pred_logits = cls_logits[-1]
    # TODO(synk): bilinear upsample (align_corners=False) stays in XLA; no clean Pallas equivalent.
    pred_masks = jax.image.resize(seg_cum[-1].reshape(B, nq, h, w),
                                  (B, nq, img, img), method="bilinear")

    # semantic inference einsum("bqc,bqhw->bchw"); sigmoid fused into the Pallas bmm,
    # the tiny (B,nq,nq+1) softmax/transpose stays in XLA glue.
    cls_prob_t = jnp.transpose(jax.nn.softmax(pred_logits, axis=-1)[..., :-1], (0, 2, 1))
    pred = pl.pallas_call(
        _seg_inference_kernel,
        grid=(B,),
        in_specs=[
            pl.BlockSpec((1, nq, nq), lambda b: (b, 0, 0)),
            pl.BlockSpec((1, nq, img * img), lambda b: (b, 0, 0)),
        ],
        out_specs=pl.BlockSpec((1, nq, img * img), lambda b: (b, 0, 0)),
        out_shape=jax.ShapeDtypeStruct((B, nq, img * img), jnp.float32),
        compiler_params=pltpu.CompilerParams(dimension_semantics=("parallel",)),
    )(cls_prob_t, pred_masks.reshape(B, nq, img * img))
    pred = pred.reshape(B, nq, img, img)      # valid because num_classes == num_queries here

    aux = [{"pred_logits": cls_logits[i], "pred_masks": seg_cum[i].reshape(B, nq, h, w)}
           for i in range(use_stages - 1)]
    return {"pred_logits": pred_logits, "pred_masks": pred_masks, "pred": pred,
            "aux_outputs": aux}


def forward(x, params, cfg):
    feats = vit_encoder(x, params, cfg)       # (L, B, S, D) per-layer token slabs
    return atm_head(feats, params, cfg)       # training-mode output dict


# --------------------------- deterministic params ----------------------------

def init_params(key, cfg):
    D, Dd = cfg["enc_dim"], cfg["dec_dim"]
    P, C = cfg["patch_size"], cfg["in_ch"]
    L = cfg["enc_layers"]
    St, Lps = cfg["use_stages"], cfg["dec_layers_per_stage"]
    nq = cfg["num_classes"]
    mlp = cfg["mlp_ratio"] * D
    ffd = 4 * Dd
    S = (cfg["img_size"] // P) ** 2 + 1

    kit = iter(jax.random.split(key, 32))
    nrm = lambda shape, std=0.02: (std * jax.random.normal(next(kit), shape)).astype(jnp.float32)
    bf = lambda shape: nrm(shape).astype(jnp.bfloat16)        # bf16 weight storage, f32 acc
    zeros = lambda shape: jnp.zeros(shape, jnp.float32)
    ones = lambda shape: jnp.ones(shape, jnp.float32)

    p = {
        "patch_w": bf((C * P * P, D)), "patch_b": zeros((1, D)),
        "cls_token": nrm((1, D)), "pos_embed": nrm((S, D)),
        # packed LN params per layer: rows [ln1_g, ln1_b, ln2_g, ln2_b]
        "enc_ln": jnp.stack([ones((L, D)), zeros((L, D)),
                             ones((L, D)), zeros((L, D))], axis=1),
        "enc_qkv_w": bf((L, D, 3 * D)), "enc_qkv_b": zeros((L, 1, 3 * D)),
        # out-proj kept f32 so per-head row slices stay 8-sublane aligned (cast at the MXU)
        "enc_proj_w": nrm((L, D, D)), "enc_proj_b": zeros((L, 1, D)),
        "enc_fc1_w": bf((L, D, mlp)), "enc_fc1_b": zeros((L, 1, mlp)),
        "enc_fc2_w": bf((L, mlp, D)), "enc_fc2_b": zeros((L, 1, D)),
        # decoder lateral projection + norm, packed as rows [bias, gamma, beta]
        "in_proj_w": bf((St, D, Dd)),
        "in_aff": jnp.stack([zeros((St, Dd)), ones((St, Dd)), zeros((St, Dd))], axis=1),
        "query": nrm((nq, Dd)),
        "class_w": bf((Dd, nq + 1)), "class_b": zeros((1, nq + 1)),
        "sa_qkv_w": bf((St, Lps, Dd, 3 * Dd)), "sa_qkv_b": zeros((St, Lps, 1, 3 * Dd)),
        "sa_out_w": nrm((St, Lps, Dd, Dd)), "sa_out_b": zeros((St, Lps, 1, Dd)),
        "ca_qkv_w": bf((St, Lps, Dd, 3 * Dd)), "ca_qkv_b": zeros((St, Lps, 1, 3 * Dd)),
        "ca_proj_w": nrm((St, Lps, Dd, Dd)), "ca_proj_b": zeros((St, Lps, 1, Dd)),
        "ff1_w": bf((St, Lps, Dd, ffd)), "ff1_b": zeros((St, Lps, 1, ffd)),
        "ff2_w": bf((St, Lps, ffd, Dd)), "ff2_b": zeros((St, Lps, 1, Dd)),
        # packed LN params per decoder layer: [ln1_g, ln1_b, ln2_g, ln2_b, ln3_g, ln3_b]
        "dec_ln": jnp.stack([ones((St, Lps, Dd)), zeros((St, Lps, Dd)),
                             ones((St, Lps, Dd)), zeros((St, Lps, Dd)),
                             ones((St, Lps, Dd)), zeros((St, Lps, Dd))], axis=2),
    }
    return p


# ---------------------------------- main --------------------------------------

if __name__ == "__main__":
    cfg = dict(
        img_size=16, patch_size=4, in_ch=3,
        enc_dim=32, enc_layers=3, enc_heads=4, mlp_ratio=4,
        out_indices=(0, 1, 2),
        dec_dim=32, dec_heads=4, use_stages=3, dec_layers_per_stage=1,
        num_classes=8,
    )
    key = jax.random.PRNGKey(0)
    pkey, xkey = jax.random.split(key)
    params = init_params(pkey, cfg)
    x = jax.random.normal(xkey, (2, cfg["in_ch"], cfg["img_size"], cfg["img_size"]),
                          dtype=jnp.float32)

    fwd = jax.jit(functools.partial(forward, cfg=cfg))
    out = fwd(x, params)
    out = jax.block_until_ready(out)

    B, N, img = x.shape[0], cfg["num_classes"], cfg["img_size"]
    assert out["pred_logits"].shape == (B, N, N + 1)
    assert out["pred_masks"].shape == (B, N, img, img)
    assert out["pred"].shape == (B, N, img, img)
    assert len(out["aux_outputs"]) == cfg["use_stages"] - 1
    assert bool(jnp.isfinite(out["pred_logits"]).all())
    assert bool(jnp.isfinite(out["pred_masks"]).all())
    assert bool(jnp.isfinite(out["pred"]).all())
    print("KERNEL_OK")
</pallas_src>

<mosaic_0001>
module attributes {stable_mosaic.version = 11 : i64} {
  func.func @_encoder_kernel(%arg0: i32, %arg1: i32, %arg2: memref<1x16x48xf32, #tpu.memory_space<vmem>>, %arg3: memref<48x32xbf16, #tpu.memory_space<vmem>>, %arg4: memref<1x32xf32, #tpu.memory_space<vmem>>, %arg5: memref<1x32xf32, #tpu.memory_space<vmem>>, %arg6: memref<17x32xf32, #tpu.memory_space<vmem>>, %arg7: memref<1x4x32xf32, #tpu.memory_space<vmem>>, %arg8: memref<1x32x96xbf16, #tpu.memory_space<vmem>>, %arg9: memref<1x1x96xf32, #tpu.memory_space<vmem>>, %arg10: memref<1x32x32xf32, #tpu.memory_space<vmem>>, %arg11: memref<1x1x32xf32, #tpu.memory_space<vmem>>, %arg12: memref<1x32x128xbf16, #tpu.memory_space<vmem>>, %arg13: memref<1x1x128xf32, #tpu.memory_space<vmem>>, %arg14: memref<1x128x32xbf16, #tpu.memory_space<vmem>>, %arg15: memref<1x1x32xf32, #tpu.memory_space<vmem>>, %arg16: memref<1x1x17x32xf32, #tpu.memory_space<vmem>>, %arg17: memref<17x32xf32, #tpu.memory_space<vmem>>) attributes {dimension_semantics = [#tpu.dimension_semantics<parallel>, #tpu.dimension_semantics<arbitrary>], iteration_bounds = array<i64: 2, 3>, scalar_prefetch = 0 : i64, scratch_operands = 1 : i64, tpu.core_type = #tpu.core_type<tc>, window_params = [{transform_indices = @transform_0, window_bounds = array<i64: 1, 16, 48>}, {pipeline_mode = #tpu.pipeline_mode<synchronous>, transform_indices = @transform_1, window_bounds = array<i64: 48, 32>}, {pipeline_mode = #tpu.pipeline_mode<synchronous>, transform_indices = @transform_2, window_bounds = array<i64: 1, 32>}, {pipeline_mode = #tpu.pipeline_mode<synchronous>, transform_indices = @transform_3, window_bounds = array<i64: 1, 32>}, {pipeline_mode = #tpu.pipeline_mode<synchronous>, transform_indices = @transform_4, window_bounds = array<i64: 17, 32>}, {transform_indices = @transform_5, window_bounds = array<i64: 1, 4, 32>}, {transform_indices = @transform_6, window_bounds = array<i64: 1, 32, 96>}, {transform_indices = @transform_7, window_bounds = array<i64: 1, 1, 96>}, {transform_indices = @transform_8, window_bounds = array<i64: 1, 32, 32>}, {transform_indices = @transform_9, window_bounds = array<i64: 1, 1, 32>}, {transform_indices = @transform_10, window_bounds = array<i64: 1, 32, 128>}, {transform_indices = @transform_11, window_bounds = array<i64: 1, 1, 128>}, {transform_indices = @transform_12, window_bounds = array<i64: 1, 128, 32>}, {transform_indices = @transform_13, window_bounds = array<i64: 1, 1, 32>}, {transform_indices = @transform_14, window_bounds = array<i64: 1, 1, 17, 32>}]} {
    %c0_i32 = arith.constant 0 : i32
    %0 = arith.cmpi eq, %arg1, %c0_i32 : i32
    %1 = arith.extui %0 : i1 to i32
    %c0_i32_0 = arith.constant 0 : i32
    %2 = arith.cmpi ne, %1, %c0_i32_0 : i32
    scf.if %2 {
      %c0_76 = arith.constant 0 : index
      %c0_77 = arith.constant 0 : index
      %c0_78 = arith.constant 0 : index
      %191 = vector.load %arg2[%c0_76, %c0_77, %c0_78] : memref<1x16x48xf32, #tpu.memory_space<vmem>>, vector<1x16x48xf32>
      %192 = vector.shape_cast %191 : vector<1x16x48xf32> to vector<16x48xf32>
      %c0_79 = arith.constant 0 : index
      %c0_80 = arith.constant 0 : index
      %193 = vector.load %arg3[%c0_79, %c0_80] : memref<48x32xbf16, #tpu.memory_space<vmem>>, vector<48x32xbf16>
      %194 = arith.truncf %192 : vector<16x48xf32> to vector<16x48xbf16>
      %cst_81 = arith.constant dense<0.000000e+00> : vector<16x32xf32>
      %195 = tpu.matmul %194, %193, %cst_81 {dimension_numbers = #tpu.dot_dimension_numbers<[1], [0], [0], [1], [0, 0, 1, 1], [], []>} : vector<16x48xbf16>, vector<48x32xbf16>, vector<16x32xf32> -> vector<16x32xf32>
      %c0_82 = arith.constant 0 : index
      %c0_83 = arith.constant 0 : index
      %196 = vector.load %arg4[%c0_82, %c0_83] : memref<1x32xf32, #tpu.memory_space<vmem>>, vector<1x32xf32>
      %197 = vector.broadcast %196 : vector<1x32xf32> to vector<16x32xf32>
      %198 = arith.addf %195, %197 : vector<16x32xf32>
      %c0_84 = arith.constant 0 : index
      %c0_85 = arith.constant 0 : index
      %199 = vector.load %arg6[%c0_84, %c0_85] : memref<17x32xf32, #tpu.memory_space<vmem>>, vector<16x32xf32>
      %200 = arith.addf %198, %199 : vector<16x32xf32>
      %c0_86 = arith.constant 0 : index
      %c0_87 = arith.constant 0 : index
      %201 = vector.load %arg17[%c0_86, %c0_87] : memref<17x32xf32, #tpu.memory_space<vmem>>, vector<16x32xf32>
      tpu.vector_store %arg17[%c0_86, %c0_87], %200 {strides = array<i32>} : memref<17x32xf32, #tpu.memory_space<vmem>>, vector<16x32xf32>,
      %c0_88 = arith.constant 0 : index
      %c0_89 = arith.constant 0 : index
      %202 = vector.load %arg5[%c0_88, %c0_89] : memref<1x32xf32, #tpu.memory_space<vmem>>, vector<1x32xf32>
      %c16 = arith.constant 16 : index
      %c0_90 = arith.constant 0 : index
      %203 = vector.load %arg6[%c16, %c0_90] : memref<17x32xf32, #tpu.memory_space<vmem>>, vector<1x32xf32>
      %204 = arith.addf %202, %203 : vector<1x32xf32>
      %c16_91 = arith.constant 16 : index
      %c0_92 = arith.constant 0 : index
      %205 = vector.load %arg17[%c16_91, %c0_92] : memref<17x32xf32, #tpu.memory_space<vmem>>, vector<1x32xf32>
      tpu.vector_store %arg17[%c16_91, %c0_92], %204 {strides = array<i32>} : memref<17x32xf32, #tpu.memory_space<vmem>>, vector<1x32xf32>,
    } else {
    }
    %c0 = arith.constant 0 : index
    %c0_1 = arith.constant 0 : index
    %3 = vector.load %arg17[%c0, %c0_1] : memref<17x32xf32, #tpu.memory_space<vmem>>, vector<17x32xf32>
    %c0_2 = arith.constant 0 : index
    %c0_3 = arith.constant 0 : index
    %c0_4 = arith.constant 0 : index
    %4 = vector.load %arg7[%c0_2, %c0_3, %c0_4] : memref<1x4x32xf32, #tpu.memory_space<vmem>>, vector<1x4x32xf32>
    %5 = vector.shape_cast %4 : vector<1x4x32xf32> to vector<4x32xf32>
    %6 = vector.extract_strided_slice %5 {offsets = [0, 0], sizes = [1, 32], strides = [1, 1]} : vector<4x32xf32> to vector<1x32xf32>
    %7 = vector.extract_strided_slice %5 {offsets = [1, 0], sizes = [1, 32], strides = [1, 1]} : vector<4x32xf32> to vector<1x32xf32>
    %cst = arith.constant dense<0.000000e+00> : vector<17xf32>
    %8 = vector.multi_reduction <add>, %3, %cst [1] : vector<17x32xf32> to vector<17xf32>
    %9 = vector.shape_cast %8 : vector<17xf32> to vector<17x1xf32>
    %cst_5 = arith.constant 3.200000e+01 : f32
    %10 = vector.broadcast %cst_5 : f32 to vector<17x1xf32>
    %11 = arith.divf %9, %10 : vector<17x1xf32>
    %12 = vector.broadcast %11 : vector<17x1xf32> to vector<17x32xf32>
    %13 = arith.subf %3, %12 : vector<17x32xf32>
    %14 = arith.mulf %13, %13 : vector<17x32xf32>
    %cst_6 = arith.constant dense<0.000000e+00> : vector<17xf32>
    %15 = vector.multi_reduction <add>, %14, %cst_6 [1] : vector<17x32xf32> to vector<17xf32>
    %16 = vector.shape_cast %15 : vector<17xf32> to vector<17x1xf32>
    %cst_7 = arith.constant 3.200000e+01 : f32
    %17 = vector.broadcast %cst_7 : f32 to vector<17x1xf32>
    %18 = arith.divf %16, %17 : vector<17x1xf32>
    %19 = vector.broadcast %11 : vector<17x1xf32> to vector<17x32xf32>
    %20 = arith.subf %3, %19 : vector<17x32xf32>
    %cst_8 = arith.constant 9.99999974E-6 : f32
    %21 = vector.broadcast %cst_8 : f32 to vector<17x1xf32>
    %22 = arith.addf %18, %21 : vector<17x1xf32>
    %23 = math.rsqrt %22 : vector<17x1xf32>
    %24 = vector.broadcast %23 : vector<17x1xf32> to vector<17x32xf32>
    %25 = arith.mulf %20, %24 : vector<17x32xf32>
    %26 = vector.broadcast %6 : vector<1x32xf32> to vector<17x32xf32>
    %27 = arith.mulf %25, %26 : vector<17x32xf32>
    %28 = vector.broadcast %7 : vector<1x32xf32> to vector<17x32xf32>
    %29 = arith.addf %27, %28 : vector<17x32xf32>
    %c0_9 = arith.constant 0 : index
    %c0_10 = arith.constant 0 : index
    %c0_11 = arith.constant 0 : index
    %30 = vector.load %arg8[%c0_9, %c0_10, %c0_11] : memref<1x32x96xbf16, #tpu.memory_space<vmem>>, vector<1x32x96xbf16>
    %31 = vector.shape_cast %30 : vector<1x32x96xbf16> to vector<32x96xbf16>
    %32 = arith.truncf %29 : vector<17x32xf32> to vector<17x32xbf16>
    %cst_12 = arith.constant dense<0.000000e+00> : vector<17x96xf32>
    %33 = tpu.matmul %32, %31, %cst_12 {dimension_numbers = #tpu.dot_dimension_numbers<[1], [0], [0], [1], [0, 0, 1, 1], [], []>} : vector<17x32xbf16>, vector<32x96xbf16>, vector<17x96xf32> -> vector<17x96xf32>
    %c0_13 = arith.constant 0 : index
    %c0_14 = arith.constant 0 : index
    %c0_15 = arith.constant 0 : index
    %34 = vector.load %arg9[%c0_13, %c0_14, %c0_15] : memref<1x1x96xf32, #tpu.memory_space<vmem>>, vector<1x1x96xf32>
    %35 = vector.shape_cast %34 : vector<1x1x96xf32> to vector<1x96xf32>
    %36 = vector.broadcast %35 : vector<1x96xf32> to vector<17x96xf32>
    %37 = arith.addf %33, %36 : vector<17x96xf32>
    %38 = vector.extract_strided_slice %37 {offsets = [0, 0], sizes = [17, 32], strides = [1, 1]} : vector<17x96xf32> to vector<17x32xf32>
    %39 = vector.extract_strided_slice %37 {offsets = [0, 32], sizes = [17, 32], strides = [1, 1]} : vector<17x96xf32> to vector<17x32xf32>
    %40 = vector.extract_strided_slice %37 {offsets = [0, 64], sizes = [17, 32], strides = [1, 1]} : vector<17x96xf32> to vector<17x32xf32>
    %c0_16 = arith.constant 0 : index
    %c0_17 = arith.constant 0 : index
    %c0_18 = arith.constant 0 : index
    %41 = vector.load %arg10[%c0_16, %c0_17, %c0_18] : memref<1x32x32xf32, #tpu.memory_space<vmem>>, vector<1x32x32xf32>
    %42 = vector.shape_cast %41 : vector<1x32x32xf32> to vector<32x32xf32>
    %c0_19 = arith.constant 0 : index
    %c0_20 = arith.constant 0 : index
    %c0_21 = arith.constant 0 : index
    %43 = vector.load %arg11[%c0_19, %c0_20, %c0_21] : memref<1x1x32xf32, #tpu.memory_space<vmem>>, vector<1x1x32xf32>
    %44 = vector.shape_cast %43 : vector<1x1x32xf32> to vector<1x32xf32>
    %cst_22 = arith.constant 0.000000e+00 : f32
    %45 = vector.broadcast %cst_22 : f32 to vector<17x32xf32>
    %46 = vector.extract_strided_slice %38 {offsets = [0, 0], sizes = [17, 8], strides = [1, 1]} : vector<17x32xf32> to vector<17x8xf32>
    %47 = vector.extract_strided_slice %39 {offsets = [0, 0], sizes = [17, 8], strides = [1, 1]} : vector<17x32xf32> to vector<17x8xf32>
    %48 = vector.extract_strided_slice %40 {offsets = [0, 0], sizes = [17, 8], strides = [1, 1]} : vector<17x32xf32> to vector<17x8xf32>
    %cst_23 = arith.constant dense<0.000000e+00> : vector<17x17xf32>
    %49 = tpu.matmul %46, %47, %cst_23 {dimension_numbers = #tpu.dot_dimension_numbers<[1], [1], [0], [0], [0, 0, 1, 0], [], []>} : vector<17x8xf32>, vector<17x8xf32>, vector<17x17xf32> -> vector<17x17xf32>
    %cst_24 = arith.constant 0.353553385 : f32
    %50 = vector.broadcast %cst_24 : f32 to vector<17x17xf32>
    %51 = arith.mulf %49, %50 : vector<17x17xf32>
    %cst_25 = arith.constant dense<0xFF800000> : vector<17xf32>
    %52 = vector.multi_reduction <maximumf>, %51, %cst_25 [1] : vector<17x17xf32> to vector<17xf32>
    %53 = vector.shape_cast %52 : vector<17xf32> to vector<17x1xf32>
    %54 = vector.broadcast %53 : vector<17x1xf32> to vector<17x17xf32>
    %55 = arith.subf %51, %54 : vector<17x17xf32>
    %56 = math.exp %55 : vector<17x17xf32>
    %cst_26 = arith.constant dense<0.000000e+00> : vector<17xf32>
    %57 = vector.multi_reduction <add>, %56, %cst_26 [1] : vector<17x17xf32> to vector<17xf32>
    %58 = vector.shape_cast %57 : vector<17xf32> to vector<17x1xf32>
    %59 = vector.broadcast %58 : vector<17x1xf32> to vector<17x17xf32>
    %60 = arith.divf %56, %59 : vector<17x17xf32>
    %cst_27 = arith.constant dense<0.000000e+00> : vector<17x8xf32>
    %61 = tpu.matmul %60, %48, %cst_27 {dimension_numbers = #tpu.dot_dimension_numbers<[1], [0], [0], [1], [0, 0, 1, 1], [], []>} : vector<17x17xf32>, vector<17x8xf32>, vector<17x8xf32> -> vector<17x8xf32>
    %62 = vector.extract_strided_slice %42 {offsets = [0, 0], sizes = [8, 32], strides = [1, 1]} : vector<32x32xf32> to vector<8x32xf32>
    %63 = arith.truncf %61 : vector<17x8xf32> to vector<17x8xbf16>
    %64 = arith.truncf %62 : vector<8x32xf32> to vector<8x32xbf16>
    %cst_28 = arith.constant dense<0.000000e+00> : vector<17x32xf32>
    %65 = tpu.matmul %63, %64, %cst_28 {dimension_numbers = #tpu.dot_dimension_numbers<[1], [0], [0], [1], [0, 0, 1, 1], [], []>} : vector<17x8xbf16>, vector<8x32xbf16>, vector<17x32xf32> -> vector<17x32xf32>
    %66 = arith.addf %45, %65 : vector<17x32xf32>
    %67 = vector.extract_strided_slice %38 {offsets = [0, 8], sizes = [17, 8], strides = [1, 1]} : vector<17x32xf32> to vector<17x8xf32>
    %68 = vector.extract_strided_slice %39 {offsets = [0, 8], sizes = [17, 8], strides = [1, 1]} : vector<17x32xf32> to vector<17x8xf32>
    %69 = vector.extract_strided_slice %40 {offsets = [0, 8], sizes = [17, 8], strides = [1, 1]} : vector<17x32xf32> to vector<17x8xf32>
    %cst_29 = arith.constant dense<0.000000e+00> : vector<17x17xf32>
    %70 = tpu.matmul %67, %68, %cst_29 {dimension_numbers = #tpu.dot_dimension_numbers<[1], [1], [0], [0], [0, 0, 1, 0], [], []>} : vector<17x8xf32>, vector<17x8xf32>, vector<17x17xf32> -> vector<17x17xf32>
    %cst_30 = arith.constant 0.353553385 : f32
    %71 = vector.broadcast %cst_30 : f32 to vector<17x17xf32>
    %72 = arith.mulf %70, %71 : vector<17x17xf32>
    %cst_31 = arith.constant dense<0xFF800000> : vector<17xf32>
    %73 = vector.multi_reduction <maximumf>, %72, %cst_31 [1] : vector<17x17xf32> to vector<17xf32>
    %74 = vector.shape_cast %73 : vector<17xf32> to vector<17x1xf32>
    %75 = vector.broadcast %74 : vector<17x1xf32> to vector<17x17xf32>
    %76 = arith.subf %72, %75 : vector<17x17xf32>
    %77 = math.exp %76 : vector<17x17xf32>
    %cst_32 = arith.constant dense<0.000000e+00> : vector<17xf32>
    %78 = vector.multi_reduction <add>, %77, %cst_32 [1] : vector<17x17xf32> to vector<17xf32>
    %79 = vector.shape_cast %78 : vector<17xf32> to vector<17x1xf32>
    %80 = vector.broadcast %79 : vector<17x1xf32> to vector<17x17xf32>
    %81 = arith.divf %77, %80 : vector<17x17xf32>
    %cst_33 = arith.constant dense<0.000000e+00> : vector<17x8xf32>
    %82 = tpu.matmul %81, %69, %cst_33 {dimension_numbers = #tpu.dot_dimension_numbers<[1], [0], [0], [1], [0, 0, 1, 1], [], []>} : vector<17x17xf32>, vector<17x8xf32>, vector<17x8xf32> -> vector<17x8xf32>
    %83 = vector.extract_strided_slice %42 {offsets = [8, 0], sizes = [8, 32], strides = [1, 1]} : vector<32x32xf32> to vector<8x32xf32>
    %84 = arith.truncf %82 : vector<17x8xf32> to vector<17x8xbf16>
    %85 = arith.truncf %83 : vector<8x32xf32> to vector<8x32xbf16>
    %cst_34 = arith.constant dense<0.000000e+00> : vector<17x32xf32>
    %86 = tpu.matmul %84, %85, %cst_34 {dimension_numbers = #tpu.dot_dimension_numbers<[1], [0], [0], [1], [0, 0, 1, 1], [], []>} : vector<17x8xbf16>, vector<8x32xbf16>, vector<17x32xf32> -> vector<17x32xf32>
    %87 = arith.addf %66, %86 : vector<17x32xf32>
    %88 = vector.extract_strided_slice %38 {offsets = [0, 16], sizes = [17, 8], strides = [1, 1]} : vector<17x32xf32> to vector<17x8xf32>
    %89 = vector.extract_strided_slice %39 {offsets = [0, 16], sizes = [17, 8], strides = [1, 1]} : vector<17x32xf32> to vector<17x8xf32>
    %90 = vector.extract_strided_slice %40 {offsets = [0, 16], sizes = [17, 8], strides = [1, 1]} : vector<17x32xf32> to vector<17x8xf32>
    %cst_35 = arith.constant dense<0.000000e+00> : vector<17x17xf32>
    %91 = tpu.matmul %88, %89, %cst_35 {dimension_numbers = #tpu.dot_dimension_numbers<[1], [1], [0], [0], [0, 0, 1, 0], [], []>} : vector<17x8xf32>, vector<17x8xf32>, vector<17x17xf32> -> vector<17x17xf32>
    %cst_36 = arith.constant 0.353553385 : f32
    %92 = vector.broadcast %cst_36 : f32 to vector<17x17xf32>
    %93 = arith.mulf %91, %92 : vector<17x17xf32>
    %cst_37 = arith.constant dense<0xFF800000> : vector<17xf32>
    %94 = vector.multi_reduction <maximumf>, %93, %cst_37 [1] : vector<17x17xf32> to vector<17xf32>
    %95 = vector.shape_cast %94 : vector<17xf32> to vector<17x1xf32>
    %96 = vector.broadcast %95 : vector<17x1xf32> to vector<17x17xf32>
    %97 = arith.subf %93, %96 : vector<17x17xf32>
    %98 = math.exp %97 : vector<17x17xf32>
    %cst_38 = arith.constant dense<0.000000e+00> : vector<17xf32>
    %99 = vector.multi_reduction <add>, %98, %cst_38 [1] : vector<17x17xf32> to vector<17xf32>
    %100 = vector.shape_cast %99 : vector<17xf32> to vector<17x1xf32>
    %101 = vector.broadcast %100 : vector<17x1xf32> to vector<17x17xf32>
    %102 = arith.divf %98, %101 : vector<17x17xf32>
    %cst_39 = arith.constant dense<0.000000e+00> : vector<17x8xf32>
    %103 = tpu.matmul %102, %90, %cst_39 {dimension_numbers = #tpu.dot_dimension_numbers<[1], [0], [0], [1], [0, 0, 1, 1], [], []>} : vector<17x17xf32>, vector<17x8xf32>, vector<17x8xf32> -> vector<17x8xf32>
    %104 = vector.extract_strided_slice %42 {offsets = [16, 0], sizes = [8, 32], strides = [1, 1]} : vector<32x32xf32> to vector<8x32xf32>
    %105 = arith.truncf %103 : vector<17x8xf32> to vector<17x8xbf16>
    %106 = arith.truncf %104 : vector<8x32xf32> to vector<8x32xbf16>
    %cst_40 = arith.constant dense<0.000000e+00> : vector<17x32xf32>
    %107 = tpu.matmul %105, %106, %cst_40 {dimension_numbers = #tpu.dot_dimension_numbers<[1], [0], [0], [1], [0, 0, 1, 1], [], []>} : vector<17x8xbf16>, vector<8x32xbf16>, vector<17x32xf32> -> vector<17x32xf32>
    %108 = arith.addf %87, %107 : vector<17x32xf32>
    %109 = vector.extract_strided_slice %38 {offsets = [0, 24], sizes = [17, 8], strides = [1, 1]} : vector<17x32xf32> to vector<17x8xf32>
    %110 = vector.extract_strided_slice %39 {offsets = [0, 24], sizes = [17, 8], strides = [1, 1]} : vector<17x32xf32> to vector<17x8xf32>
    %111 = vector.extract_strided_slice %40 {offsets = [0, 24], sizes = [17, 8], strides = [1, 1]} : vector<17x32xf32> to vector<17x8xf32>
    %cst_41 = arith.constant dense<0.000000e+00> : vector<17x17xf32>
    %112 = tpu.matmul %109, %110, %cst_41 {dimension_numbers = #tpu.dot_dimension_numbers<[1], [1], [0], [0], [0, 0, 1, 0], [], []>} : vector<17x8xf32>, vector<17x8xf32>, vector<17x17xf32> -> vector<17x17xf32>
    %cst_42 = arith.constant 0.353553385 : f32
    %113 = vector.broadcast %cst_42 : f32 to vector<17x17xf32>
    %114 = arith.mulf %112, %113 : vector<17x17xf32>
    %cst_43 = arith.constant dense<0xFF800000> : vector<17xf32>
    %115 = vector.multi_reduction <maximumf>, %114, %cst_43 [1] : vector<17x17xf32> to vector<17xf32>
    %116 = vector.shape_cast %115 : vector<17xf32> to vector<17x1xf32>
    %117 = vector.broadcast %116 : vector<17x1xf32> to vector<17x17xf32>
    %118 = arith.subf %114, %117 : vector<17x17xf32>
    %119 = math.exp %118 : vector<17x17xf32>
    %cst_44 = arith.constant dense<0.000000e+00> : vector<17xf32>
    %120 = vector.multi_reduction <add>, %119, %cst_44 [1] : vector<17x17xf32> to vector<17xf32>
    %121 = vector.shape_cast %120 : vector<17xf32> to vector<17x1xf32>
    %122 = vector.broadcast %121 : vector<17x1xf32> to vector<17x17xf32>
    %123 = arith.divf %119, %122 : vector<17x17xf32>
    %cst_45 = arith.constant dense<0.000000e+00> : vector<17x8xf32>
    %124 = tpu.matmul %123, %111, %cst_45 {dimension_numbers = #tpu.dot_dimension_numbers<[1], [0], [0], [1], [0, 0, 1, 1], [], []>} : vector<17x17xf32>, vector<17x8xf32>, vector<17x8xf32> -> vector<17x8xf32>
    %125 = vector.extract_strided_slice %42 {offsets = [24, 0], sizes = [8, 32], strides = [1, 1]} : vector<32x32xf32> to vector<8x32xf32>
    %126 = arith.truncf %124 : vector<17x8xf32> to vector<17x8xbf16>
    %127 = arith.truncf %125 : vector<8x32xf32> to vector<8x32xbf16>
    %cst_46 = arith.constant dense<0.000000e+00> : vector<17x32xf32>
    %128 = tpu.matmul %126, %127, %cst_46 {dimension_numbers = #tpu.dot_dimension_numbers<[1], [0], [0], [1], [0, 0, 1, 1], [], []>} : vector<17x8xbf16>, vector<8x32xbf16>, vector<17x32xf32> -> vector<17x32xf32>
    %129 = arith.addf %108, %128 : vector<17x32xf32>
    %130 = vector.broadcast %44 : vector<1x32xf32> to vector<17x32xf32>
    %131 = arith.addf %129, %130 : vector<17x32xf32>
    %132 = arith.addf %3, %131 : vector<17x32xf32>
    %133 = vector.extract_strided_slice %5 {offsets = [2, 0], sizes = [1, 32], strides = [1, 1]} : vector<4x32xf32> to vector<1x32xf32>
    %134 = vector.extract_strided_slice %5 {offsets = [3, 0], sizes = [1, 32], strides = [1, 1]} : vector<4x32xf32> to vector<1x32xf32>
    %cst_47 = arith.constant dense<0.000000e+00> : vector<17xf32>
    %135 = vector.multi_reduction <add>, %132, %cst_47 [1] : vector<17x32xf32> to vector<17xf32>
    %136 = vector.shape_cast %135 : vector<17xf32> to vector<17x1xf32>
    %cst_48 = arith.constant 3.200000e+01 : f32
    %137 = vector.broadcast %cst_48 : f32 to vector<17x1xf32>
    %138 = arith.divf %136, %137 : vector<17x1xf32>
    %139 = vector.broadcast %138 : vector<17x1xf32> to vector<17x32xf32>
    %140 = arith.subf %132, %139 : vector<17x32xf32>
    %141 = arith.mulf %140, %140 : vector<17x32xf32>
    %cst_49 = arith.constant dense<0.000000e+00> : vector<17xf32>
    %142 = vector.multi_reduction <add>, %141, %cst_49 [1] : vector<17x32xf32> to vector<17xf32>
    %143 = vector.shape_cast %142 : vector<17xf32> to vector<17x1xf32>
    %cst_50 = arith.constant 3.200000e+01 : f32
    %144 = vector.broadcast %cst_50 : f32 to vector<17x1xf32>
    %145 = arith.divf %143, %144 : vector<17x1xf32>
    %146 = vector.broadcast %138 : vector<17x1xf32> to vector<17x32xf32>
    %147 = arith.subf %132, %146 : vector<17x32xf32>
    %cst_51 = arith.constant 9.99999974E-6 : f32
    %148 = vector.broadcast %cst_51 : f32 to vector<17x1xf32>
    %149 = arith.addf %145, %148 : vector<17x1xf32>
    %150 = math.rsqrt %149 : vector<17x1xf32>
    %151 = vector.broadcast %150 : vector<17x1xf32> to vector<17x32xf32>
    %152 = arith.mulf %147, %151 : vector<17x32xf32>
    %153 = vector.broadcast %133 : vector<1x32xf32> to vector<17x32xf32>
    %154 = arith.mulf %152, %153 : vector<17x32xf32>
    %155 = vector.broadcast %134 : vector<1x32xf32> to vector<17x32xf32>
    %156 = arith.addf %154, %155 : vector<17x32xf32>
    %c0_52 = arith.constant 0 : index
    %c0_53 = arith.constant 0 : index
    %c0_54 = arith.constant 0 : index
    %157 = vector.load %arg12[%c0_52, %c0_53, %c0_54] : memref<1x32x128xbf16, #tpu.memory_space<vmem>>, vector<1x32x128xbf16>
    %158 = vector.shape_cast %157 : vector<1x32x128xbf16> to vector<32x128xbf16>
    %159 = arith.truncf %156 : vector<17x32xf32> to vector<17x32xbf16>
    %cst_55 = arith.constant dense<0.000000e+00> : vector<17x128xf32>
    %160 = tpu.matmul %159, %158, %cst_55 {dimension_numbers = #tpu.dot_dimension_numbers<[1], [0], [0], [1], [0, 0, 1, 1], [], []>} : vector<17x32xbf16>, vector<32x128xbf16>, vector<17x128xf32> -> vector<17x128xf32>
    %c0_56 = arith.constant 0 : index
    %c0_57 = arith.constant 0 : index
    %c0_58 = arith.constant 0 : index
    %161 = vector.load %arg13[%c0_56, %c0_57, %c0_58] : memref<1x1x128xf32, #tpu.memory_space<vmem>>, vector<1x1x128xf32>
    %162 = vector.shape_cast %161 : vector<1x1x128xf32> to vector<1x128xf32>
    %163 = vector.broadcast %162 : vector<1x128xf32> to vector<17x128xf32>
    %164 = arith.addf %160, %163 : vector<17x128xf32>
    %cst_59 = arith.constant 5.000000e-01 : f32
    %165 = vector.broadcast %cst_59 : f32 to vector<17x128xf32>
    %166 = arith.mulf %165, %164 : vector<17x128xf32>
    %cst_60 = arith.constant 4.471500e-02 : f32
    %167 = vector.broadcast %cst_60 : f32 to vector<17x128xf32>
    %168 = arith.mulf %167, %164 : vector<17x128xf32>
    %169 = arith.mulf %168, %164 : vector<17x128xf32>
    %170 = arith.mulf %169, %164 : vector<17x128xf32>
    %171 = arith.addf %164, %170 : vector<17x128xf32>
    %cst_61 = arith.constant 0.797884583 : f32
    %172 = vector.broadcast %cst_61 : f32 to vector<17x128xf32>
    %173 = arith.mulf %172, %171 : vector<17x128xf32>
    %174 = math.tanh %173 : vector<17x128xf32>
    %cst_62 = arith.constant 1.000000e+00 : f32
    %175 = vector.broadcast %cst_62 : f32 to vector<17x128xf32>
    %176 = arith.addf %175, %174 : vector<17x128xf32>
    %177 = arith.mulf %166, %176 : vector<17x128xf32>
    %c0_63 = arith.constant 0 : index
    %c0_64 = arith.constant 0 : index
    %c0_65 = arith.constant 0 : index
    %178 = vector.load %arg14[%c0_63, %c0_64, %c0_65] : memref<1x128x32xbf16, #tpu.memory_space<vmem>>, vector<1x128x32xbf16>
    %179 = vector.shape_cast %178 : vector<1x128x32xbf16> to vector<128x32xbf16>
    %180 = arith.truncf %177 : vector<17x128xf32> to vector<17x128xbf16>
    %cst_66 = arith.constant dense<0.000000e+00> : vector<17x32xf32>
    %181 = tpu.matmul %180, %179, %cst_66 {dimension_numbers = #tpu.dot_dimension_numbers<[1], [0], [0], [1], [0, 0, 1, 1], [], []>} : vector<17x128xbf16>, vector<128x32xbf16>, vector<17x32xf32> -> vector<17x32xf32>
    %182 = arith.addf %132, %181 : vector<17x32xf32>
    %c0_67 = arith.constant 0 : index
    %c0_68 = arith.constant 0 : index
    %c0_69 = arith.constant 0 : index
    %183 = vector.load %arg15[%c0_67, %c0_68, %c0_69] : memref<1x1x32xf32, #tpu.memory_space<vmem>>, vector<1x1x32xf32>
    %184 = vector.shape_cast %183 : vector<1x1x32xf32> to vector<1x32xf32>
    %185 = vector.broadcast %184 : vector<1x32xf32> to vector<17x32xf32>
    %186 = arith.addf %182, %185 : vector<17x32xf32>
    %c0_70 = arith.constant 0 : index
    %c0_71 = arith.constant 0 : index
    %187 = vector.load %arg17[%c0_70, %c0_71] : memref<17x32xf32, #tpu.memory_space<vmem>>, vector<17x32xf32>
    tpu.vector_store %arg17[%c0_70, %c0_71], %186 {strides = array<i32>} : memref<17x32xf32, #tpu.memory_space<vmem>>, vector<17x32xf32>,
    %c0_72 = arith.constant 0 : index
    %c0_73 = arith.constant 0 : index
    %c0_74 = arith.constant 0 : index
    %c0_75 = arith.constant 0 : index
    %188 = vector.load %arg16[%c0_72, %c0_73, %c0_74, %c0_75] : memref<1x1x17x32xf32, #tpu.memory_space<vmem>>, vector<1x1x17x32xf32>
    %189 = vector.shape_cast %188 : vector<1x1x17x32xf32> to vector<17x32xf32>
    %190 = vector.shape_cast %186 : vector<17x32xf32> to vector<1x1x17x32xf32>
    tpu.vector_store %arg16[%c0_72, %c0_73, %c0_74, %c0_75], %190 {strides = array<i32>} : memref<1x1x17x32xf32, #tpu.memory_space<vmem>>, vector<1x1x17x32xf32>,
    return
  }
  func.func @transform_0(%arg0: i32, %arg1: i32) -> (i32, i32, i32) {
    %c0_i32 = arith.constant 0 : i32
    %c0_i32_0 = arith.constant 0 : i32
    %c0_i32_1 = arith.constant 0 : i32
    return %arg0, %c0_i32, %c0_i32_0 : i32, i32, i32
  }
  func.func @transform_1(%arg0: i32, %arg1: i32) -> (i32, i32) {
    %c0_i32 = arith.constant 0 : i32
    %c0_i32_0 = arith.constant 0 : i32
    %c0_i32_1 = arith.constant 0 : i32
    return %c0_i32, %c0_i32_0 : i32, i32
  }
  func.func @transform_2(%arg0: i32, %arg1: i32) -> (i32, i32) {
    %c0_i32 = arith.constant 0 : i32
    %c0_i32_0 = arith.constant 0 : i32
    %c0_i32_1 = arith.constant 0 : i32
    return %c0_i32, %c0_i32_0 : i32, i32
  }
  func.func @transform_3(%arg0: i32, %arg1: i32) -> (i32, i32) {
    %c0_i32 = arith.constant 0 : i32
    %c0_i32_0 = arith.constant 0 : i32
    %c0_i32_1 = arith.constant 0 : i32
    return %c0_i32, %c0_i32_0 : i32, i32
  }
  func.func @transform_4(%arg0: i32, %arg1: i32) -> (i32, i32) {
    %c0_i32 = arith.constant 0 : i32
    %c0_i32_0 = arith.constant 0 : i32
    %c0_i32_1 = arith.constant 0 : i32
    return %c0_i32, %c0_i32_0 : i32, i32
  }
  func.func @transform_5(%arg0: i32, %arg1: i32) -> (i32, i32, i32) {
    %c0_i32 = arith.constant 0 : i32
    %c0_i32_0 = arith.constant 0 : i32
    %c0_i32_1 = arith.constant 0 : i32
    return %arg1, %c0_i32, %c0_i32_0 : i32, i32, i32
  }
  func.func @transform_6(%arg0: i32, %arg1: i32) -> (i32, i32, i32) {
    %c0_i32 = arith.constant 0 : i32
    %c0_i32_0 = arith.constant 0 : i32
    %c0_i32_1 = arith.constant 0 : i32
    return %arg1, %c0_i32, %c0_i32_0 : i32, i32, i32
  }
  func.func @transform_7(%arg0: i32, %arg1: i32) -> (i32, i32, i32) {
    %c0_i32 = arith.constant 0 : i32
    %c0_i32_0 = arith.constant 0 : i32
    %c0_i32_1 = arith.constant 0 : i32
    return %arg1, %c0_i32, %c0_i32_0 : i32, i32, i32
  }
  func.func @transform_8(%arg0: i32, %arg1: i32) -> (i32, i32, i32) {
    %c0_i32 = arith.constant 0 : i32
    %c0_i32_0 = arith.constant 0 : i32
    %c0_i32_1 = arith.constant 0 : i32
    return %arg1, %c0_i32, %c0_i32_0 : i32, i32, i32
  }
  func.func @transform_9(%arg0: i32, %arg1: i32) -> (i32, i32, i32) {
    %c0_i32 = arith.constant 0 : i32
    %c0_i32_0 = arith.constant 0 : i32
    %c0_i32_1 = arith.constant 0 : i32
    return %arg1, %c0_i32, %c0_i32_0 : i32, i32, i32
  }
  func.func @transform_10(%arg0: i32, %arg1: i32) -> (i32, i32, i32) {
    %c0_i32 = arith.constant 0 : i32
    %c0_i32_0 = arith.constant 0 : i32
    %c0_i32_1 = arith.constant 0 : i32
    return %arg1, %c0_i32, %c0_i32_0 : i32, i32, i32
  }
  func.func @transform_11(%arg0: i32, %arg1: i32) -> (i32, i32, i32) {
    %c0_i32 = arith.constant 0 : i32
    %c0_i32_0 = arith.constant 0 : i32
    %c0_i32_1 = arith.constant 0 : i32
    return %arg1, %c0_i32, %c0_i32_0 : i32, i32, i32
  }
  func.func @transform_12(%arg0: i32, %arg1: i32) -> (i32, i32, i32) {
    %c0_i32 = arith.constant 0 : i32
    %c0_i32_0 = arith.constant 0 : i32
    %c0_i32_1 = arith.constant 0 : i32
    return %arg1, %c0_i32, %c0_i32_0 : i32, i32, i32
  }
  func.func @transform_13(%arg0: i32, %arg1: i32) -> (i32, i32, i32) {
    %c0_i32 = arith.constant 0 : i32
    %c0_i32_0 = arith.constant 0 : i32
    %c0_i32_1 = arith.constant 0 : i32
    return %arg1, %c0_i32, %c0_i32_0 : i32, i32, i32
  }
  func.func @transform_14(%arg0: i32, %arg1: i32) -> (i32, i32, i32, i32) {
    %c0_i32 = arith.constant 0 : i32
    %c0_i32_0 = arith.constant 0 : i32
    %c0_i32_1 = arith.constant 0 : i32
    return %arg1, %arg0, %c0_i32, %c0_i32_0 : i32, i32, i32, i32
  }
}

module attributes {stable_mosaic.version = 11 : i64} {
  func.func @_decoder_kernel(%arg0: i32, %arg1: i32, %arg2: i32, %arg3: memref<1x1x16x32xf32, #tpu.memory_space<vmem>>, %arg4: memref<1x32x32xbf16, #tpu.memory_space<vmem>>, %arg5: memref<1x3x32xf32, #tpu.memory_space<vmem>>, %arg6: memref<8x32xf32, #tpu.memory_space<vmem>>, %arg7: memref<32x9xbf16, #tpu.memory_space<vmem>>, %arg8: memref<1x9xf32, #tpu.memory_space<vmem>>, %arg9: memref<1x1x32x96xbf16, #tpu.memory_space<vmem>>, %arg10: memref<1x1x1x96xf32, #tpu.memory_space<vmem>>, %arg11: memref<1x1x32x32xf32, #tpu.memory_space<vmem>>, %arg12: memref<1x1x1x32xf32, #tpu.memory_space<vmem>>, %arg13: memref<1x1x32x96xbf16, #tpu.memory_space<vmem>>, %arg14: memref<1x1x1x96xf32, #tpu.memory_space<vmem>>, %arg15: memref<1x1x32x32xf32, #tpu.memory_space<vmem>>, %arg16: memref<1x1x1x32xf32, #tpu.memory_space<vmem>>, %arg17: memref<1x1x32x128xbf16, #tpu.memory_space<vmem>>, %arg18: memref<1x1x1x128xf32, #tpu.memory_space<vmem>>, %arg19: memref<1x1x128x32xbf16, #tpu.memory_space<vmem>>, %arg20: memref<1x1x1x32xf32, #tpu.memory_space<vmem>>, %arg21: memref<1x1x6x32xf32, #tpu.memory_space<vmem>>, %arg22: memref<1x1x8x9xf32, #tpu.memory_space<vmem>>, %arg23: memref<1x1x8x16xf32, #tpu.memory_space<vmem>>, %arg24: memref<8x32xf32, #tpu.memory_space<vmem>>, %arg25: memref<16x32xf32, #tpu.memory_space<vmem>>) attributes {dimension_semantics = [#tpu.dimension_semantics<parallel>, #tpu.dimension_semantics<arbitrary>, #tpu.dimension_semantics<arbitrary>], iteration_bounds = array<i64: 2, 3, 1>, scalar_prefetch = 0 : i64, scratch_operands = 2 : i64, tpu.core_type = #tpu.core_type<tc>, window_params = [{transform_indices = @transform_0, window_bounds = array<i64: 1, 1, 16, 32>}, {transform_indices = @transform_1, window_bounds = array<i64: 1, 32, 32>}, {transform_indices = @transform_2, window_bounds = array<i64: 1, 3, 32>}, {pipeline_mode = #tpu.pipeline_mode<synchronous>, transform_indices = @transform_3, window_bounds = array<i64: 8, 32>}, {pipeline_mode = #tpu.pipeline_mode<synchronous>, transform_indices = @transform_4, window_bounds = array<i64: 32, 9>}, {pipeline_mode = #tpu.pipeline_mode<synchronous>, transform_indices = @transform_5, window_bounds = array<i64: 1, 9>}, {transform_indices = @transform_6, window_bounds = array<i64: 1, 1, 32, 96>}, {transform_indices = @transform_7, window_bounds = array<i64: 1, 1, 1, 96>}, {transform_indices = @transform_8, window_bounds = array<i64: 1, 1, 32, 32>}, {transform_indices = @transform_9, window_bounds = array<i64: 1, 1, 1, 32>}, {transform_indices = @transform_10, window_bounds = array<i64: 1, 1, 32, 96>}, {transform_indices = @transform_11, window_bounds = array<i64: 1, 1, 1, 96>}, {transform_indices = @transform_12, window_bounds = array<i64: 1, 1, 32, 32>}, {transform_indices = @transform_13, window_bounds = array<i64: 1, 1, 1, 32>}, {transform_indices = @transform_14, window_bounds = array<i64: 1, 1, 32, 128>}, {transform_indices = @transform_15, window_bounds = array<i64: 1, 1, 1, 128>}, {transform_indices = @transform_16, window_bounds = array<i64: 1, 1, 128, 32>}, {transform_indices = @transform_17, window_bounds = array<i64: 1, 1, 1, 32>}, {transform_indices = @transform_18, window_bounds = array<i64: 1, 1, 6, 32>}, {transform_indices = @transform_19, window_bounds = array<i64: 1, 1, 8, 9>}, {transform_indices = @transform_20, window_bounds = array<i64: 1, 1, 8, 16>}]} {
    %c0_i32 = arith.constant 0 : i32
    %0 = arith.cmpi eq, %arg1, %c0_i32 : i32
    %c0_i32_0 = arith.constant 0 : i32
    %1 = arith.cmpi eq, %arg2, %c0_i32_0 : i32
    %2 = arith.andi %0, %1 : i1
    %3 = arith.extui %2 : i1 to i32
    %c0_i32_1 = arith.constant 0 : i32
    %4 = arith.cmpi ne, %3, %c0_i32_1 : i32
    scf.if %4 {
      %c0_147 = arith.constant 0 : index
      %c0_148 = arith.constant 0 : index
      %340 = vector.load %arg6[%c0_147, %c0_148] : memref<8x32xf32, #tpu.memory_space<vmem>>, vector<8x32xf32>
      %c0_149 = arith.constant 0 : index
      %c0_150 = arith.constant 0 : index
      %341 = vector.load %arg24[%c0_149, %c0_150] : memref<8x32xf32, #tpu.memory_space<vmem>>, vector<8x32xf32>
      tpu.vector_store %arg24[%c0_149, %c0_150], %340 {strides = array<i32>} : memref<8x32xf32, #tpu.memory_space<vmem>>, vector<8x32xf32>,
    } else {
    }
    %c0_i32_2 = arith.constant 0 : i32
    %5 = arith.cmpi eq, %arg2, %c0_i32_2 : i32
    %6 = arith.extui %5 : i1 to i32
    %c0_i32_3 = arith.constant 0 : i32
    %7 = arith.cmpi ne, %6, %c0_i32_3 : i32
    scf.if %7 {
      %c0_147 = arith.constant 0 : index
      %c0_148 = arith.constant 0 : index
      %c0_149 = arith.constant 0 : index
      %340 = vector.load %arg5[%c0_147, %c0_148, %c0_149] : memref<1x3x32xf32, #tpu.memory_space<vmem>>, vector<1x3x32xf32>
      %341 = vector.shape_cast %340 : vector<1x3x32xf32> to vector<3x32xf32>
      %c0_150 = arith.constant 0 : index
      %c0_151 = arith.constant 0 : index
      %c0_152 = arith.constant 0 : index
      %c0_153 = arith.constant 0 : index
      %342 = vector.load %arg3[%c0_150, %c0_151, %c0_152, %c0_153] : memref<1x1x16x32xf32, #tpu.memory_space<vmem>>, vector<1x1x16x32xf32>
      %343 = vector.shape_cast %342 : vector<1x1x16x32xf32> to vector<16x32xf32>
      %c0_154 = arith.constant 0 : index
      %c0_155 = arith.constant 0 : index
      %c0_156 = arith.constant 0 : index
      %344 = vector.load %arg4[%c0_154, %c0_155, %c0_156] : memref<1x32x32xbf16, #tpu.memory_space<vmem>>, vector<1x32x32xbf16>
      %345 = vector.shape_cast %344 : vector<1x32x32xbf16> to vector<32x32xbf16>
      %346 = arith.truncf %343 : vector<16x32xf32> to vector<16x32xbf16>
      %cst_157 = arith.constant dense<0.000000e+00> : vector<16x32xf32>
      %347 = tpu.matmul %346, %345, %cst_157 {dimension_numbers = #tpu.dot_dimension_numbers<[1], [0], [0], [1], [0, 0, 1, 1], [], []>} : vector<16x32xbf16>, vector<32x32xbf16>, vector<16x32xf32> -> vector<16x32xf32>
      %348 = vector.extract_strided_slice %341 {offsets = [0, 0], sizes = [1, 32], strides = [1, 1]} : vector<3x32xf32> to vector<1x32xf32>
      %349 = vector.broadcast %348 : vector<1x32xf32> to vector<16x32xf32>
      %350 = arith.addf %347, %349 : vector<16x32xf32>
      %351 = vector.extract_strided_slice %341 {offsets = [1, 0], sizes = [1, 32], strides = [1, 1]} : vector<3x32xf32> to vector<1x32xf32>
      %352 = vector.extract_strided_slice %341 {offsets = [2, 0], sizes = [1, 32], strides = [1, 1]} : vector<3x32xf32> to vector<1x32xf32>
      %cst_158 = arith.constant dense<0.000000e+00> : vector<16xf32>
      %353 = vector.multi_reduction <add>, %350, %cst_158 [1] : vector<16x32xf32> to vector<16xf32>
      %354 = vector.shape_cast %353 : vector<16xf32> to vector<16x1xf32>
      %cst_159 = arith.constant 3.200000e+01 : f32
      %355 = vector.broadcast %cst_159 : f32 to vector<16x1xf32>
      %356 = arith.divf %354, %355 : vector<16x1xf32>
      %357 = vector.broadcast %356 : vector<16x1xf32> to vector<16x32xf32>
      %358 = arith.subf %350, %357 : vector<16x32xf32>
      %359 = arith.mulf %358, %358 : vector<16x32xf32>
      %cst_160 = arith.constant dense<0.000000e+00> : vector<16xf32>
      %360 = vector.multi_reduction <add>, %359, %cst_160 [1] : vector<16x32xf32> to vector<16xf32>
      %361 = vector.shape_cast %360 : vector<16xf32> to vector<16x1xf32>
      %cst_161 = arith.constant 3.200000e+01 : f32
      %362 = vector.broadcast %cst_161 : f32 to vector<16x1xf32>
      %363 = arith.divf %361, %362 : vector<16x1xf32>
      %364 = vector.broadcast %356 : vector<16x1xf32> to vector<16x32xf32>
      %365 = arith.subf %350, %364 : vector<16x32xf32>
      %cst_162 = arith.constant 9.99999974E-6 : f32
      %366 = vector.broadcast %cst_162 : f32 to vector<16x1xf32>
      %367 = arith.addf %363, %366 : vector<16x1xf32>
      %368 = math.rsqrt %367 : vector<16x1xf32>
      %369 = vector.broadcast %368 : vector<16x1xf32> to vector<16x32xf32>
      %370 = arith.mulf %365, %369 : vector<16x32xf32>
      %371 = vector.broadcast %351 : vector<1x32xf32> to vector<16x32xf32>
      %372 = arith.mulf %370, %371 : vector<16x32xf32>
      %373 = vector.broadcast %352 : vector<1x32xf32> to vector<16x32xf32>
      %374 = arith.addf %372, %373 : vector<16x32xf32>
      %c0_163 = arith.constant 0 : index
      %c0_164 = arith.constant 0 : index
      %375 = vector.load %arg25[%c0_163, %c0_164] : memref<16x32xf32, #tpu.memory_space<vmem>>, vector<16x32xf32>
      tpu.vector_store %arg25[%c0_163, %c0_164], %374 {strides = array<i32>} : memref<16x32xf32, #tpu.memory_space<vmem>>, vector<16x32xf32>,
    } else {
    }
    %c0 = arith.constant 0 : index
    %c0_4 = arith.constant 0 : index
    %8 = vector.load %arg24[%c0, %c0_4] : memref<8x32xf32, #tpu.memory_space<vmem>>, vector<8x32xf32>
    %c0_5 = arith.constant 0 : index
    %c0_6 = arith.constant 0 : index
    %9 = vector.load %arg25[%c0_5, %c0_6] : memref<16x32xf32, #tpu.memory_space<vmem>>, vector<16x32xf32>
    %c0_7 = arith.constant 0 : index
    %c0_8 = arith.constant 0 : index
    %c0_9 = arith.constant 0 : index
    %c0_10 = arith.constant 0 : index
    %10 = vector.load %arg21[%c0_7, %c0_8, %c0_9, %c0_10] : memref<1x1x6x32xf32, #tpu.memory_space<vmem>>, vector<1x1x6x32xf32>
    %11 = vector.shape_cast %10 : vector<1x1x6x32xf32> to vector<6x32xf32>
    %c0_11 = arith.constant 0 : index
    %c0_12 = arith.constant 0 : index
    %c0_13 = arith.constant 0 : index
    %c0_14 = arith.constant 0 : index
    %12 = vector.load %arg9[%c0_11, %c0_12, %c0_13, %c0_14] : memref<1x1x32x96xbf16, #tpu.memory_space<vmem>>, vector<1x1x32x96xbf16>
    %13 = vector.shape_cast %12 : vector<1x1x32x96xbf16> to vector<32x96xbf16>
    %14 = arith.truncf %8 : vector<8x32xf32> to vector<8x32xbf16>
    %cst = arith.constant dense<0.000000e+00> : vector<8x96xf32>
    %15 = tpu.matmul %14, %13, %cst {dimension_numbers = #tpu.dot_dimension_numbers<[1], [0], [0], [1], [0, 0, 1, 1], [], []>} : vector<8x32xbf16>, vector<32x96xbf16>, vector<8x96xf32> -> vector<8x96xf32>
    %c0_15 = arith.constant 0 : index
    %c0_16 = arith.constant 0 : index
    %c0_17 = arith.constant 0 : index
    %c0_18 = arith.constant 0 : index
    %16 = vector.load %arg10[%c0_15, %c0_16, %c0_17, %c0_18] : memref<1x1x1x96xf32, #tpu.memory_space<vmem>>, vector<1x1x1x96xf32>
    %17 = vector.shape_cast %16 : vector<1x1x1x96xf32> to vector<1x96xf32>
    %18 = vector.broadcast %17 : vector<1x96xf32> to vector<8x96xf32>
    %19 = arith.addf %15, %18 : vector<8x96xf32>
    %20 = vector.extract_strided_slice %19 {offsets = [0, 0], sizes = [8, 32], strides = [1, 1]} : vector<8x96xf32> to vector<8x32xf32>
    %21 = vector.extract_strided_slice %19 {offsets = [0, 32], sizes = [8, 32], strides = [1, 1]} : vector<8x96xf32> to vector<8x32xf32>
    %22 = vector.extract_strided_slice %19 {offsets = [0, 64], sizes = [8, 32], strides = [1, 1]} : vector<8x96xf32> to vector<8x32xf32>
    %c0_19 = arith.constant 0 : index
    %c0_20 = arith.constant 0 : index
    %c0_21 = arith.constant 0 : index
    %c0_22 = arith.constant 0 : index
    %23 = vector.load %arg11[%c0_19, %c0_20, %c0_21, %c0_22] : memref<1x1x32x32xf32, #tpu.memory_space<vmem>>, vector<1x1x32x32xf32>
    %24 = vector.shape_cast %23 : vector<1x1x32x32xf32> to vector<32x32xf32>
    %c0_23 = arith.constant 0 : index
    %c0_24 = arith.constant 0 : index
    %c0_25 = arith.constant 0 : index
    %c0_26 = arith.constant 0 : index
    %25 = vector.load %arg12[%c0_23, %c0_24, %c0_25, %c0_26] : memref<1x1x1x32xf32, #tpu.memory_space<vmem>>, vector<1x1x1x32xf32>
    %26 = vector.shape_cast %25 : vector<1x1x1x32xf32> to vector<1x32xf32>
    %cst_27 = arith.constant 0.000000e+00 : f32
    %27 = vector.broadcast %cst_27 : f32 to vector<8x32xf32>
    %28 = vector.extract_strided_slice %20 {offsets = [0, 0], sizes = [8, 8], strides = [1, 1]} : vector<8x32xf32> to vector<8x8xf32>
    %29 = vector.extract_strided_slice %21 {offsets = [0, 0], sizes = [8, 8], strides = [1, 1]} : vector<8x32xf32> to vector<8x8xf32>
    %30 = vector.extract_strided_slice %22 {offsets = [0, 0], sizes = [8, 8], strides = [1, 1]} : vector<8x32xf32> to vector<8x8xf32>
    %cst_28 = arith.constant dense<0.000000e+00> : vector<8x8xf32>
    %31 = tpu.matmul %28, %29, %cst_28 {dimension_numbers = #tpu.dot_dimension_numbers<[1], [1], [0], [0], [0, 0, 1, 0], [], []>} : vector<8x8xf32>, vector<8x8xf32>, vector<8x8xf32> -> vector<8x8xf32>
    %cst_29 = arith.constant 0.353553385 : f32
    %32 = vector.broadcast %cst_29 : f32 to vector<8x8xf32>
    %33 = arith.mulf %31, %32 : vector<8x8xf32>
    %cst_30 = arith.constant dense<0xFF800000> : vector<8xf32>
    %34 = vector.multi_reduction <maximumf>, %33, %cst_30 [1] : vector<8x8xf32> to vector<8xf32>
    %35 = vector.shape_cast %34 : vector<8xf32> to vector<8x1xf32>
    %36 = vector.broadcast %35 : vector<8x1xf32> to vector<8x8xf32>
    %37 = arith.subf %33, %36 : vector<8x8xf32>
    %38 = math.exp %37 : vector<8x8xf32>
    %cst_31 = arith.constant dense<0.000000e+00> : vector<8xf32>
    %39 = vector.multi_reduction <add>, %38, %cst_31 [1] : vector<8x8xf32> to vector<8xf32>
    %40 = vector.shape_cast %39 : vector<8xf32> to vector<8x1xf32>
    %41 = vector.broadcast %40 : vector<8x1xf32> to vector<8x8xf32>
    %42 = arith.divf %38, %41 : vector<8x8xf32>
    %cst_32 = arith.constant dense<0.000000e+00> : vector<8x8xf32>
    %43 = tpu.matmul %42, %30, %cst_32 {dimension_numbers = #tpu.dot_dimension_numbers<[1], [0], [0], [1], [0, 0, 1, 1], [], []>} : vector<8x8xf32>, vector<8x8xf32>, vector<8x8xf32> -> vector<8x8xf32>
    %44 = vector.extract_strided_slice %24 {offsets = [0, 0], sizes = [8, 32], strides = [1, 1]} : vector<32x32xf32> to vector<8x32xf32>
    %45 = arith.truncf %43 : vector<8x8xf32> to vector<8x8xbf16>
    %46 = arith.truncf %44 : vector<8x32xf32> to vector<8x32xbf16>
    %cst_33 = arith.constant dense<0.000000e+00> : vector<8x32xf32>
    %47 = tpu.matmul %45, %46, %cst_33 {dimension_numbers = #tpu.dot_dimension_numbers<[1], [0], [0], [1], [0, 0, 1, 1], [], []>} : vector<8x8xbf16>, vector<8x32xbf16>, vector<8x32xf32> -> vector<8x32xf32>
    %48 = arith.addf %27, %47 : vector<8x32xf32>
    %49 = vector.extract_strided_slice %20 {offsets = [0, 8], sizes = [8, 8], strides = [1, 1]} : vector<8x32xf32> to vector<8x8xf32>
    %50 = vector.extract_strided_slice %21 {offsets = [0, 8], sizes = [8, 8], strides = [1, 1]} : vector<8x32xf32> to vector<8x8xf32>
    %51 = vector.extract_strided_slice %22 {offsets = [0, 8], sizes = [8, 8], strides = [1, 1]} : vector<8x32xf32> to vector<8x8xf32>
    %cst_34 = arith.constant dense<0.000000e+00> : vector<8x8xf32>
    %52 = tpu.matmul %49, %50, %cst_34 {dimension_numbers = #tpu.dot_dimension_numbers<[1], [1], [0], [0], [0, 0, 1, 0], [], []>} : vector<8x8xf32>, vector<8x8xf32>, vector<8x8xf32> -> vector<8x8xf32>
    %cst_35 = arith.constant 0.353553385 : f32
    %53 = vector.broadcast %cst_35 : f32 to vector<8x8xf32>
    %54 = arith.mulf %52, %53 : vector<8x8xf32>
    %cst_36 = arith.constant dense<0xFF800000> : vector<8xf32>
    %55 = vector.multi_reduction <maximumf>, %54, %cst_36 [1] : vector<8x8xf32> to vector<8xf32>
    %56 = vector.shape_cast %55 : vector<8xf32> to vector<8x1xf32>
    %57 = vector.broadcast %56 : vector<8x1xf32> to vector<8x8xf32>
    %58 = arith.subf %54, %57 : vector<8x8xf32>
    %59 = math.exp %58 : vector<8x8xf32>
    %cst_37 = arith.constant dense<0.000000e+00> : vector<8xf32>
    %60 = vector.multi_reduction <add>, %59, %cst_37 [1] : vector<8x8xf32> to vector<8xf32>
    %61 = vector.shape_cast %60 : vector<8xf32> to vector<8x1xf32>
    %62 = vector.broadcast %61 : vector<8x1xf32> to vector<8x8xf32>
    %63 = arith.divf %59, %62 : vector<8x8xf32>
    %cst_38 = arith.constant dense<0.000000e+00> : vector<8x8xf32>
    %64 = tpu.matmul %63, %51, %cst_38 {dimension_numbers = #tpu.dot_dimension_numbers<[1], [0], [0], [1], [0, 0, 1, 1], [], []>} : vector<8x8xf32>, vector<8x8xf32>, vector<8x8xf32> -> vector<8x8xf32>
    %65 = vector.extract_strided_slice %24 {offsets = [8, 0], sizes = [8, 32], strides = [1, 1]} : vector<32x32xf32> to vector<8x32xf32>
    %66 = arith.truncf %64 : vector<8x8xf32> to vector<8x8xbf16>
    %67 = arith.truncf %65 : vector<8x32xf32> to vector<8x32xbf16>
    %cst_39 = arith.constant dense<0.000000e+00> : vector<8x32xf32>
    %68 = tpu.matmul %66, %67, %cst_39 {dimension_numbers = #tpu.dot_dimension_numbers<[1], [0], [0], [1], [0, 0, 1, 1], [], []>} : vector<8x8xbf16>, vector<8x32xbf16>, vector<8x32xf32> -> vector<8x32xf32>
    %69 = arith.addf %48, %68 : vector<8x32xf32>
    %70 = vector.extract_strided_slice %20 {offsets = [0, 16], sizes = [8, 8], strides = [1, 1]} : vector<8x32xf32> to vector<8x8xf32>
    %71 = vector.extract_strided_slice %21 {offsets = [0, 16], sizes = [8, 8], strides = [1, 1]} : vector<8x32xf32> to vector<8x8xf32>
    %72 = vector.extract_strided_slice %22 {offsets = [0, 16], sizes = [8, 8], strides = [1, 1]} : vector<8x32xf32> to vector<8x8xf32>
    %cst_40 = arith.constant dense<0.000000e+00> : vector<8x8xf32>
    %73 = tpu.matmul %70, %71, %cst_40 {dimension_numbers = #tpu.dot_dimension_numbers<[1], [1], [0], [0], [0, 0, 1, 0], [], []>} : vector<8x8xf32>, vector<8x8xf32>, vector<8x8xf32> -> vector<8x8xf32>
    %cst_41 = arith.constant 0.353553385 : f32
    %74 = vector.broadcast %cst_41 : f32 to vector<8x8xf32>
    %75 = arith.mulf %73, %74 : vector<8x8xf32>
    %cst_42 = arith.constant dense<0xFF800000> : vector<8xf32>
    %76 = vector.multi_reduction <maximumf>, %75, %cst_42 [1] : vector<8x8xf32> to vector<8xf32>
    %77 = vector.shape_cast %76 : vector<8xf32> to vector<8x1xf32>
    %78 = vector.broadcast %77 : vector<8x1xf32> to vector<8x8xf32>
    %79 = arith.subf %75, %78 : vector<8x8xf32>
    %80 = math.exp %79 : vector<8x8xf32>
    %cst_43 = arith.constant dense<0.000000e+00> : vector<8xf32>
    %81 = vector.multi_reduction <add>, %80, %cst_43 [1] : vector<8x8xf32> to vector<8xf32>
    %82 = vector.shape_cast %81 : vector<8xf32> to vector<8x1xf32>
    %83 = vector.broadcast %82 : vector<8x1xf32> to vector<8x8xf32>
    %84 = arith.divf %80, %83 : vector<8x8xf32>
    %cst_44 = arith.constant dense<0.000000e+00> : vector<8x8xf32>
    %85 = tpu.matmul %84, %72, %cst_44 {dimension_numbers = #tpu.dot_dimension_numbers<[1], [0], [0], [1], [0, 0, 1, 1], [], []>} : vector<8x8xf32>, vector<8x8xf32>, vector<8x8xf32> -> vector<8x8xf32>
    %86 = vector.extract_strided_slice %24 {offsets = [16, 0], sizes = [8, 32], strides = [1, 1]} : vector<32x32xf32> to vector<8x32xf32>
    %87 = arith.truncf %85 : vector<8x8xf32> to vector<8x8xbf16>
    %88 = arith.truncf %86 : vector<8x32xf32> to vector<8x32xbf16>
    %cst_45 = arith.constant dense<0.000000e+00> : vector<8x32xf32>
    %89 = tpu.matmul %87, %88, %cst_45 {dimension_numbers = #tpu.dot_dimension_numbers<[1], [0], [0], [1], [0, 0, 1, 1], [], []>} : vector<8x8xbf16>, vector<8x32xbf16>, vector<8x32xf32> -> vector<8x32xf32>
    %90 = arith.addf %69, %89 : vector<8x32xf32>
    %91 = vector.extract_strided_slice %20 {offsets = [0, 24], sizes = [8, 8], strides = [1, 1]} : vector<8x32xf32> to vector<8x8xf32>
    %92 = vector.extract_strided_slice %21 {offsets = [0, 24], sizes = [8, 8], strides = [1, 1]} : vector<8x32xf32> to vector<8x8xf32>
    %93 = vector.extract_strided_slice %22 {offsets = [0, 24], sizes = [8, 8], strides = [1, 1]} : vector<8x32xf32> to vector<8x8xf32>
    %cst_46 = arith.constant dense<0.000000e+00> : vector<8x8xf32>
    %94 = tpu.matmul %91, %92, %cst_46 {dimension_numbers = #tpu.dot_dimension_numbers<[1], [1], [0], [0], [0, 0, 1, 0], [], []>} : vector<8x8xf32>, vector<8x8xf32>, vector<8x8xf32> -> vector<8x8xf32>
    %cst_47 = arith.constant 0.353553385 : f32
    %95 = vector.broadcast %cst_47 : f32 to vector<8x8xf32>
    %96 = arith.mulf %94, %95 : vector<8x8xf32>
    %cst_48 = arith.constant dense<0xFF800000> : vector<8xf32>
    %97 = vector.multi_reduction <maximumf>, %96, %cst_48 [1] : vector<8x8xf32> to vector<8xf32>
    %98 = vector.shape_cast %97 : vector<8xf32> to vector<8x1xf32>
    %99 = vector.broadcast %98 : vector<8x1xf32> to vector<8x8xf32>
    %100 = arith.subf %96, %99 : vector<8x8xf32>
    %101 = math.exp %100 : vector<8x8xf32>
    %cst_49 = arith.constant dense<0.000000e+00> : vector<8xf32>
    %102 = vector.multi_reduction <add>, %101, %cst_49 [1] : vector<8x8xf32> to vector<8xf32>
    %103 = vector.shape_cast %102 : vector<8xf32> to vector<8x1xf32>
    %104 = vector.broadcast %103 : vector<8x1xf32> to vector<8x8xf32>
    %105 = arith.divf %101, %104 : vector<8x8xf32>
    %cst_50 = arith.constant dense<0.000000e+00> : vector<8x8xf32>
    %106 = tpu.matmul %105, %93, %cst_50 {dimension_numbers = #tpu.dot_dimension_numbers<[1], [0], [0], [1], [0, 0, 1, 1], [], []>} : vector<8x8xf32>, vector<8x8xf32>, vector<8x8xf32> -> vector<8x8xf32>
    %107 = vector.extract_strided_slice %24 {offsets = [24, 0], sizes = [8, 32], strides = [1, 1]} : vector<32x32xf32> to vector<8x32xf32>
    %108 = arith.truncf %106 : vector<8x8xf32> to vector<8x8xbf16>
    %109 = arith.truncf %107 : vector<8x32xf32> to vector<8x32xbf16>
    %cst_51 = arith.constant dense<0.000000e+00> : vector<8x32xf32>
    %110 = tpu.matmul %108, %109, %cst_51 {dimension_numbers = #tpu.dot_dimension_numbers<[1], [0], [0], [1], [0, 0, 1, 1], [], []>} : vector<8x8xbf16>, vector<8x32xbf16>, vector<8x32xf32> -> vector<8x32xf32>
    %111 = arith.addf %90, %110 : vector<8x32xf32>
    %112 = vector.broadcast %26 : vector<1x32xf32> to vector<8x32xf32>
    %113 = arith.addf %111, %112 : vector<8x32xf32>
    %114 = arith.addf %8, %113 : vector<8x32xf32>
    %115 = vector.extract_strided_slice %11 {offsets = [0, 0], sizes = [1, 32], strides = [1, 1]} : vector<6x32xf32> to vector<1x32xf32>
    %116 = vector.extract_strided_slice %11 {offsets = [1, 0], sizes = [1, 32], strides = [1, 1]} : vector<6x32xf32> to vector<1x32xf32>
    %cst_52 = arith.constant dense<0.000000e+00> : vector<8xf32>
    %117 = vector.multi_reduction <add>, %114, %cst_52 [1] : vector<8x32xf32> to vector<8xf32>
    %118 = vector.shape_cast %117 : vector<8xf32> to vector<8x1xf32>
    %cst_53 = arith.constant 3.200000e+01 : f32
    %119 = vector.broadcast %cst_53 : f32 to vector<8x1xf32>
    %120 = arith.divf %118, %119 : vector<8x1xf32>
    %121 = vector.broadcast %120 : vector<8x1xf32> to vector<8x32xf32>
    %122 = arith.subf %114, %121 : vector<8x32xf32>
    %123 = arith.mulf %122, %122 : vector<8x32xf32>
    %cst_54 = arith.constant dense<0.000000e+00> : vector<8xf32>
    %124 = vector.multi_reduction <add>, %123, %cst_54 [1] : vector<8x32xf32> to vector<8xf32>
    %125 = vector.shape_cast %124 : vector<8xf32> to vector<8x1xf32>
    %cst_55 = arith.constant 3.200000e+01 : f32
    %126 = vector.broadcast %cst_55 : f32 to vector<8x1xf32>
    %127 = arith.divf %125, %126 : vector<8x1xf32>
    %128 = vector.broadcast %120 : vector<8x1xf32> to vector<8x32xf32>
    %129 = arith.subf %114, %128 : vector<8x32xf32>
    %cst_56 = arith.constant 9.99999974E-6 : f32
    %130 = vector.broadcast %cst_56 : f32 to vector<8x1xf32>
    %131 = arith.addf %127, %130 : vector<8x1xf32>
    %132 = math.rsqrt %131 : vector<8x1xf32>
    %133 = vector.broadcast %132 : vector<8x1xf32> to vector<8x32xf32>
    %134 = arith.mulf %129, %133 : vector<8x32xf32>
    %135 = vector.broadcast %115 : vector<1x32xf32> to vector<8x32xf32>
    %136 = arith.mulf %134, %135 : vector<8x32xf32>
    %137 = vector.broadcast %116 : vector<1x32xf32> to vector<8x32xf32>
    %138 = arith.addf %136, %137 : vector<8x32xf32>
    %c0_57 = arith.constant 0 : index
    %c0_58 = arith.constant 0 : index
    %c0_59 = arith.constant 0 : index
    %c0_60 = arith.constant 0 : index
    %139 = vector.load %arg13[%c0_57, %c0_58, %c0_59, %c0_60] : memref<1x1x32x96xbf16, #tpu.memory_space<vmem>>, vector<1x1x32x96xbf16>
    %140 = vector.shape_cast %139 : vector<1x1x32x96xbf16> to vector<32x96xbf16>
    %c0_61 = arith.constant 0 : index
    %c0_62 = arith.constant 0 : index
    %c0_63 = arith.constant 0 : index
    %c0_64 = arith.constant 0 : index
    %141 = vector.load %arg14[%c0_61, %c0_62, %c0_63, %c0_64] : memref<1x1x1x96xf32, #tpu.memory_space<vmem>>, vector<1x1x1x96xf32>
    %142 = vector.shape_cast %141 : vector<1x1x1x96xf32> to vector<1x96xf32>
    %143 = vector.extract_strided_slice %140 {offsets = [0, 0], sizes = [32, 32], strides = [1, 1]} : vector<32x96xbf16> to vector<32x32xbf16>
    %144 = arith.truncf %138 : vector<8x32xf32> to vector<8x32xbf16>
    %cst_65 = arith.constant dense<0.000000e+00> : vector<8x32xf32>
    %145 = tpu.matmul %144, %143, %cst_65 {dimension_numbers = #tpu.dot_dimension_numbers<[1], [0], [0], [1], [0, 0, 1, 1], [], []>} : vector<8x32xbf16>, vector<32x32xbf16>, vector<8x32xf32> -> vector<8x32xf32>
    %146 = vector.extract_strided_slice %142 {offsets = [0, 0], sizes = [1, 32], strides = [1, 1]} : vector<1x96xf32> to vector<1x32xf32>
    %147 = vector.broadcast %146 : vector<1x32xf32> to vector<8x32xf32>
    %148 = arith.addf %145, %147 : vector<8x32xf32>
    %149 = vector.extract_strided_slice %140 {offsets = [0, 32], sizes = [32, 32], strides = [1, 1]} : vector<32x96xbf16> to vector<32x32xbf16>
    %150 = arith.truncf %9 : vector<16x32xf32> to vector<16x32xbf16>
    %cst_66 = arith.constant dense<0.000000e+00> : vector<16x32xf32>
    %151 = tpu.matmul %150, %149, %cst_66 {dimension_numbers = #tpu.dot_dimension_numbers<[1], [0], [0], [1], [0, 0, 1, 1], [], []>} : vector<16x32xbf16>, vector<32x32xbf16>, vector<16x32xf32> -> vector<16x32xf32>
    %152 = vector.extract_strided_slice %142 {offsets = [0, 32], sizes = [1, 32], strides = [1, 1]} : vector<1x96xf32> to vector<1x32xf32>
    %153 = vector.broadcast %152 : vector<1x32xf32> to vector<16x32xf32>
    %154 = arith.addf %151, %153 : vector<16x32xf32>
    %155 = vector.extract_strided_slice %140 {offsets = [0, 64], sizes = [32, 32], strides = [1, 1]} : vector<32x96xbf16> to vector<32x32xbf16>
    %156 = arith.truncf %9 : vector<16x32xf32> to vector<16x32xbf16>
    %cst_67 = arith.constant dense<0.000000e+00> : vector<16x32xf32>
    %157 = tpu.matmul %156, %155, %cst_67 {dimension_numbers = #tpu.dot_dimension_numbers<[1], [0], [0], [1], [0, 0, 1, 1], [], []>} : vector<16x32xbf16>, vector<32x32xbf16>, vector<16x32xf32> -> vector<16x32xf32>
    %158 = vector.extract_strided_slice %142 {offsets = [0, 64], sizes = [1, 32], strides = [1, 1]} : vector<1x96xf32> to vector<1x32xf32>
    %159 = vector.broadcast %158 : vector<1x32xf32> to vector<16x32xf32>
    %160 = arith.addf %157, %159 : vector<16x32xf32>
    %c0_68 = arith.constant 0 : index
    %c0_69 = arith.constant 0 : index
    %c0_70 = arith.constant 0 : index
    %c0_71 = arith.constant 0 : index
    %161 = vector.load %arg15[%c0_68, %c0_69, %c0_70, %c0_71] : memref<1x1x32x32xf32, #tpu.memory_space<vmem>>, vector<1x1x32x32xf32>
    %162 = vector.shape_cast %161 : vector<1x1x32x32xf32> to vector<32x32xf32>
    %c0_72 = arith.constant 0 : index
    %c0_73 = arith.constant 0 : index
    %c0_74 = arith.constant 0 : index
    %c0_75 = arith.constant 0 : index
    %163 = vector.load %arg16[%c0_72, %c0_73, %c0_74, %c0_75] : memref<1x1x1x32xf32, #tpu.memory_space<vmem>>, vector<1x1x1x32xf32>
    %164 = vector.shape_cast %163 : vector<1x1x1x32xf32> to vector<1x32xf32>
    %cst_76 = arith.constant 0.000000e+00 : f32
    %165 = vector.broadcast %cst_76 : f32 to vector<8x32xf32>
    %cst_77 = arith.constant 0.000000e+00 : f32
    %166 = vector.broadcast %cst_77 : f32 to vector<8x16xf32>
    %167 = vector.extract_strided_slice %148 {offsets = [0, 0], sizes = [8, 8], strides = [1, 1]} : vector<8x32xf32> to vector<8x8xf32>
    %168 = vector.extract_strided_slice %154 {offsets = [0, 0], sizes = [16, 8], strides = [1, 1]} : vector<16x32xf32> to vector<16x8xf32>
    %169 = vector.extract_strided_slice %160 {offsets = [0, 0], sizes = [16, 8], strides = [1, 1]} : vector<16x32xf32> to vector<16x8xf32>
    %cst_78 = arith.constant dense<0.000000e+00> : vector<8x16xf32>
    %170 = tpu.matmul %167, %168, %cst_78 {dimension_numbers = #tpu.dot_dimension_numbers<[1], [1], [0], [0], [0, 0, 1, 0], [], []>} : vector<8x8xf32>, vector<16x8xf32>, vector<8x16xf32> -> vector<8x16xf32>
    %cst_79 = arith.constant 0.353553385 : f32
    %171 = vector.broadcast %cst_79 : f32 to vector<8x16xf32>
    %172 = arith.mulf %170, %171 : vector<8x16xf32>
    %173 = arith.addf %166, %172 : vector<8x16xf32>
    %cst_80 = arith.constant dense<0xFF800000> : vector<8xf32>
    %174 = vector.multi_reduction <maximumf>, %172, %cst_80 [1] : vector<8x16xf32> to vector<8xf32>
    %175 = vector.shape_cast %174 : vector<8xf32> to vector<8x1xf32>
    %176 = vector.broadcast %175 : vector<8x1xf32> to vector<8x16xf32>
    %177 = arith.subf %172, %176 : vector<8x16xf32>
    %178 = math.exp %177 : vector<8x16xf32>
    %cst_81 = arith.constant dense<0.000000e+00> : vector<8xf32>
    %179 = vector.multi_reduction <add>, %178, %cst_81 [1] : vector<8x16xf32> to vector<8xf32>
    %180 = vector.shape_cast %179 : vector<8xf32> to vector<8x1xf32>
    %181 = vector.broadcast %180 : vector<8x1xf32> to vector<8x16xf32>
    %182 = arith.divf %178, %181 : vector<8x16xf32>
    %cst_82 = arith.constant dense<0.000000e+00> : vector<8x8xf32>
    %183 = tpu.matmul %182, %169, %cst_82 {dimension_numbers = #tpu.dot_dimension_numbers<[1], [0], [0], [1], [0, 0, 1, 1], [], []>} : vector<8x16xf32>, vector<16x8xf32>, vector<8x8xf32> -> vector<8x8xf32>
    %184 = vector.extract_strided_slice %162 {offsets = [0, 0], sizes = [8, 32], strides = [1, 1]} : vector<32x32xf32> to vector<8x32xf32>
    %185 = arith.truncf %183 : vector<8x8xf32> to vector<8x8xbf16>
    %186 = arith.truncf %184 : vector<8x32xf32> to vector<8x32xbf16>
    %cst_83 = arith.constant dense<0.000000e+00> : vector<8x32xf32>
    %187 = tpu.matmul %185, %186, %cst_83 {dimension_numbers = #tpu.dot_dimension_numbers<[1], [0], [0], [1], [0, 0, 1, 1], [], []>} : vector<8x8xbf16>, vector<8x32xbf16>, vector<8x32xf32> -> vector<8x32xf32>
    %188 = arith.addf %165, %187 : vector<8x32xf32>
    %189 = vector.extract_strided_slice %148 {offsets = [0, 8], sizes = [8, 8], strides = [1, 1]} : vector<8x32xf32> to vector<8x8xf32>
    %190 = vector.extract_strided_slice %154 {offsets = [0, 8], sizes = [16, 8], strides = [1, 1]} : vector<16x32xf32> to vector<16x8xf32>
    %191 = vector.extract_strided_slice %160 {offsets = [0, 8], sizes = [16, 8], strides = [1, 1]} : vector<16x32xf32> to vector<16x8xf32>
    %cst_84 = arith.constant dense<0.000000e+00> : vector<8x16xf32>
    %192 = tpu.matmul %189, %190, %cst_84 {dimension_numbers = #tpu.dot_dimension_numbers<[1], [1], [0], [0], [0, 0, 1, 0], [], []>} : vector<8x8xf32>, vector<16x8xf32>, vector<8x16xf32> -> vector<8x16xf32>
    %cst_85 = arith.constant 0.353553385 : f32
    %193 = vector.broadcast %cst_85 : f32 to vector<8x16xf32>
    %194 = arith.mulf %192, %193 : vector<8x16xf32>
    %195 = arith.addf %173, %194 : vector<8x16xf32>
    %cst_86 = arith.constant dense<0xFF800000> : vector<8xf32>
    %196 = vector.multi_reduction <maximumf>, %194, %cst_86 [1] : vector<8x16xf32> to vector<8xf32>
    %197 = vector.shape_cast %196 : vector<8xf32> to vector<8x1xf32>
    %198 = vector.broadcast %197 : vector<8x1xf32> to vector<8x16xf32>
    %199 = arith.subf %194, %198 : vector<8x16xf32>
    %200 = math.exp %199 : vector<8x16xf32>
    %cst_87 = arith.constant dense<0.000000e+00> : vector<8xf32>
    %201 = vector.multi_reduction <add>, %200, %cst_87 [1] : vector<8x16xf32> to vector<8xf32>
    %202 = vector.shape_cast %201 : vector<8xf32> to vector<8x1xf32>
    %203 = vector.broadcast %202 : vector<8x1xf32> to vector<8x16xf32>
    %204 = arith.divf %200, %203 : vector<8x16xf32>
    %cst_88 = arith.constant dense<0.000000e+00> : vector<8x8xf32>
    %205 = tpu.matmul %204, %191, %cst_88 {dimension_numbers = #tpu.dot_dimension_numbers<[1], [0], [0], [1], [0, 0, 1, 1], [], []>} : vector<8x16xf32>, vector<16x8xf32>, vector<8x8xf32> -> vector<8x8xf32>
    %206 = vector.extract_strided_slice %162 {offsets = [8, 0], sizes = [8, 32], strides = [1, 1]} : vector<32x32xf32> to vector<8x32xf32>
    %207 = arith.truncf %205 : vector<8x8xf32> to vector<8x8xbf16>
    %208 = arith.truncf %206 : vector<8x32xf32> to vector<8x32xbf16>
    %cst_89 = arith.constant dense<0.000000e+00> : vector<8x32xf32>
    %209 = tpu.matmul %207, %208, %cst_89 {dimension_numbers = #tpu.dot_dimension_numbers<[1], [0], [0], [1], [0, 0, 1, 1], [], []>} : vector<8x8xbf16>, vector<8x32xbf16>, vector<8x32xf32> -> vector<8x32xf32>
    %210 = arith.addf %188, %209 : vector<8x32xf32>
    %211 = vector.extract_strided_slice %148 {offsets = [0, 16], sizes = [8, 8], strides = [1, 1]} : vector<8x32xf32> to vector<8x8xf32>
    %212 = vector.extract_strided_slice %154 {offsets = [0, 16], sizes = [16, 8], strides = [1, 1]} : vector<16x32xf32> to vector<16x8xf32>
    %213 = vector.extract_strided_slice %160 {offsets = [0, 16], sizes = [16, 8], strides = [1, 1]} : vector<16x32xf32> to vector<16x8xf32>
    %cst_90 = arith.constant dense<0.000000e+00> : vector<8x16xf32>
    %214 = tpu.matmul %211, %212, %cst_90 {dimension_numbers = #tpu.dot_dimension_numbers<[1], [1], [0], [0], [0, 0, 1, 0], [], []>} : vector<8x8xf32>, vector<16x8xf32>, vector<8x16xf32> -> vector<8x16xf32>
    %cst_91 = arith.constant 0.353553385 : f32
    %215 = vector.broadcast %cst_91 : f32 to vector<8x16xf32>
    %216 = arith.mulf %214, %215 : vector<8x16xf32>
    %217 = arith.addf %195, %216 : vector<8x16xf32>
    %cst_92 = arith.constant dense<0xFF800000> : vector<8xf32>
    %218 = vector.multi_reduction <maximumf>, %216, %cst_92 [1] : vector<8x16xf32> to vector<8xf32>
    %219 = vector.shape_cast %218 : vector<8xf32> to vector<8x1xf32>
    %220 = vector.broadcast %219 : vector<8x1xf32> to vector<8x16xf32>
    %221 = arith.subf %216, %220 : vector<8x16xf32>
    %222 = math.exp %221 : vector<8x16xf32>
    %cst_93 = arith.constant dense<0.000000e+00> : vector<8xf32>
    %223 = vector.multi_reduction <add>, %222, %cst_93 [1] : vector<8x16xf32> to vector<8xf32>
    %224 = vector.shape_cast %223 : vector<8xf32> to vector<8x1xf32>
    %225 = vector.broadcast %224 : vector<8x1xf32> to vector<8x16xf32>
    %226 = arith.divf %222, %225 : vector<8x16xf32>
    %cst_94 = arith.constant dense<0.000000e+00> : vector<8x8xf32>
    %227 = tpu.matmul %226, %213, %cst_94 {dimension_numbers = #tpu.dot_dimension_numbers<[1], [0], [0], [1], [0, 0, 1, 1], [], []>} : vector<8x16xf32>, vector<16x8xf32>, vector<8x8xf32> -> vector<8x8xf32>
    %228 = vector.extract_strided_slice %162 {offsets = [16, 0], sizes = [8, 32], strides = [1, 1]} : vector<32x32xf32> to vector<8x32xf32>
    %229 = arith.truncf %227 : vector<8x8xf32> to vector<8x8xbf16>
    %230 = arith.truncf %228 : vector<8x32xf32> to vector<8x32xbf16>
    %cst_95 = arith.constant dense<0.000000e+00> : vector<8x32xf32>
    %231 = tpu.matmul %229, %230, %cst_95 {dimension_numbers = #tpu.dot_dimension_numbers<[1], [0], [0], [1], [0, 0, 1, 1], [], []>} : vector<8x8xbf16>, vector<8x32xbf16>, vector<8x32xf32> -> vector<8x32xf32>
    %232 = arith.addf %210, %231 : vector<8x32xf32>
    %233 = vector.extract_strided_slice %148 {offsets = [0, 24], sizes = [8, 8], strides = [1, 1]} : vector<8x32xf32> to vector<8x8xf32>
    %234 = vector.extract_strided_slice %154 {offsets = [0, 24], sizes = [16, 8], strides = [1, 1]} : vector<16x32xf32> to vector<16x8xf32>
    %235 = vector.extract_strided_slice %160 {offsets = [0, 24], sizes = [16, 8], strides = [1, 1]} : vector<16x32xf32> to vector<16x8xf32>
    %cst_96 = arith.constant dense<0.000000e+00> : vector<8x16xf32>
    %236 = tpu.matmul %233, %234, %cst_96 {dimension_numbers = #tpu.dot_dimension_numbers<[1], [1], [0], [0], [0, 0, 1, 0], [], []>} : vector<8x8xf32>, vector<16x8xf32>, vector<8x16xf32> -> vector<8x16xf32>
    %cst_97 = arith.constant 0.353553385 : f32
    %237 = vector.broadcast %cst_97 : f32 to vector<8x16xf32>
    %238 = arith.mulf %236, %237 : vector<8x16xf32>
    %239 = arith.addf %217, %238 : vector<8x16xf32>
    %cst_98 = arith.constant dense<0xFF800000> : vector<8xf32>
    %240 = vector.multi_reduction <maximumf>, %238, %cst_98 [1] : vector<8x16xf32> to vector<8xf32>
    %241 = vector.shape_cast %240 : vector<8xf32> to vector<8x1xf32>
    %242 = vector.broadcast %241 : vector<8x1xf32> to vector<8x16xf32>
    %243 = arith.subf %238, %242 : vector<8x16xf32>
    %244 = math.exp %243 : vector<8x16xf32>
    %cst_99 = arith.constant dense<0.000000e+00> : vector<8xf32>
    %245 = vector.multi_reduction <add>, %244, %cst_99 [1] : vector<8x16xf32> to vector<8xf32>
    %246 = vector.shape_cast %245 : vector<8xf32> to vector<8x1xf32>
    %247 = vector.broadcast %246 : vector<8x1xf32> to vector<8x16xf32>
    %248 = arith.divf %244, %247 : vector<8x16xf32>
    %cst_100 = arith.constant dense<0.000000e+00> : vector<8x8xf32>
    %249 = tpu.matmul %248, %235, %cst_100 {dimension_numbers = #tpu.dot_dimension_numbers<[1], [0], [0], [1], [0, 0, 1, 1], [], []>} : vector<8x16xf32>, vector<16x8xf32>, vector<8x8xf32> -> vector<8x8xf32>
    %250 = vector.extract_strided_slice %162 {offsets = [24, 0], sizes = [8, 32], strides = [1, 1]} : vector<32x32xf32> to vector<8x32xf32>
    %251 = arith.truncf %249 : vector<8x8xf32> to vector<8x8xbf16>
    %252 = arith.truncf %250 : vector<8x32xf32> to vector<8x32xbf16>
    %cst_101 = arith.constant dense<0.000000e+00> : vector<8x32xf32>
    %253 = tpu.matmul %251, %252, %cst_101 {dimension_numbers = #tpu.dot_dimension_numbers<[1], [0], [0], [1], [0, 0, 1, 1], [], []>} : vector<8x8xbf16>, vector<8x32xbf16>, vector<8x32xf32> -> vector<8x32xf32>
    %254 = arith.addf %232, %253 : vector<8x32xf32>
    %255 = vector.broadcast %164 : vector<1x32xf32> to vector<8x32xf32>
    %256 = arith.addf %254, %255 : vector<8x32xf32>
    %cst_102 = arith.constant 2.500000e-01 : f32
    %257 = vector.broadcast %cst_102 : f32 to vector<8x16xf32>
    %258 = arith.mulf %239, %257 : vector<8x16xf32>
    %259 = arith.addf %138, %256 : vector<8x32xf32>
    %260 = vector.extract_strided_slice %11 {offsets = [2, 0], sizes = [1, 32], strides = [1, 1]} : vector<6x32xf32> to vector<1x32xf32>
    %261 = vector.extract_strided_slice %11 {offsets = [3, 0], sizes = [1, 32], strides = [1, 1]} : vector<6x32xf32> to vector<1x32xf32>
    %cst_103 = arith.constant dense<0.000000e+00> : vector<8xf32>
    %262 = vector.multi_reduction <add>, %259, %cst_103 [1] : vector<8x32xf32> to vector<8xf32>
    %263 = vector.shape_cast %262 : vector<8xf32> to vector<8x1xf32>
    %cst_104 = arith.constant 3.200000e+01 : f32
    %264 = vector.broadcast %cst_104 : f32 to vector<8x1xf32>
    %265 = arith.divf %263, %264 : vector<8x1xf32>
    %266 = vector.broadcast %265 : vector<8x1xf32> to vector<8x32xf32>
    %267 = arith.subf %259, %266 : vector<8x32xf32>
    %268 = arith.mulf %267, %267 : vector<8x32xf32>
    %cst_105 = arith.constant dense<0.000000e+00> : vector<8xf32>
    %269 = vector.multi_reduction <add>, %268, %cst_105 [1] : vector<8x32xf32> to vector<8xf32>
    %270 = vector.shape_cast %269 : vector<8xf32> to vector<8x1xf32>
    %cst_106 = arith.constant 3.200000e+01 : f32
    %271 = vector.broadcast %cst_106 : f32 to vector<8x1xf32>
    %272 = arith.divf %270, %271 : vector<8x1xf32>
    %273 = vector.broadcast %265 : vector<8x1xf32> to vector<8x32xf32>
    %274 = arith.subf %259, %273 : vector<8x32xf32>
    %cst_107 = arith.constant 9.99999974E-6 : f32
    %275 = vector.broadcast %cst_107 : f32 to vector<8x1xf32>
    %276 = arith.addf %272, %275 : vector<8x1xf32>
    %277 = math.rsqrt %276 : vector<8x1xf32>
    %278 = vector.broadcast %277 : vector<8x1xf32> to vector<8x32xf32>
    %279 = arith.mulf %274, %278 : vector<8x32xf32>
    %280 = vector.broadcast %260 : vector<1x32xf32> to vector<8x32xf32>
    %281 = arith.mulf %279, %280 : vector<8x32xf32>
    %282 = vector.broadcast %261 : vector<1x32xf32> to vector<8x32xf32>
    %283 = arith.addf %281, %282 : vector<8x32xf32>
    %c0_108 = arith.constant 0 : index
    %c0_109 = arith.constant 0 : index
    %c0_110 = arith.constant 0 : index
    %c0_111 = arith.constant 0 : index
    %284 = vector.load %arg17[%c0_108, %c0_109, %c0_110, %c0_111] : memref<1x1x32x128xbf16, #tpu.memory_space<vmem>>, vector<1x1x32x128xbf16>
    %285 = vector.shape_cast %284 : vector<1x1x32x128xbf16> to vector<32x128xbf16>
    %286 = arith.truncf %283 : vector<8x32xf32> to vector<8x32xbf16>
    %cst_112 = arith.constant dense<0.000000e+00> : vector<8x128xf32>
    %287 = tpu.matmul %286, %285, %cst_112 {dimension_numbers = #tpu.dot_dimension_numbers<[1], [0], [0], [1], [0, 0, 1, 1], [], []>} : vector<8x32xbf16>, vector<32x128xbf16>, vector<8x128xf32> -> vector<8x128xf32>
    %c0_113 = arith.constant 0 : index
    %c0_114 = arith.constant 0 : index
    %c0_115 = arith.constant 0 : index
    %c0_116 = arith.constant 0 : index
    %288 = vector.load %arg18[%c0_113, %c0_114, %c0_115, %c0_116] : memref<1x1x1x128xf32, #tpu.memory_space<vmem>>, vector<1x1x1x128xf32>
    %289 = vector.shape_cast %288 : vector<1x1x1x128xf32> to vector<1x128xf32>
    %290 = vector.broadcast %289 : vector<1x128xf32> to vector<8x128xf32>
    %291 = arith.addf %287, %290 : vector<8x128xf32>
    %cst_117 = arith.constant 0.000000e+00 : f32
    %292 = vector.broadcast %cst_117 : f32 to vector<8x128xf32>
    %293 = arith.maximumf %291, %292 : vector<8x128xf32>
    %c0_118 = arith.constant 0 : index
    %c0_119 = arith.constant 0 : index
    %c0_120 = arith.constant 0 : index
    %c0_121 = arith.constant 0 : index
    %294 = vector.load %arg19[%c0_118, %c0_119, %c0_120, %c0_121] : memref<1x1x128x32xbf16, #tpu.memory_space<vmem>>, vector<1x1x128x32xbf16>
    %295 = vector.shape_cast %294 : vector<1x1x128x32xbf16> to vector<128x32xbf16>
    %296 = arith.truncf %293 : vector<8x128xf32> to vector<8x128xbf16>
    %cst_122 = arith.constant dense<0.000000e+00> : vector<8x32xf32>
    %297 = tpu.matmul %296, %295, %cst_122 {dimension_numbers = #tpu.dot_dimension_numbers<[1], [0], [0], [1], [0, 0, 1, 1], [], []>} : vector<8x128xbf16>, vector<128x32xbf16>, vector<8x32xf32> -> vector<8x32xf32>
    %298 = arith.addf %283, %297 : vector<8x32xf32>
    %c0_123 = arith.constant 0 : index
    %c0_124 = arith.constant 0 : index
    %c0_125 = arith.constant 0 : index
    %c0_126 = arith.constant 0 : index
    %299 = vector.load %arg20[%c0_123, %c0_124, %c0_125, %c0_126] : memref<1x1x1x32xf32, #tpu.memory_space<vmem>>, vector<1x1x1x32xf32>
    %300 = vector.shape_cast %299 : vector<1x1x1x32xf32> to vector<1x32xf32>
    %301 = vector.broadcast %300 : vector<1x32xf32> to vector<8x32xf32>
    %302 = arith.addf %298, %301 : vector<8x32xf32>
    %303 = vector.extract_strided_slice %11 {offsets = [4, 0], sizes = [1, 32], strides = [1, 1]} : vector<6x32xf32> to vector<1x32xf32>
    %304 = vector.extract_strided_slice %11 {offsets = [5, 0], sizes = [1, 32], strides = [1, 1]} : vector<6x32xf32> to vector<1x32xf32>
    %cst_127 = arith.constant dense<0.000000e+00> : vector<8xf32>
    %305 = vector.multi_reduction <add>, %302, %cst_127 [1] : vector<8x32xf32> to vector<8xf32>
    %306 = vector.shape_cast %305 : vector<8xf32> to vector<8x1xf32>
    %cst_128 = arith.constant 3.200000e+01 : f32
    %307 = vector.broadcast %cst_128 : f32 to vector<8x1xf32>
    %308 = arith.divf %306, %307 : vector<8x1xf32>
    %309 = vector.broadcast %308 : vector<8x1xf32> to vector<8x32xf32>
    %310 = arith.subf %302, %309 : vector<8x32xf32>
    %311 = arith.mulf %310, %310 : vector<8x32xf32>
    %cst_129 = arith.constant dense<0.000000e+00> : vector<8xf32>
    %312 = vector.multi_reduction <add>, %311, %cst_129 [1] : vector<8x32xf32> to vector<8xf32>
    %313 = vector.shape_cast %312 : vector<8xf32> to vector<8x1xf32>
    %cst_130 = arith.constant 3.200000e+01 : f32
    %314 = vector.broadcast %cst_130 : f32 to vector<8x1xf32>
    %315 = arith.divf %313, %314 : vector<8x1xf32>
    %316 = vector.broadcast %308 : vector<8x1xf32> to vector<8x32xf32>
    %317 = arith.subf %302, %316 : vector<8x32xf32>
    %cst_131 = arith.constant 9.99999974E-6 : f32
    %318 = vector.broadcast %cst_131 : f32 to vector<8x1xf32>
    %319 = arith.addf %315, %318 : vector<8x1xf32>
    %320 = math.rsqrt %319 : vector<8x1xf32>
    %321 = vector.broadcast %320 : vector<8x1xf32> to vector<8x32xf32>
    %322 = arith.mulf %317, %321 : vector<8x32xf32>
    %323 = vector.broadcast %303 : vector<1x32xf32> to vector<8x32xf32>
    %324 = arith.mulf %322, %323 : vector<8x32xf32>
    %325 = vector.broadcast %304 : vector<1x32xf32> to vector<8x32xf32>
    %326 = arith.addf %324, %325 : vector<8x32xf32>
    %c0_132 = arith.constant 0 : index
    %c0_133 = arith.constant 0 : index
    %327 = vector.load %arg24[%c0_132, %c0_133] : memref<8x32xf32, #tpu.memory_space<vmem>>, vector<8x32xf32>
    tpu.vector_store %arg24[%c0_132, %c0_133], %326 {strides = array<i32>} : memref<8x32xf32, #tpu.memory_space<vmem>>, vector<8x32xf32>,
    %c0_134 = arith.constant 0 : index
    %c0_135 = arith.constant 0 : index
    %328 = vector.load %arg7[%c0_134, %c0_135] : memref<32x9xbf16, #tpu.memory_space<vmem>>, vector<32x9xbf16>
    %329 = arith.truncf %326 : vector<8x32xf32> to vector<8x32xbf16>
    %cst_136 = arith.constant dense<0.000000e+00> : vector<8x9xf32>
    %330 = tpu.matmul %329, %328, %cst_136 {dimension_numbers = #tpu.dot_dimension_numbers<[1], [0], [0], [1], [0, 0, 1, 1], [], []>} : vector<8x32xbf16>, vector<32x9xbf16>, vector<8x9xf32> -> vector<8x9xf32>
    %c0_137 = arith.constant 0 : index
    %c0_138 = arith.constant 0 : index
    %331 = vector.load %arg8[%c0_137, %c0_138] : memref<1x9xf32, #tpu.memory_space<vmem>>, vector<1x9xf32>
    %332 = vector.broadcast %331 : vector<1x9xf32> to vector<8x9xf32>
    %333 = arith.addf %330, %332 : vector<8x9xf32>
    %c0_139 = arith.constant 0 : index
    %c0_140 = arith.constant 0 : index
    %c0_141 = arith.constant 0 : index
    %c0_142 = arith.constant 0 : index
    %334 = vector.load %arg22[%c0_139, %c0_140, %c0_141, %c0_142] : memref<1x1x8x9xf32, #tpu.memory_space<vmem>>, vector<1x1x8x9xf32>
    %335 = vector.shape_cast %334 : vector<1x1x8x9xf32> to vector<8x9xf32>
    %336 = vector.shape_cast %333 : vector<8x9xf32> to vector<1x1x8x9xf32>
    tpu.vector_store %arg22[%c0_139, %c0_140, %c0_141, %c0_142], %336 {strides = array<i32>} : memref<1x1x8x9xf32, #tpu.memory_space<vmem>>, vector<1x1x8x9xf32>,
    %c0_143 = arith.constant 0 : index
    %c0_144 = arith.constant 0 : index
    %c0_145 = arith.constant 0 : index
    %c0_146 = arith.constant 0 : index
    %337 = vector.load %arg23[%c0_143, %c0_144, %c0_145, %c0_146] : memref<1x1x8x16xf32, #tpu.memory_space<vmem>>, vector<1x1x8x16xf32>
    %338 = vector.shape_cast %337 : vector<1x1x8x16xf32> to vector<8x16xf32>
    %339 = vector.shape_cast %258 : vector<8x16xf32> to vector<1x1x8x16xf32>
    tpu.vector_store %arg23[%c0_143, %c0_144, %c0_145, %c0_146], %339 {strides = array<i32>} : memref<1x1x8x16xf32, #tpu.memory_space<vmem>>, vector<1x1x8x16xf32>,
    return
  }
  func.func @transform_0(%arg0: i32, %arg1: i32, %arg2: i32) -> (i32, i32, i32, i32) {
    %c0_i32 = arith.constant 0 : i32
    %c0_i32_0 = arith.constant 0 : i32
    %c0_i32_1 = arith.constant 0 : i32
    return %arg1, %arg0, %c0_i32, %c0_i32_0 : i32, i32, i32, i32
  }
  func.func @transform_1(%arg0: i32, %arg1: i32, %arg2: i32) -> (i32, i32, i32) {
    %c0_i32 = arith.constant 0 : i32
    %c0_i32_0 = arith.constant 0 : i32
    %c0_i32_1 = arith.constant 0 : i32
    return %arg1, %c0_i32, %c0_i32_0 : i32, i32, i32
  }
  func.func @transform_2(%arg0: i32, %arg1: i32, %arg2: i32) -> (i32, i32, i32) {
    %c0_i32 = arith.constant 0 : i32
    %c0_i32_0 = arith.constant 0 : i32
    %c0_i32_1 = arith.constant 0 : i32
    return %arg1, %c0_i32, %c0_i32_0 : i32, i32, i32
  }
  func.func @transform_3(%arg0: i32, %arg1: i32, %arg2: i32) -> (i32, i32) {
    %c0_i32 = arith.constant 0 : i32
    %c0_i32_0 = arith.constant 0 : i32
    %c0_i32_1 = arith.constant 0 : i32
    return %c0_i32, %c0_i32_0 : i32, i32
  }
  func.func @transform_4(%arg0: i32, %arg1: i32, %arg2: i32) -> (i32, i32) {
    %c0_i32 = arith.constant 0 : i32
    %c0_i32_0 = arith.constant 0 : i32
    %c0_i32_1 = arith.constant 0 : i32
    return %c0_i32, %c0_i32_0 : i32, i32
  }
  func.func @transform_5(%arg0: i32, %arg1: i32, %arg2: i32) -> (i32, i32) {
    %c0_i32 = arith.constant 0 : i32
    %c0_i32_0 = arith.constant 0 : i32
    %c0_i32_1 = arith.constant 0 : i32
    return %c0_i32, %c0_i32_0 : i32, i32
  }
  func.func @transform_6(%arg0: i32, %arg1: i32, %arg2: i32) -> (i32, i32, i32, i32) {
    %c0_i32 = arith.constant 0 : i32
    %c0_i32_0 = arith.constant 0 : i32
    %c0_i32_1 = arith.constant 0 : i32
    return %arg1, %arg2, %c0_i32, %c0_i32_0 : i32, i32, i32, i32
  }
  func.func @transform_7(%arg0: i32, %arg1: i32, %arg2: i32) -> (i32, i32, i32, i32) {
    %c0_i32 = arith.constant 0 : i32
    %c0_i32_0 = arith.constant 0 : i32
    %c0_i32_1 = arith.constant 0 : i32
    return %arg1, %arg2, %c0_i32, %c0_i32_0 : i32, i32, i32, i32
  }
  func.func @transform_8(%arg0: i32, %arg1: i32, %arg2: i32) -> (i32, i32, i32, i32) {
    %c0_i32 = arith.constant 0 : i32
    %c0_i32_0 = arith.constant 0 : i32
    %c0_i32_1 = arith.constant 0 : i32
    return %arg1, %arg2, %c0_i32, %c0_i32_0 : i32, i32, i32, i32
  }
  func.func @transform_9(%arg0: i32, %arg1: i32, %arg2: i32) -> (i32, i32, i32, i32) {
    %c0_i32 = arith.constant 0 : i32
    %c0_i32_0 = arith.constant 0 : i32
    %c0_i32_1 = arith.constant 0 : i32
    return %arg1, %arg2, %c0_i32, %c0_i32_0 : i32, i32, i32, i32
  }
  func.func @transform_10(%arg0: i32, %arg1: i32, %arg2: i32) -> (i32, i32, i32, i32) {
    %c0_i32 = arith.constant 0 : i32
    %c0_i32_0 = arith.constant 0 : i32
    %c0_i32_1 = arith.constant 0 : i32
    return %arg1, %arg2, %c0_i32, %c0_i32_0 : i32, i32, i32, i32
  }
  func.func @transform_11(%arg0: i32, %arg1: i32, %arg2: i32) -> (i32, i32, i32, i32) {
    %c0_i32 = arith.constant 0 : i32
    %c0_i32_0 = arith.constant 0 : i32
    %c0_i32_1 = arith.constant 0 : i32
    return %arg1, %arg2, %c0_i32, %c0_i32_0 : i32, i32, i32, i32
  }
  func.func @transform_12(%arg0: i32, %arg1: i32, %arg2: i32) -> (i32, i32, i32, i32) {
    %c0_i32 = arith.constant 0 : i32
    %c0_i32_0 = arith.constant 0 : i32
    %c0_i32_1 = arith.constant 0 : i32
    return %arg1, %arg2, %c0_i32, %c0_i32_0 : i32, i32, i32, i32
  }
  func.func @transform_13(%arg0: i32, %arg1: i32, %arg2: i32) -> (i32, i32, i32, i32) {
    %c0_i32 = arith.constant 0 : i32
    %c0_i32_0 = arith.constant 0 : i32
    %c0_i32_1 = arith.constant 0 : i32
    return %arg1, %arg2, %c0_i32, %c0_i32_0 : i32, i32, i32, i32
  }
  func.func @transform_14(%arg0: i32, %arg1: i32, %arg2: i32) -> (i32, i32, i32, i32) {
    %c0_i32 = arith.constant 0 : i32
    %c0_i32_0 = arith.constant 0 : i32
    %c0_i32_1 = arith.constant 0 : i32
    return %arg1, %arg2, %c0_i32, %c0_i32_0 : i32, i32, i32, i32
  }
  func.func @transform_15(%arg0: i32, %arg1: i32, %arg2: i32) -> (i32, i32, i32, i32) {
    %c0_i32 = arith.constant 0 : i32
    %c0_i32_0 = arith.constant 0 : i32
    %c0_i32_1 = arith.constant 0 : i32
    return %arg1, %arg2, %c0_i32, %c0_i32_0 : i32, i32, i32, i32
  }
  func.func @transform_16(%arg0: i32, %arg1: i32, %arg2: i32) -> (i32, i32, i32, i32) {
    %c0_i32 = arith.constant 0 : i32
    %c0_i32_0 = arith.constant 0 : i32
    %c0_i32_1 = arith.constant 0 : i32
    return %arg1, %arg2, %c0_i32, %c0_i32_0 : i32, i32, i32, i32
  }
  func.func @transform_17(%arg0: i32, %arg1: i32, %arg2: i32) -> (i32, i32, i32, i32) {
    %c0_i32 = arith.constant 0 : i32
    %c0_i32_0 = arith.constant 0 : i32
    %c0_i32_1 = arith.constant 0 : i32
    return %arg1, %arg2, %c0_i32, %c0_i32_0 : i32, i32, i32, i32
  }
  func.func @transform_18(%arg0: i32, %arg1: i32, %arg2: i32) -> (i32, i32, i32, i32) {
    %c0_i32 = arith.constant 0 : i32
    %c0_i32_0 = arith.constant 0 : i32
    %c0_i32_1 = arith.constant 0 : i32
    return %arg1, %arg2, %c0_i32, %c0_i32_0 : i32, i32, i32, i32
  }
  func.func @transform_19(%arg0: i32, %arg1: i32, %arg2: i32) -> (i32, i32, i32, i32) {
    %c0_i32 = arith.constant 0 : i32
    %c0_i32_0 = arith.constant 0 : i32
    %c0_i32_1 = arith.constant 0 : i32
    return %arg1, %arg0, %c0_i32, %c0_i32_0 : i32, i32, i32, i32
  }
  func.func @transform_20(%arg0: i32, %arg1: i32, %arg2: i32) -> (i32, i32, i32, i32) {
    %c0_i32 = arith.constant 0 : i32
    %c0_i32_0 = arith.constant 0 : i32
    %c0_i32_1 = arith.constant 0 : i32
    return %arg1, %arg0, %c0_i32, %c0_i32_0 : i32, i32, i32, i32
  }
}

module attributes {stable_mosaic.version = 11 : i64} {
  func.func @_seg_inference_kernel(%arg0: i32, %arg1: memref<1x8x8xf32, #tpu.memory_space<vmem>>, %arg2: memref<1x8x256xf32, #tpu.memory_space<vmem>>, %arg3: memref<1x8x256xf32, #tpu.memory_space<vmem>>) attributes {dimension_semantics = [#tpu.dimension_semantics<parallel>], iteration_bounds = array<i64: 2>, scalar_prefetch = 0 : i64, scratch_operands = 0 : i64, tpu.core_type = #tpu.core_type<tc>, window_params = [{transform_indices = @transform_0, window_bounds = array<i64: 1, 8, 8>}, {transform_indices = @transform_1, window_bounds = array<i64: 1, 8, 256>}, {transform_indices = @transform_2, window_bounds = array<i64: 1, 8, 256>}]} {
    %c0 = arith.constant 0 : index
    %c0_0 = arith.constant 0 : index
    %c0_1 = arith.constant 0 : index
    %0 = vector.load %arg1[%c0, %c0_0, %c0_1] : memref<1x8x8xf32, #tpu.memory_space<vmem>>, vector<1x8x8xf32>
    %1 = vector.shape_cast %0 : vector<1x8x8xf32> to vector<8x8xf32>
    %c0_2 = arith.constant 0 : index
    %c0_3 = arith.constant 0 : index
    %c0_4 = arith.constant 0 : index
    %2 = vector.load %arg2[%c0_2, %c0_3, %c0_4] : memref<1x8x256xf32, #tpu.memory_space<vmem>>, vector<1x8x256xf32>
    %3 = vector.shape_cast %2 : vector<1x8x256xf32> to vector<8x256xf32>
    %cst = arith.constant 0.000000e+00 : f32
    %4 = vector.broadcast %cst : f32 to vector<8x256xf32>
    %5 = arith.subf %4, %3 : vector<8x256xf32>
    %6 = math.exp %5 : vector<8x256xf32>
    %cst_5 = arith.constant 1.000000e+00 : f32
    %7 = vector.broadcast %cst_5 : f32 to vector<8x256xf32>
    %8 = arith.addf %7, %6 : vector<8x256xf32>
    %cst_6 = arith.constant 1.000000e+00 : f32
    %9 = vector.broadcast %cst_6 : f32 to vector<8x256xf32>
    %10 = arith.divf %9, %8 : vector<8x256xf32>
    %11 = arith.truncf %1 : vector<8x8xf32> to vector<8x8xbf16>
    %12 = arith.truncf %10 : vector<8x256xf32> to vector<8x256xbf16>
    %cst_7 = arith.constant dense<0.000000e+00> : vector<8x256xf32>
    %13 = tpu.matmul %11, %12, %cst_7 {dimension_numbers = #tpu.dot_dimension_numbers<[1], [0], [0], [1], [0, 0, 1, 1], [], []>} : vector<8x8xbf16>, vector<8x256xbf16>, vector<8x256xf32> -> vector<8x256xf32>
    %c0_8 = arith.constant 0 : index
    %c0_9 = arith.constant 0 : index
    %c0_10 = arith.constant 0 : index
    %14 = vector.load %arg3[%c0_8, %c0_9, %c0_10] : memref<1x8x256xf32, #tpu.memory_space<vmem>>, vector<1x8x256xf32>
    %15 = vector.shape_cast %14 : vector<1x8x256xf32> to vector<8x256xf32>
    %16 = vector.shape_cast %13 : vector<8x256xf32> to vector<1x8x256xf32>
    tpu.vector_store %arg3[%c0_8, %c0_9, %c0_10], %16 {strides = array<i32>} : memref<1x8x256xf32, #tpu.memory_space<vmem>>, vector<1x8x256xf32>,
    return
  }
  func.func @transform_0(%arg0: i32) -> (i32, i32, i32) {
    %c0_i32 = arith.constant 0 : i32
    %c0_i32_0 = arith.constant 0 : i32
    %c0_i32_1 = arith.constant 0 : i32
    return %arg0, %c0_i32, %c0_i32_0 : i32, i32, i32
  }
  func.func @transform_1(%arg0: i32) -> (i32, i32, i32) {
    %c0_i32 = arith.constant 0 : i32
    %c0_i32_0 = arith.constant 0 : i32
    %c0_i32_1 = arith.constant 0 : i32
    return %arg0, %c0_i32, %c0_i32_0 : i32, i32, i32
  }
  func.func @transform_2(%arg0: i32) -> (i32, i32, i32) {
    %c0_i32 = arith.constant 0 : i32
    %c0_i32_0 = arith.constant 0 : i32
    %c0_i32_1 = arith.constant 0 : i32
    return %arg0, %c0_i32, %c0_i32_0 : i32, i32, i32
  }
}

</mosaic_0001>

<bundles_post_ra>
// kernel: reverse
= control target key start
LH: loop header
LB: loop body
LE: loop exit
PB: predicated region body
PF: predicated region fallthrough
CT: control target
= control target key end

     0   :  { %s152_s0 = inlined_call_operand.vmem [shape: f32[3,2,16,32], index: 0, kind: input, shape index: {}]   ;;  %s153_s1 = inlined_call_operand.vmem [shape: f32[3,2,16,32], index: 1, kind: output, shape index: {}]  }
   0x1   :  { %v48_v0 = vld [vmem:[%s152_s0 + $0x40] sm:$0xff]  ;;  %v52_v3 = vld [vmem:[%s152_s0 + $0x50] sm:$0xff]  ;;  %v58_v6 = vld [vmem:[%s152_s0 + $0x48] sm:$0xff] }
   0x2   :  { %v49_v1 = vld [vmem:[%s152_s0 + $0x20] sm:$0xff]  ;;  %4 = vst [vmem:[%s153_s1] sm:$0xff] %v48_v0  ;;  %v54_v4 = vld [vmem:[%s152_s0 + $0x30] sm:$0xff]  ;;  %53 = vst [vmem:[%s153_s1 + $0x10] sm:$0xff] %v52_v3 }
   0x3   :  { %v9_v2 = vld [vmem:[%s152_s0] sm:$0xff]  ;;  %50 = vst [vmem:[%s153_s1 + $0x20] sm:$0xff] %v49_v1  ;;  %v56_v5 = vld [vmem:[%s152_s0 + $0x10] sm:$0xff]  ;;  %55 = vst [vmem:[%s153_s1 + $0x30] sm:$0xff] %v54_v4 }
   0x4   :  { %51 = vst [vmem:[%s153_s1 + $0x40] sm:$0xff] %v9_v2  ;;  %57 = vst [vmem:[%s153_s1 + $0x50] sm:$0xff] %v56_v5  ;;  %v60_v7 = vld [vmem:[%s152_s0 + $0x28] sm:$0xff]  ;;  %v64_v9 = vld [vmem:[%s152_s0 + $0x58] sm:$0xff] }
   0x5   :  { %v62_v8 = vld [vmem:[%s152_s0 + $0x8] sm:$0xff]  ;;  %59 = vst [vmem:[%s153_s1 + $0x8] sm:$0xff] %v58_v6  ;;  %61 = vst [vmem:[%s153_s1 + $0x28] sm:$0xff] %v60_v7  ;;  %v66_v10 = vld [vmem:[%s152_s0 + $0x38] sm:$0xff] }
   0x6   :  { %63 = vst [vmem:[%s153_s1 + $0x48] sm:$0xff] %v62_v8  ;;  %v68_v11 = vld [vmem:[%s152_s0 + $0x18] sm:$0xff]  ;;  %65 = vst [vmem:[%s153_s1 + $0x18] sm:$0xff] %v64_v9 }
   0x7   :  { %67 = vst [vmem:[%s153_s1 + $0x38] sm:$0xff] %v66_v10  ;;  %69 = vst [vmem:[%s153_s1 + $0x58] sm:$0xff] %v68_v11 }

// kernel: forward.3
= control target key start
LH: loop header
LB: loop body
LE: loop exit
PB: predicated region body
PF: predicated region fallthrough
CT: control target
= control target key end

     0   :  { %s3289_s29 = smov 0   ;;  %s3291_s30 = smov 0   ;;  %s3717_s0 = inlined_call_operand.vmem [shape: f32[2,16,48], index: 0, kind: input, shape index: {}]   ;;  %s3718_s1 = inlined_call_operand.vmem [shape: bf16[48,32], index: 1, kind: input, shape index: {}]   ;;  %s3719_s2 = inlined_call_operand.vmem [shape: f32[1,32], index: 2, kind: input, shape index: {}]   ;;  %s3720_s3 = inlined_call_operand.vmem [shape: f32[1,32], index: 3, kind: input, shape index: {}]   ;;  %s3721_s4 = inlined_call_operand.vmem [shape: f32[17,32], index: 4, kind: input, shape index: {}]   ;;  %s3722_s5 = inlined_call_operand.vmem [shape: f32[3,4,32], index: 5, kind: input, shape index: {}]   ;;  %s3723_s6 = inlined_call_operand.vmem [shape: bf16[3,32,96], index: 6, kind: input, shape index: {}]   ;;  %s3724_s7 = inlined_call_operand.vmem [shape: f32[3,1,96], index: 7, kind: input, shape index: {}]   ;;  %s3725_s8 = inlined_call_operand.vmem [shape: f32[3,32,32], index: 8, kind: input, shape index: {}]   ;;  %s3726_s9 = inlined_call_operand.vmem [shape: f32[3,1,32], index: 9, kind: input, shape index: {}]   ;;  %s3727_s10 = inlined_call_operand.vmem [shape: bf16[3,32,128], index: 10, kind: input, shape index: {}]   ;;  %s3728_s11 = inlined_call_operand.vmem [shape: f32[3,1,128], index: 11, kind: input, shape index: {}]   ;;  %s3729_s12 = inlined_call_operand.vmem [shape: bf16[3,128,32], index: 12, kind: input, shape index: {}]   ;;  %s3730_s13 = inlined_call_operand.vmem [shape: f32[3,1,32], index: 13, kind: input, shape index: {}]   ;;  %s3731_s14 = inlined_call_operand.vmem [shape: f32[3,2,17,32], index: 14, kind: output, shape index: {}]  }
   0x1   :  { %3737 = sst [smem:[#allocation9_spill]] %s3717_s0  ;;  %s3293_s15 = smov 0  }
   0x2   :  { %3738 = sst [smem:[#allocation10_spill]] %s3719_s2  ;;  %s3295_s16 = smov 0  }
   0x3   :  { %3739 = sst [smem:[#allocation11_spill]] %s3720_s3  ;;  %s3297_s17 = smov 0  }
   0x4   :  { %3740 = sst [smem:[#allocation12_spill]] %s3721_s4 }
   0x5   :  { %3741 = sst [smem:[#allocation13_spill]] %s3722_s5 }
   0x6   :  { %3742 = sst [smem:[#allocation14_spill]] %s3723_s6 }
   0x7   :  { %3743 = sst [smem:[#allocation15_spill]] %s3725_s8 }
   0x8 LB: > { %3744 = sst [smem:[#allocation3_spill]] %s3188_s15  ;;  %s33_s18 = sadd.s32 1, %s3188_s15  ;;  %s3196_s17 = sphi %s3297_s17, %s24_s17   ;;  %s3192_s16 = sphi %s3295_s16, %s3766_s16   ;;  %s3188_s15 = sphi %s3293_s15, %s3765_s15   ;;  %s3184_s30 = sphi %s3291_s30, %s3764_s30   ;;  %s3180_s29 = sphi %s3289_s29, %s3763_s29  }
   0x9   : > { %3745 = sst [smem:[#allocation4_spill]] %s3192_s16  ;;  %s36_s19 = sadd.s32 1, %s3192_s16 }
   0xa   : > { %3746 = sst [smem:[#allocation5_spill]] %s3196_s17  ;;  %p34_p0 = scmp.ge.s32.totalorder %s33_s18, 3 }
   0xb   : > { %p2577_p1 = scmp.ge.s32.totalorder %s3196_s17, 1  ;;  %p507_p2 = scmp.lt.s32.totalorder %s3196_s17, 7 }
   0xc   : > { %s3768_s18 = smov (%p34_p0, %s33_s18), 0  ;;  %s3770_s19 = smov (!%p34_p0, %s36_s19), %s3192_s16 }
   0xd   : > { %3747 = sst [smem:[#allocation6_spill]] %s3768_s18  ;;  %p508_p3 = pnand %p2577_p1, %p507_p2 }
   0xe   : > { %p38_p4 = scmp.ge.s32.totalorder %s3770_s19, 2 }
   0xf   : > { %511 = sbr.rel (%p508_p3) target bundleno = 4287 (0x10bf), region = 76 }
  0x10   : > { %s3772_s19 = smov (%p38_p4, %s3770_s19), 0 }
  0x11   : > { %3748 = sst [smem:[#allocation7_spill]] %s3772_s19 }
  0x16   : > { %p593_p5 = scmp.lt.s32.totalorder %s3184_s30, 1  ;;  %p598_p6 = scmp.lt.s32.totalorder %s3180_s29, 2 }
  0x17   : > { %s3749_s0 = sld [smem:[#allocation9_spill]]  ;;  %s3751_s5 = sld [smem:[#allocation13_spill]] }
  0x18   : > { %s3774_s30 = smov (!%p593_p5, %s3184_s30), 1  ;;  %s3752_s6 = sld [smem:[#allocation14_spill]] }
  0x19   : > { %s3323_s20 = scalar_select %p598_p6, %s3180_s29, 2 }
  0x1a   : > { %s2666_s21 = sshll.u32 %s3774_s30, 4  ;;  %s2975_s22 = smul.u32 3, %s3774_s30 }
  0x1b   : > { %s2580_s26 = sshll.u32 %s3323_s20, 2  ;;  %s2667_s18 = sshll.u32 %s3323_s20, 4 }
  0x1c   : > { %s2668_s3 = sshll.u32 %s3323_s20, 5  ;;  %s3753_s8 = sld [smem:[#allocation15_spill]] }
  0x1d   : > { %s3328_s25 = scalar_lea.vmem %s3749_s0, %s2666_s21  ;;  %s3334_s19 = scalar_lea.vmem %s3751_s5, %s2580_s26 }
  0x1e   : > { %3750 = sst [smem:[#allocation8_spill]] %s3328_s25  ;;  %s3340_s17 = scalar_lea.vmem %s3752_s6, %s2667_s18 }
  0x1f   : > { %s3359_s15 = scalar_lea.vmem %s3727_s10, %s2667_s18  ;;  %s625_s2 = scalar_lea.vmem %s3728_s11, %s3323_s20 }
  0x20   : > { %s2670_s4 = sshll.u32 %s3323_s20, 6  ;;  %s633_s0 = scalar_lea.vmem %s3730_s13, %s3323_s20 }
  0x21   : > { %s3369_s23 = scalar_lea.vmem %s3729_s12, %s2670_s4  ;;  %p2590_p7 = scmp.ne.s32.totalorder %s3180_s29, 0 }
  0x22   : > { %s3354_s26 = scalar_lea.vmem %s3753_s8, %s2668_s3  ;;  %s2976_s3 = smul.u32 6, %s3323_s20  ;;  %v3033_v0 = vld [vmem:[%s3718_s1] sm:$0xff] (!%p2590_p7)   ;;  %v3198_v1 = vmov (!%p2590_p7), 0.0   ;;  %v3034_v2 = vld [vmem:[%s3718_s1 + $0x8] sm:$0xff] (!%p2590_p7)   ;;  %vm3199_vm0 = vmmov (!%p2590_p7), 0   ;;  %v3035_v3 = vld [vmem:[%s3718_s1 + $0x10] sm:$0xff] (!%p2590_p7)  }
  0x23   : > { %647 = sbr.rel (%p2590_p7) target bundleno = 266 (0x10a), region = 80  ;;  %s3754_s6 = sld [smem:[#allocation8_spill]] (!%p2590_p7)  ;;  %2753 = vmatprep.subr.bf16.mxu0 (!%p2590_p7), %v3198_v1  ;;  %2759 = vmatprep.mubr.msk.bf16.mxu0 (!%p2590_p7), %vm3199_vm0, %v3198_v1  ;;  %vm682_vm1 = vcmask (!%p2590_p7), 392192   ;;  %vm737_vm2 = vcmask (!%p2590_p7), 253952   ;;  %vm731_vm3 = vcmask (!%p2590_p7), 261120  }
  0x24   : > { %s640_s25 = sadd.s32 %s2976_s3, %s2975_s22  ;;  %2754 = vmatpush3.bf16.msra.mxu0 (!%p2590_p7), %v3033_v0  ;;  %s3755_s21 = sld [smem:[#allocation11_spill]] (!%p2590_p7) }
  0x25   : > { %s2589_s8 = sshll.u32 %s640_s25, 3  ;;  %2755 = vmatprep.subr.bf16.mxu0 (!%p2590_p7), %v3198_v1  ;;  %s3756_s27 = sld [smem:[#allocation12_spill]] (!%p2590_p7) }
  0x26   : > { %s3379_s28 = scalar_lea.vmem %s3731_s14, %s2589_s8  ;;  %s3757_s16 = sld [smem:[#allocation10_spill]] (!%p2590_p7) }
  0x28   : > { %2756 = vmatpush3.bf16.msra.mxu0 (!%p2590_p7), %v3034_v2 }
  0x29   : > { %v648_v4 = vld [vmem:[%s3754_s6] sm:$0xff] (!%p2590_p7)  ;;  %v649_v5 = vld [vmem:[%s3754_s6 + $0x8] sm:$0xff] (!%p2590_p7)  ;;  %2757 = vmatprep.subr.bf16.mxu0 (!%p2590_p7), %v3198_v1 }
  0x2a   : > { %v656_v6 = vpack.c.bf16 %v649_v5, %v648_v4  ;;  %v734_v7 = vld [vmem:[%s3755_s21] sm:$0x1] }
  0x2b   : > { %v735_v8 = vld [vmem:[%s3756_s27 + $0x10] sm:$0x1]  ;;  %v727_v12 = vld [vmem:[%s3756_s27] sm:$0xff]  ;;  %v728_v16 = vld [vmem:[%s3756_s27 + $0x8] sm:$0xff] }
  0x2c   : > { %2758 = vmatpush3.bf16.msra.mxu0 %v3035_v3  ;;  %v736_v9 = vadd.f32 %v735_v8, %v734_v7  ;;  %v2591_v10 = vld [vmem:[%s3757_s16] ss:$0 sm:$0xff] }
  0x2e   : > { %738 = vst.msk [vmem:[#allocation2 + $0x10] sm:$0x1] %vm737_vm2, %v736_v9 }
  0x2f   : > { %2760 = vmatmul.mubr.msk.bf16.vlgmr.msra.gmra.mrb[0].mxu0 %vm682_vm1, %v656_v6 }
 0x102   : > { %v720_v11 = vpop.f32.mrb[0].mxu0 }
 0x103   : > { %v721_v13 = vadd.f32 %v2591_v10, %v720_v11  ;;  %v2761_v14 = vpop.f32.mrb[1].mxu0 }
 0x104   : > { %v723_v15 = vpop.f32.mrb[2].mxu0 }
 0x105   : > { %v729_v17 = vadd.f32 %v727_v12, %v721_v13  ;;  %v724_v18 = vadd.f32 %v2591_v10, %v723_v15  ;;  %v2762_v19 = vpop.f32.mrb[3].mxu0 }
 0x107   : > { %732 = vst.msk [vmem:[#allocation2] sm:$0xff] %vm731_vm3, %v729_v17  ;;  %v730_v20 = vadd.f32 %v728_v16, %v724_v18 }
 0x109   : > { %733 = vst.msk [vmem:[#allocation2 + $0x8] sm:$0xff] %vm731_vm3, %v730_v20 }
 0x10a PF: > { %vm743_vm4 = vcmask 261120   ;;  %v741_v22 = vld [vmem:[#allocation2 + $0x10] sm:$0x1]  ;;  %vm750_vm5 = vcmask 253952   ;;  %v3076_v42 = vld [vmem:[%s3340_s17] sm:$0xff]   ;;  %v3077_v43 = vld [vmem:[%s3340_s17 + $0x8] sm:$0xff]   ;;  %v785_v51 = vlaneseq  ;;  %s3758_s24 = scalar_lea.vmem %s3724_s7, %s3323_s20  ;;  %s3761_s29 = scalar_lea.vmem %s3726_s9, %s3323_s20 }
 0x10b   : > { %v751_v25 = vsel %vm750_vm5, %v741_v22, 0.0  ;;  %2763 = vmatprep.subr.bf16.mxu0 %v3076_v42  ;;  %v742_v56 = vld [vmem:[%s3334_s19] sm:$0xf]  ;;  %v3200_v11 = vmov 0.0|0.0   ;;  %s3201_s4 = smov 96   ;;  %vm3202_vm6 = vmmov 0  }
 0x10c   : > { %752 = vadd.xlane.f32.xlu1 %v751_v25  ;;  %2764 = vmatpush3.bf16.msra.mxu0 %v3076_v42  ;;  %v3416_v54 = vshrl.u32 %v785_v51, 7  ;;  %v2596_v10 = vld [vmem:[%s3758_s24] ss:$0 sm:$0xff]  ;;  %v3203_v20 = vmov 0.0   ;;  %vm892_vm7 = vcmask 64512   ;;  %vm988_vm9 = vcmask 138240  }
 0x10d   : > { %2765 = vmatprep.subr.bf16.mxu0 %v3077_v43  ;;  %2943 = vmatprep.subr.bf16.mxu1 %v3200_v11  ;;  %vm3448_vm8 = vmpackc.low %vm892_vm7, %vm892_vm7  ;;  %vm995_vm10 = vcmask 131072   ;;  %s3204_s21 = smov 64   ;;  %s3205_s3 = smov 88   ;;  %vm1040_vm11 = vcmask 1040384   ;;  %vm1374_vm12 = vcmask 1043456  }
 0x10e   : > { %v739_v21 = vld [vmem:[#allocation2] sm:$0xff]  ;;  %v787_v55 = vsub.s32 0, %v3416_v54  ;;  %v794_v60 = vsub.s32 1, %v3416_v54  ;;  %2777 = vmatprep.mubr.msk.f32.mxu1 %vm3202_vm6, %v3203_v20  ;;  %s3206_s25 = smov 120   ;;  %s3207_s18 = smov 56  }
 0x10f   : > { %v744_v24 = vsel %vm743_vm4, %v739_v21, 0.0  ;;  %s3208_s5 = smov 80   ;;  %s3209_s16 = smov 112  }
 0x110   : > { %v740_v23 = vld [vmem:[#allocation2 + $0x8] sm:$0xff]  ;;  %745 = vadd.xlane.f32.xlu0 %v744_v24  ;;  %2766 = vmatpush3.bf16.msra.mxu0 %v3077_v43  ;;  %v788_v59 = vrot.slane %v742_v56, %v787_v55  ;;  %v795_v2 = vrot.slane %v742_v56, %v794_v60  ;;  %s3210_s6 = smov 72   ;;  %s3211_s30 = smov 104  }
 0x111   : > { %v747_v26 = vsel %vm743_vm4, %v740_v23, 0.0  ;;  %2947 = vmatprep.subr.bf16.mxu0 %v3200_v11  ;;  %s3212_s22 = smov 48   ;;  %s3213_s8 = smov 40  }
 0x114   : > { %748 = vadd.xlane.f32.xlu0 %v747_v26 }
 0x199   : > { %v753_v28 = vpop.xlane.xlu1 %752 }
 0x19a   : > { %v757_v30 = vmul.f32 0.03125, %v753_v28 }
 0x19c   : > { %v760_v32 = vsub.f32 %v741_v22, %v757_v30 }
 0x19d   : > { %v746_v27 = vpop.xlane.xlu0 %745 }
 0x19e   : > { %v755_v29 = vmul.f32 0.03125, %v746_v27  ;;  %v763_v36 = vmul.f32 %v760_v32, %v760_v32 }
 0x1a0   : > { %v758_v31 = vsub.f32 %v739_v21, %v755_v29  ;;  %v770_v39 = vsel %vm750_vm5, %v763_v36, 0.0 }
 0x1a1   : > { %v749_v33 = vpop.xlane.xlu0 %748 }
 0x1a2   : > { %v756_v34 = vmul.f32 0.03125, %v749_v33  ;;  %v761_v35 = vmul.f32 %v758_v31, %v758_v31 }
 0x1a4   : > { %v759_v37 = vsub.f32 %v740_v23, %v756_v34  ;;  %v764_v38 = vsel %vm743_vm4, %v761_v35, 0.0 }
 0x1a5   : > { %765 = vadd.xlane.f32.xlu1 %v764_v38 }
 0x1a6   : > { %v762_v40 = vmul.f32 %v759_v37, %v759_v37 }
 0x1a8   : > { %v767_v41 = vsel %vm743_vm4, %v762_v40, 0.0 }
 0x1a9   : > { %771 = vadd.xlane.f32.xlu1 %v770_v39  ;;  %768 = vadd.xlane.f32.xlu0 %v767_v41 }
 0x232   : > { %v766_v44 = vpop.xlane.xlu1 %765 }
 0x233   : > { %v773_v45 = vmul.f32 0.03125, %v766_v44 }
 0x235   : > { %v776_v46 = vadd.f32 1e-05, %v773_v45 }
 0x236   : > { %v772_v47 = vpop.xlane.xlu1 %771  ;;  %v769_v48 = vpop.xlane.xlu0 %768 }
 0x237   : > { %3088 = vrsqrt.f32 %v776_v46  ;;  %v775_v49 = vmul.f32 0.03125, %v772_v47  ;;  %v774_v50 = vmul.f32 0.03125, %v769_v48 }
 0x239   : > { %v778_v52 = vadd.f32 1e-05, %v775_v49  ;;  %v777_v53 = vadd.f32 1e-05, %v774_v50 }
 0x23b   : > { %3090 = vrsqrt.f32 %v778_v52 }
 0x23c   : > { %3092 = vrsqrt.f32 %v777_v53 }
 0x241   : > { %v3089_v57 = vpop.eup %3088 }
 0x242   : > { %v782_v58 = vmul.f32 %v3089_v57, %v758_v31 }
 0x244   : > { %v789_v1 = vmul.f32 %v788_v59, %v782_v58 }
 0x245   : > { %v3091_v61 = vpop.eup %3090 }
 0x246   : > { %v3093_v62 = vpop.eup %3092  ;;  %v784_v63 = vmul.f32 %v3091_v61, %v760_v32  ;;  %v796_v6 = vadd.f32 %v795_v2, %v789_v1 }
 0x247   : > { %v783_v0 = vmul.f32 %v3093_v62, %v759_v37 }
 0x248   : > { %v791_v3 = vmul.f32 %v788_v59, %v784_v63 }
 0x249   : > { %v790_v4 = vmul.f32 %v788_v59, %v783_v0 }
 0x24a   : > { %v798_v5 = vadd.f32 %v795_v2, %v791_v3 }
 0x24b   : > { %v797_v7 = vadd.f32 %v795_v2, %v790_v4 }
 0x24c   : > { %v804_v8 = vpack.c.bf16 %v798_v5, %v798_v5 }
 0x24d   : > { %v803_v9 = vpack.c.bf16 %v797_v7, %v796_v6 }
 0x24f   : > { %2767 = vmatprep.mubr.msk.bf16.mxu0 %vm743_vm4, %v803_v9 }
 0x250   : > { %2768 = vmatmul.mubr.msk.bf16.vlgmr.msra.gmra.mrb[0].mxu0 %vm743_vm4, %v804_v8 }
 0x251   : > { %2792 = vmatprep.mubr.msk.f32.mxu0 %vm3202_vm6, %v3203_v20 }
 0x323   : > { %v2769_v12 = vpop.f32.mrb[0].mxu0 }
 0x324   : > { %v3430_v13 = vadd.f32 %v2769_v12, %v2596_v10  ;;  %v864_v14 = vpop.f32.mrb[1].mxu0 }
 0x325   : > { %v2770_v15 = vpop.f32.mrb[2].mxu0  ;;  %v3433_v17 = vadd.f32 %v2596_v10, %v864_v14 }
 0x326   : > { %890 = vrot.lane.b32.xlu1 %v3430_v13, %s3201_s4  ;;  %v867_v16 = vpop.f32.mrb[3].mxu0 }
 0x327   : > { %v3435_v18 = vadd.f32 %v2596_v10, %v867_v16 }
 0x329   : > { %v3439_v19 = vpack.i.bf16 %v3435_v18, %v3433_v17 }
 0x32b   : > { %3037 = vrot.lane.b32.xlu0 %v3439_v19, %s3201_s4 }
 0x398   : > { %v891_v26 = vpop.permute.xlu1 %890 }
 0x39d   : > { %v3038_v21 = vpop.permute.xlu0 %3037 }
 0x39e   : > { %v3040_v22 = vunpack.i.h.bf16 %v3038_v21  ;;  %v3039_v23 = vunpack.i.l.bf16 %v3038_v21 }
 0x3a0   : > { %v2944_v25 = vpack.c.bf16 %v3040_v22, %v3039_v23 }
 0x3a2   : > { %2946 = vmatpush3.bf16.xpose.msk.msra.mxu1 %vm3448_vm8, %v2944_v25 }
 0x3a3   : > { %2775 = vmatprep.subr.mxu1 %v3203_v20 }
 0x3aa   : > { %2776 = vmatpush3.xpose.msk.msra.mxu1 %vm892_vm7, %v891_v26 }
 0x3ad   : > { %2778 = vmatmul.mubr.msk.f32.vlgmr.msra.gmra.mrb[0].mxu1 %vm892_vm7, %v3433_v17 }
 0x3ae   : > { %2780 = vmatprep.mubr.msk.f32.mxu1 %vm3202_vm6, %v3203_v20 }
 0x3b1   : > { %2781 = vmatmul.mubr.msk.f32.gmra.mrb[2].mxu1 %vm892_vm7, %v3435_v18 }
 0x3b2   : > { %2783 = vmatprep.mubr.msk.f32.mxu1 %vm3202_vm6, %v3203_v20 }
 0x3b5   : > { %2784 = vmatmul.mubr.msk.f32.gmra.mrb[4].mxu1 %vm892_vm7, %v3430_v13 }
 0x480   : > { %v971_v27 = vpop.f32.mrb[0].mxu1 }
 0x481   : > { %v985_v28 = vmul.f32 0.35355338, %v971_v27  ;;  %v2779_v29 = vpop.f32.mrb[1].mxu1 }
 0x483   : > { %v989_v30 = vsel %vm988_vm9, %v985_v28, -inf }
 0x484   : > { %990 = vmax.xlane.f32.xlu1 %v989_v30  ;;  %v976_v31 = vpop.f32.mrb[2].mxu1 }
 0x485   : > { %v986_v32 = vmul.f32 0.35355338, %v976_v31  ;;  %v2782_v33 = vpop.f32.mrb[3].mxu1 }
 0x487   : > { %v992_v34 = vsel %vm988_vm9, %v986_v32, -inf }
 0x488   : > { %993 = vmax.xlane.f32.xlu0 %v992_v34  ;;  %v981_v35 = vpop.f32.mrb[4].mxu1 }
 0x489   : > { %v987_v36 = vmul.f32 0.35355338, %v981_v35  ;;  %v2785_v37 = vpop.f32.mrb[5].mxu1 }
 0x48b   : > { %v996_v38 = vsel %vm995_vm10, %v987_v36, -inf }
 0x48c   : > { %997 = vmax.xlane.f32.xlu0 %v996_v38 }
 0x511   : > { %v991_v39 = vpop.xlane.xlu1 %990 }
 0x512   : > { %v999_v40 = vsub.f32 %v985_v28, %v991_v39 }
 0x514   : > { %v1002_v41 = vmul.f32 1.442695, %v999_v40 }
 0x515   : > { %v994_v42 = vpop.xlane.xlu0 %993 }
 0x516   : > { %3094 = vpow2.f32 %v1002_v41  ;;  %v1000_v43 = vsub.f32 %v986_v32, %v994_v42 }
 0x518   : > { %v1004_v44 = vmul.f32 1.442695, %v1000_v43 }
 0x519   : > { %v998_v49 = vpop.xlane.xlu0 %997 }
 0x51a   : > { %3096 = vpow2.f32 %v1004_v44  ;;  %v1001_v50 = vsub.f32 %v987_v36, %v998_v49 }
 0x51c   : > { %v1006_v51 = vmul.f32 1.442695, %v1001_v50 }
 0x51e   : > { %3098 = vpow2.f32 %v1006_v51 }
 0x520   : > { %v3095_v45 = vpop.eup %3094 }
 0x521   : > { %v1008_v46 = vsel %vm988_vm9, %v3095_v45, 0.0 }
 0x522   : > { %1009 = vadd.xlane.f32.xlu1 %v1008_v46 }
 0x524   : > { %v3097_v47 = vpop.eup %3096 }
 0x525   : > { %v1011_v48 = vsel %vm988_vm9, %v3097_v47, 0.0 }
 0x526   : > { %1012 = vadd.xlane.f32.xlu0 %v1011_v48 }
 0x528   : > { %v3099_v52 = vpop.eup %3098 }
 0x529   : > { %v1014_v53 = vsel %vm995_vm10, %v3099_v52, 0.0 }
 0x533   : > { %1027 = vrot.lane.b32.xlu1 %v3430_v13, %s3204_s21 }
 0x537   : > { %3047 = vrot.lane.b32.xlu1 %v3439_v19, %s3205_s3 }
 0x53b   : > { %1136 = vrot.lane.b32.xlu1 %v3430_v13, %s3205_s3 }
 0x53c   : > { %3042 = vrot.lane.b32.xlu0 %v3439_v19, %s3204_s21 }
 0x540   : > { %1126 = vrot.lane.b32.xlu0 %v3433_v17, %s3206_s25 }
 0x544   : > { %1130 = vrot.lane.b32.xlu0 %v3430_v13, %s3206_s25 }
 0x55f   : > { %1015 = vadd.xlane.f32.xlu1 %v1014_v53 }
 0x570   : > { %1128 = vrot.lane.b32.xlu1 %v3435_v18, %s3206_s25 }
 0x5af   : > { %v1010_v55 = vpop.xlane.xlu1 %1009 }
 0x5b0   : > { %3100 = vrcp.f32 %v1010_v55 }
 0x5b3   : > { %v1013_v56 = vpop.xlane.xlu0 %1012  ;;  %v1028_v58 = vpop.permute.xlu1 %1027 }
 0x5b4   : > { %3102 = vrcp.f32 %v1013_v56 }
 0x5b7   : > { %v3043_v57 = vpop.permute.xlu0 %3042  ;;  %v3048_v63 = vpop.permute.xlu1 %3047 }
 0x5b8   : > { %v3045_v59 = vunpack.i.h.bf16 %v3043_v57  ;;  %v3044_v60 = vunpack.i.l.bf16 %v3043_v57  ;;  %v3050_v2 = vunpack.i.h.bf16 %v3048_v63  ;;  %v3049_v3 = vunpack.i.l.bf16 %v3048_v63 }
 0x5ba   : > { %v2948_v61 = vpack.c.bf16 %v3045_v59, %v3044_v60  ;;  %v3101_v62 = vpop.eup %3100  ;;  %v2951_v5 = vpack.c.bf16 %v3050_v2, %v3049_v3 }
 0x5bb   : > { %v1018_v0 = vmul.f32 %v3101_v62, %v3095_v45  ;;  %v1137_v6 = vpop.permute.xlu1 %1136  ;;  %v1127_v10 = vpop.permute.xlu0 %1126 }
 0x5bc   : > { %2949 = vmatpush3.bf16.msra.mxu0 %v2948_v61  ;;  %v878_v61 = vld [vmem:[%s3354_s26] sm:$0xff] }
 0x5bd   : > { %2790 = vmatprep.subr.mxu0 %v3203_v20  ;;  %v1125_v63 = vpack.c.bf16 %v878_v61, %v878_v61 }
 0x5be   : > { %v3103_v1 = vpop.eup %3102 }
 0x5bf   : > { %v1020_v4 = vmul.f32 %v3103_v1, %v3097_v47  ;;  %v1131_v14 = vpop.permute.xlu0 %1130  ;;  %v1433_v1 = vsel %vm1374_vm12, %v1125_v63, 0 }
 0x5c0   : > { %2791 = vmatpush3.msk.msra.mxu0 %vm1040_vm11, %v1028_v58 }
 0x5c1   : > { %2793 = vmatmul.mubr.msk.f32.vlgmr.msra.gmra.mrb[4].mxu0 %vm988_vm9, %v1018_v0  ;;  %2950 = vmatprep.subr.bf16.mxu0 %v3200_v11 }
 0x5c2   : > { %2795 = vmatprep.mubr.msk.f32.mxu0 %vm3202_vm6, %v3203_v20 }
 0x5c5   : > { %2796 = vmatmul.mubr.msk.f32.gmra.mrb[6].mxu0 %vm988_vm9, %v1020_v4 }
 0x5c6   : > { %2798 = vmatprep.mubr.msk.f32.mxu0 %vm3202_vm6, %v3203_v20 }
 0x5c7   : > { %2953 = vmatpush3.bf16.xpose.msk.msra.mxu0 %vm3448_vm8, %v2951_v5 }
 0x5c8   : > { %2805 = vmatprep.subr.mxu0 %v3203_v20 }
 0x5cf   : > { %2806 = vmatpush3.xpose.msk.msra.mxu0 %vm892_vm7, %v1137_v6 }
 0x5d0   : > { %2954 = vmatprep.subr.bf16.mxu0 %v3200_v11 }
 0x5ec   : > { %v1016_v7 = vpop.xlane.xlu1 %1015 }
 0x5ed   : > { %3104 = vrcp.f32 %v1016_v7  ;;  %v879_v7 = vld [vmem:[%s3354_s26 + $0x8] sm:$0xff] }
 0x5f0   : > { %v1129_v12 = vpop.permute.xlu1 %1128 }
 0x5f7   : > { %v3105_v8 = vpop.eup %3104 }
 0x5f8   : > { %v1022_v9 = vmul.f32 %v3105_v8, %v3099_v52  ;;  %v1367_v8 = vpack.c.bf16 %v879_v7, %v879_v7 }
 0x5fa   : > { %2799 = vmatmul.mubr.msk.f32.gmra.mrb[8].mxu0 %vm988_vm9, %v1022_v9  ;;  %2971 = vmatprep.subr.msk.bf16.mxu1 %vm1374_vm12, %v1367_v8  ;;  %v1376_v9 = vsel %vm1374_vm12, %v1367_v8, 0 }
 0x5fb   : > { %2807 = vmatprep.mubr.msk.f32.mxu0 %vm3202_vm6, %v3203_v20  ;;  %2832 = vmatpush3.bf16.msra.mxu1 %v1376_v9 }
 0x5fc   : > { %2957 = vmatprep.subr.bf16.mxu1 %v3200_v11 }
 0x5fe   : > { %2808 = vmatmul.mubr.msk.f32.vlgmr.msra.gmra.mrb[10].mxu0 %vm892_vm7, %v1127_v10 }
 0x5ff   : > { %2810 = vmatprep.mubr.msk.f32.mxu0 %vm3202_vm6, %v3203_v20 }
 0x602   : > { %2811 = vmatmul.mubr.msk.f32.gmra.mrb[12].mxu0 %vm892_vm7, %v1129_v12 }
 0x603   : > { %2813 = vmatprep.mubr.msk.f32.mxu0 %vm3202_vm6, %v3203_v20 }
 0x606   : > { %2814 = vmatmul.mubr.msk.f32.gmra.mrb[14].mxu0 %vm892_vm7, %v1131_v14 }
 0x607   : > { %2822 = vmatprep.mubr.msk.f32.mxu0 %vm3202_vm6, %v3203_v20 }
 0x694   : > { %v3505_v15 = vpop.f32.mrb[4].mxu0 }
 0x695   : > { %v2794_v16 = vpop.f32.mrb[5].mxu0 }
 0x698   : > { %v3507_v21 = vpop.f32.mrb[6].mxu0 }
 0x699   : > { %v1123_v22 = vpack.c.bf16 %v3507_v21, %v3505_v15  ;;  %v2797_v23 = vpop.f32.mrb[7].mxu0 }
 0x6cd   : > { %v3511_v25 = vpop.f32.mrb[8].mxu0 }
 0x6ce   : > { %v2800_v26 = vpop.f32.mrb[9].mxu0  ;;  %v1124_v6 = vpack.c.bf16 %v3511_v25, %v3511_v25 }
 0x6d1   : > { %v1216_v27 = vpop.f32.mrb[10].mxu0 }
 0x6d2   : > { %v1230_v28 = vmul.f32 0.35355338, %v1216_v27  ;;  %v2809_v29 = vpop.f32.mrb[11].mxu0 }
 0x6d4   : > { %v1233_v30 = vsel %vm988_vm9, %v1230_v28, -inf }
 0x6d5   : > { %1234 = vmax.xlane.f32.xlu1 %v1233_v30  ;;  %v1221_v31 = vpop.f32.mrb[12].mxu0 }
 0x6d6   : > { %v1231_v32 = vmul.f32 0.35355338, %v1221_v31  ;;  %v2812_v33 = vpop.f32.mrb[13].mxu0 }
 0x6d8   : > { %v1236_v34 = vsel %vm988_vm9, %v1231_v32, -inf }
 0x6d9   : > { %1237 = vmax.xlane.f32.xlu0 %v1236_v34  ;;  %v1226_v35 = vpop.f32.mrb[14].mxu0 }
 0x6da   : > { %v1232_v36 = vmul.f32 0.35355338, %v1226_v35  ;;  %v2815_v37 = vpop.f32.mrb[15].mxu0 }
 0x6dc   : > { %v1239_v38 = vsel %vm995_vm10, %v1232_v36, -inf }
 0x6dd   : > { %1240 = vmax.xlane.f32.xlu0 %v1239_v38 }
 0x762   : > { %v1235_v39 = vpop.xlane.xlu1 %1234 }
 0x763   : > { %v1242_v40 = vsub.f32 %v1230_v28, %v1235_v39 }
 0x765   : > { %v1245_v41 = vmul.f32 1.442695, %v1242_v40 }
 0x766   : > { %v1238_v42 = vpop.xlane.xlu0 %1237 }
 0x767   : > { %3106 = vpow2.f32 %v1245_v41  ;;  %v1243_v43 = vsub.f32 %v1231_v32, %v1238_v42 }
 0x769   : > { %v1247_v44 = vmul.f32 1.442695, %v1243_v43 }
 0x76a   : > { %v1241_v45 = vpop.xlane.xlu0 %1240 }
 0x76b   : > { %3108 = vpow2.f32 %v1247_v44  ;;  %v1244_v46 = vsub.f32 %v1232_v36, %v1241_v45 }
 0x76d   : > { %v1249_v47 = vmul.f32 1.442695, %v1244_v46 }
 0x76f   : > { %3110 = vpow2.f32 %v1249_v47 }
 0x771   : > { %v3107_v48 = vpop.eup %3106 }
 0x772   : > { %v1251_v49 = vsel %vm988_vm9, %v3107_v48, 0.0 }
 0x773   : > { %1252 = vadd.xlane.f32.xlu0 %v1251_v49 }
 0x775   : > { %v3109_v50 = vpop.eup %3108 }
 0x776   : > { %v1254_v51 = vsel %vm988_vm9, %v3109_v50, 0.0 }
 0x777   : > { %1255 = vadd.xlane.f32.xlu1 %v1254_v51 }
 0x779   : > { %v3111_v52 = vpop.eup %3110 }
 0x77a   : > { %v1257_v53 = vsel %vm995_vm10, %v3111_v52, 0.0 }
 0x77b   : > { %1258 = vadd.xlane.f32.xlu0 %v1257_v53 }
 0x788   : > { %3052 = vrot.lane.b32.xlu1 %v3439_v19, %s3207_s18 }
 0x78c   : > { %3057 = vrot.lane.b32.xlu1 %v3439_v19, %s3208_s5 }
 0x790   : > { %1493 = vrot.lane.b32.xlu1 %v3430_v13, %s3208_s5 }
 0x791   : > { %1270 = vrot.lane.b32.xlu0 %v3430_v13, %s3207_s18 }
 0x794   : > { %1483 = vrot.lane.b32.xlu1 %v3433_v17, %s3209_s16 }
 0x795   : > { %1485 = vrot.lane.b32.xlu0 %v3435_v18, %s3209_s16 }
 0x798   : > { %1487 = vrot.lane.b32.xlu1 %v3430_v13, %s3209_s16 }
 0x799   : > { %3062 = vrot.lane.b32.xlu0 %v3439_v19, %s3210_s6 }
 0x79c   : > { %1795 = vrot.lane.b32.xlu1 %v3430_v13, %s3210_s6 }
 0x79d   : > { %1785 = vrot.lane.b32.xlu0 %v3433_v17, %s3211_s30 }
 0x7a0   : > { %1787 = vrot.lane.b32.xlu1 %v3435_v18, %s3211_s30 }
 0x7a1   : > { %1789 = vrot.lane.b32.xlu0 %v3430_v13, %s3211_s30 }
 0x800   : > { %v1253_v55 = vpop.xlane.xlu0 %1252 }
 0x801   : > { %3112 = vrcp.f32 %v1253_v55 }
 0x804   : > { %v1256_v56 = vpop.xlane.xlu1 %1255 }
 0x805   : > { %3114 = vrcp.f32 %v1256_v56 }
 0x808   : > { %v3053_v57 = vpop.permute.xlu1 %3052  ;;  %v1259_v58 = vpop.xlane.xlu0 %1258 }
 0x809   : > { %v3055_v59 = vunpack.i.h.bf16 %v3053_v57  ;;  %v3054_v60 = vunpack.i.l.bf16 %v3053_v57  ;;  %3116 = vrcp.f32 %v1259_v58 }
 0x80b   : > { %v2955_v62 = vpack.c.bf16 %v3055_v59, %v3054_v60  ;;  %v3113_v0 = vpop.eup %3112 }
 0x80c   : > { %v1261_v17 = vmul.f32 %v3113_v0, %v3107_v48  ;;  %v1271_v18 = vpop.permute.xlu0 %1270  ;;  %v3058_v14 = vpop.permute.xlu1 %3057 }
 0x80d   : > { %2956 = vmatpush3.bf16.msra.mxu0 %v2955_v62  ;;  %v3059_v23 = vunpack.i.l.bf16 %v3058_v14 }
 0x80e   : > { %2820 = vmatprep.subr.mxu0 %v3203_v20 }
 0x80f   : > { %v3115_v2 = vpop.eup %3114 }
 0x810   : > { %v1263_v3 = vmul.f32 %v3115_v2, %v3109_v50  ;;  %v1486_v26 = vpop.permute.xlu0 %1485  ;;  %v1494_v31 = vpop.permute.xlu1 %1493 }
 0x811   : > { %2821 = vmatpush3.msk.msra.mxu0 %vm1040_vm11, %v1271_v18 }
 0x812   : > { %2823 = vmatmul.mubr.msk.f32.vlgmr.msra.gmra.mrb[16].mxu0 %vm988_vm9, %v1261_v17  ;;  %2972 = vmatprep.subr.msk.bf16.mxu0 %vm1374_vm12, %v1125_v63 }
 0x813   : > { %2825 = vmatprep.mubr.msk.f32.mxu0 %vm3202_vm6, %v3203_v20  ;;  %2838 = vmatpush3.bf16.msra.mxu0 %v1433_v1  ;;  %v3117_v4 = vpop.eup %3116 }
 0x814   : > { %2961 = vmatprep.subr.bf16.mxu0 %v3200_v11  ;;  %v1265_v5 = vmul.f32 %v3117_v4, %v3111_v52  ;;  %v3063_v34 = vpop.permute.xlu0 %3062  ;;  %v1484_v38 = vpop.permute.xlu1 %1483 }
 0x815   : > { %v3065_v36 = vunpack.i.h.bf16 %v3063_v34  ;;  %v3064_v37 = vunpack.i.l.bf16 %v3063_v34 }
 0x816   : > { %2826 = vmatmul.mubr.msk.f32.gmra.mrb[18].mxu0 %vm988_vm9, %v1263_v3 }
 0x817   : > { %2828 = vmatprep.mubr.msk.f32.mxu0 %vm3202_vm6, %v3203_v20  ;;  %v2965_v39 = vpack.c.bf16 %v3065_v36, %v3064_v37 }
 0x818   : > { %v1488_v40 = vpop.permute.xlu1 %1487  ;;  %v1786_v24 = vpop.permute.xlu0 %1785 }
 0x81a   : > { %2829 = vmatmul.mubr.msk.f32.gmra.mrb[20].mxu0 %vm988_vm9, %v1265_v5 }
 0x81b   : > { %2839 = vmatprep.mubr.msk.bf16.mxu0 %vm892_vm7, %v1123_v22  ;;  %v3060_v22 = vunpack.i.h.bf16 %v3058_v14 }
 0x81c   : > { %v1796_v41 = vpop.permute.xlu1 %1795  ;;  %v1790_v43 = vpop.permute.xlu0 %1789 }
 0x81d   : > { %v2958_v29 = vpack.c.bf16 %v3060_v22, %v3059_v23 }
 0x81e   : > { %2840 = vmatmul.mubr.msk.bf16.vlgmr.msra.gmra.mrb[24].mxu0 %vm892_vm7, %v1124_v6 }
 0x81f   : > { %2864 = vmatprep.mubr.msk.f32.mxu0 %vm3202_vm6, %v3203_v20 }
 0x820   : > { %v1788_v42 = vpop.permute.xlu1 %1787 }
 0x8e5   : > { %v1351_v10 = vpop.f32.mrb[16].mxu0 }
 0x8e6   : > { %v2824_v12 = vpop.f32.mrb[17].mxu0 }
 0x8e9   : > { %v1356_v15 = vpop.f32.mrb[18].mxu0 }
 0x8ea   : > { %v1365_v16 = vpack.c.bf16 %v1356_v15, %v1351_v10  ;;  %v2827_v21 = vpop.f32.mrb[19].mxu0 }
 0x8ec   : > { %2833 = vmatprep.mubr.msk.bf16.mxu1 %vm892_vm7, %v1365_v16 }
 0x8ed   : > { %v1361_v25 = vpop.f32.mrb[20].mxu0 }
 0x8ee   : > { %v1366_v27 = vpack.c.bf16 %v1361_v25, %v1361_v25  ;;  %v2830_v28 = vpop.f32.mrb[21].mxu0 }
 0x8f0   : > { %2834 = vmatmul.mubr.msk.bf16.vlgmr.msra.gmra.mrb[8].mxu1 %vm892_vm7, %v1366_v27 }
 0x8f1   : > { %2960 = vmatpush3.bf16.xpose.msk.msra.mxu1 %vm3448_vm8, %v2958_v29  ;;  %v2841_v30 = vpop.f32.mrb[24].mxu0  ;;  %2849 = vmatprep.mubr.msk.f32.mxu1 %vm3202_vm6, %v3203_v20 }
 0x8f2   : > { %v1469_v32 = vpop.f32.mrb[25].mxu0  ;;  %2847 = vmatprep.subr.mxu1 %v3203_v20 }
 0x8f3   : > { %v2842_v33 = vpop.f32.mrb[26].mxu0 }
 0x8f4   : > { %v1472_v35 = vpop.f32.mrb[27].mxu0 }
 0x8f9   : > { %2848 = vmatpush3.xpose.msk.msra.mxu1 %vm892_vm7, %v1494_v31 }
 0x8fa   : > { %2964 = vmatprep.subr.bf16.mxu1 %v3200_v11 }
 0x8fc   : > { %2850 = vmatmul.mubr.msk.f32.vlgmr.msra.gmra.mrb[6].mxu1 %vm892_vm7, %v1484_v38 }
 0x8fd   : > { %2967 = vmatpush3.bf16.xpose.msk.msra.mxu1 %vm3448_vm8, %v2965_v39  ;;  %2852 = vmatprep.mubr.msk.f32.mxu1 %vm3202_vm6, %v3203_v20 }
 0x8fe   : > { %2883 = vmatprep.subr.mxu1 %v3203_v20 }
 0x900   : > { %2853 = vmatmul.mubr.msk.f32.gmra.mrb[12].mxu1 %vm892_vm7, %v1486_v26 }
 0x901   : > { %2855 = vmatprep.mubr.msk.f32.mxu1 %vm3202_vm6, %v3203_v20 }
 0x904   : > { %2856 = vmatmul.mubr.msk.f32.gmra.mrb[14].mxu1 %vm892_vm7, %v1488_v40 }
 0x905   : > { %2884 = vmatpush3.xpose.msk.msra.mxu1 %vm892_vm7, %v1796_v41  ;;  %2885 = vmatprep.mubr.msk.f32.mxu1 %vm3202_vm6, %v3203_v20 }
 0x908   : > { %2886 = vmatmul.mubr.msk.f32.vlgmr.msra.gmra.mrb[16].mxu1 %vm892_vm7, %v1786_v24 }
 0x909   : > { %2888 = vmatprep.mubr.msk.f32.mxu1 %vm3202_vm6, %v3203_v20 }
 0x90c   : > { %2889 = vmatmul.mubr.msk.f32.gmra.mrb[18].mxu1 %vm892_vm7, %v1788_v42 }
 0x90d   : > { %2891 = vmatprep.mubr.msk.f32.mxu1 %vm3202_vm6, %v3203_v20 }
 0x910   : > { %2892 = vmatmul.mubr.msk.f32.gmra.mrb[20].mxu1 %vm892_vm7, %v1790_v43 }
 0x9c3   : > { %v2835_v44 = vpop.f32.mrb[8].mxu1 }
 0x9c4   : > { %v3586_v45 = vadd.f32 %v2841_v30, %v2835_v44  ;;  %v1412_v46 = vpop.f32.mrb[9].mxu1 }
 0x9c5   : > { %v3588_v47 = vadd.f32 %v1469_v32, %v1412_v46  ;;  %v2836_v48 = vpop.f32.mrb[10].mxu1 }
 0x9c6   : > { %v1415_v49 = vpop.f32.mrb[11].mxu1 }
 0x9c7   : > { %v3590_v50 = vadd.f32 %v1472_v35, %v1415_v49 }
 0x9cf   : > { %v1573_v51 = vpop.f32.mrb[6].mxu1 }
 0x9d0   : > { %v1587_v52 = vmul.f32 0.35355338, %v1573_v51  ;;  %v2851_v53 = vpop.f32.mrb[7].mxu1 }
 0x9d2   : > { %v1590_v55 = vsel %vm988_vm9, %v1587_v52, -inf }
 0x9d3   : > { %1591 = vmax.xlane.f32.xlu1 %v1590_v55  ;;  %v1578_v56 = vpop.f32.mrb[12].mxu1 }
 0x9d4   : > { %v1588_v57 = vmul.f32 0.35355338, %v1578_v56  ;;  %v2854_v58 = vpop.f32.mrb[13].mxu1 }
 0x9d6   : > { %v1593_v59 = vsel %vm988_vm9, %v1588_v57, -inf }
 0x9d7   : > { %1594 = vmax.xlane.f32.xlu0 %v1593_v59  ;;  %v1583_v60 = vpop.f32.mrb[14].mxu1 }
 0x9d8   : > { %v1589_v61 = vmul.f32 0.35355338, %v1583_v60  ;;  %v2857_v62 = vpop.f32.mrb[15].mxu1 }
 0x9da   : > { %v1596_v63 = vsel %vm995_vm10, %v1589_v61, -inf }
 0x9db   : > { %1597 = vmax.xlane.f32.xlu0 %v1596_v63  ;;  %v1875_v0 = vpop.f32.mrb[16].mxu1 }
 0x9dc   : > { %v2887_v17 = vpop.f32.mrb[17].mxu1  ;;  %v1889_v26 = vmul.f32 0.35355338, %v1875_v0  ;;  %v880_v0 = vld [vmem:[%s3354_s26 + $0x10] sm:$0xff] }
 0x9dd   : > { %v1724_v17 = vpack.c.bf16 %v880_v0, %v880_v0 }
 0x9de   : > { %v1892_v29 = vsel %vm988_vm9, %v1889_v26, -inf }
 0x9df   : > { %v1880_v18 = vpop.f32.mrb[18].mxu1 }
 0x9e0   : > { %v2890_v1 = vpop.f32.mrb[19].mxu1  ;;  %v1890_v27 = vmul.f32 0.35355338, %v1880_v18  ;;  %v1732_v18 = vsel %vm1374_vm12, %v1724_v17, 0 }
 0x9e2   : > { %v1895_v30 = vsel %vm988_vm9, %v1890_v27, -inf }
 0x9e3   : > { %v1885_v2 = vpop.f32.mrb[20].mxu1 }
 0x9e4   : > { %v2893_v3 = vpop.f32.mrb[21].mxu1  ;;  %v1891_v28 = vmul.f32 0.35355338, %v1885_v2 }
 0x9e6   : > { %v1898_v31 = vsel %vm995_vm10, %v1891_v28, -inf }
 0xa60   : > { %v1592_v4 = vpop.xlane.xlu1 %1591 }
 0xa61   : > { %v1599_v5 = vsub.f32 %v1587_v52, %v1592_v4 }
 0xa63   : > { %v1602_v6 = vmul.f32 1.442695, %v1599_v5 }
 0xa64   : > { %v1595_v7 = vpop.xlane.xlu0 %1594 }
 0xa65   : > { %3118 = vpow2.f32 %v1602_v6  ;;  %v1600_v8 = vsub.f32 %v1588_v57, %v1595_v7 }
 0xa67   : > { %v1604_v9 = vmul.f32 1.442695, %v1600_v8 }
 0xa68   : > { %v1598_v10 = vpop.xlane.xlu0 %1597 }
 0xa69   : > { %3120 = vpow2.f32 %v1604_v9  ;;  %v1601_v12 = vsub.f32 %v1589_v61, %v1598_v10 }
 0xa6b   : > { %v1606_v14 = vmul.f32 1.442695, %v1601_v12 }
 0xa6d   : > { %3122 = vpow2.f32 %v1606_v14 }
 0xa6f   : > { %v3119_v15 = vpop.eup %3118 }
 0xa70   : > { %v1608_v16 = vsel %vm988_vm9, %v3119_v15, 0.0 }
 0xa71   : > { %1609 = vadd.xlane.f32.xlu0 %v1608_v16 }
 0xa73   : > { %v3121_v21 = vpop.eup %3120 }
 0xa74   : > { %v1611_v22 = vsel %vm988_vm9, %v3121_v21, 0.0 }
 0xa75   : > { %1612 = vadd.xlane.f32.xlu1 %v1611_v22 }
 0xa77   : > { %v3123_v23 = vpop.eup %3122 }
 0xa78   : > { %v1614_v25 = vsel %vm995_vm10, %v3123_v23, 0.0 }
 0xa79   : > { %1615 = vadd.xlane.f32.xlu0 %v1614_v25 }
 0xa86   : > { %3067 = vrot.lane.b32.xlu1 %v3439_v19, %s3212_s22 }
 0xa8f   : > { %1627 = vrot.lane.b32.xlu0 %v3430_v13, %s3212_s22 }
 0xaaa   : > { %1893 = vmax.xlane.f32.xlu1 %v1892_v29 }
 0xaae   : > { %1896 = vmax.xlane.f32.xlu0 %v1895_v30  ;;  %1899 = vmax.xlane.f32.xlu1 %v1898_v31 }
 0xafe   : > { %v1610_v32 = vpop.xlane.xlu0 %1609 }
 0xaff   : > { %3124 = vrcp.f32 %v1610_v32 }
 0xb02   : > { %v1613_v33 = vpop.xlane.xlu1 %1612 }
 0xb03   : > { %3126 = vrcp.f32 %v1613_v33 }
 0xb06   : > { %v3068_v34 = vpop.permute.xlu1 %3067  ;;  %v1616_v35 = vpop.xlane.xlu0 %1615 }
 0xb07   : > { %v3070_v36 = vunpack.i.h.bf16 %v3068_v34  ;;  %v3069_v37 = vunpack.i.l.bf16 %v3068_v34  ;;  %3128 = vrcp.f32 %v1616_v35 }
 0xb09   : > { %v2962_v38 = vpack.c.bf16 %v3070_v36, %v3069_v37  ;;  %v3125_v39 = vpop.eup %3124 }
 0xb0a   : > { %v1618_v40 = vmul.f32 %v3125_v39, %v3119_v15  ;;  %v1628_v41 = vpop.permute.xlu0 %1627 }
 0xb0b   : > { %2963 = vmatpush3.bf16.msra.mxu0 %v2962_v38 }
 0xb0c   : > { %2862 = vmatprep.subr.mxu0 %v3203_v20 }
 0xb0d   : > { %v3127_v24 = vpop.eup %3126 }
 0xb0e   : > { %v1620_v42 = vmul.f32 %v3127_v24, %v3121_v21 }
 0xb0f   : > { %2863 = vmatpush3.msk.msra.mxu0 %vm1040_vm11, %v1628_v41 }
 0xb10   : > { %2865 = vmatmul.mubr.msk.f32.vlgmr.msra.gmra.mrb[22].mxu0 %vm988_vm9, %v1618_v40  ;;  %2973 = vmatprep.subr.msk.bf16.mxu0 %vm1374_vm12, %v1724_v17 }
 0xb11   : > { %2867 = vmatprep.mubr.msk.f32.mxu0 %vm3202_vm6, %v3203_v20  ;;  %v3129_v43 = vpop.eup %3128  ;;  %2874 = vmatpush3.bf16.msra.mxu0 %v1732_v18 }
 0xb12   : > { %v1622_v44 = vmul.f32 %v3129_v43, %v3123_v23  ;;  %2968 = vmatprep.subr.bf16.mxu0 %v3200_v11 }
 0xb14   : > { %2868 = vmatmul.mubr.msk.f32.gmra.mrb[28].mxu0 %vm988_vm9, %v1620_v42 }
 0xb15   : > { %2870 = vmatprep.mubr.msk.f32.mxu0 %vm3202_vm6, %v3203_v20 }
 0xb18   : > { %2871 = vmatmul.mubr.msk.f32.gmra.mrb[30].mxu0 %vm988_vm9, %v1622_v44 }
 0xb37   : > { %v1894_v46 = vpop.xlane.xlu1 %1893 }
 0xb38   : > { %v1901_v48 = vsub.f32 %v1889_v26, %v1894_v46 }
 0xb3a   : > { %v1904_v49 = vmul.f32 1.442695, %v1901_v48 }
 0xb3b   : > { %v1897_v51 = vpop.xlane.xlu0 %1896  ;;  %v1900_v52 = vpop.xlane.xlu1 %1899 }
 0xb3c   : > { %3130 = vpow2.f32 %v1904_v49  ;;  %v1902_v53 = vsub.f32 %v1890_v27, %v1897_v51  ;;  %v1903_v55 = vsub.f32 %v1891_v28, %v1900_v52  ;;  %v881_v27 = vld [vmem:[%s3354_s26 + $0x18] sm:$0xff] }
 0xb3d   : > { %v2026_v28 = vpack.c.bf16 %v881_v27, %v881_v27 }
 0xb3e   : > { %v1906_v56 = vmul.f32 1.442695, %v1902_v53  ;;  %v1908_v57 = vmul.f32 1.442695, %v1903_v55  ;;  %v3154_v53 = vld [vmem:[#allocation2] sm:$0xff] }
 0xb3f   : > { %2974 = vmatprep.subr.msk.bf16.mxu1 %vm1374_vm12, %v2026_v28  ;;  %v2034_v29 = vsel %vm1374_vm12, %v2026_v28, 0  ;;  %v2140_v28 = vsub.s32 2, %v3416_v54 }
 0xb40   : > { %3132 = vpow2.f32 %v1906_v56  ;;  %2910 = vmatpush3.bf16.msra.mxu1 %v2034_v29  ;;  %v3157_v29 = vld [vmem:[%s3334_s19] sm:$0xf] }
 0xb41   : > { %3134 = vpow2.f32 %v1908_v57  ;;  %v3155_v57 = vld [vmem:[#allocation2 + $0x10] sm:$0x1] }
 0xb46   : > { %v3131_v58 = vpop.eup %3130 }
 0xb47   : > { %v1910_v59 = vsel %vm988_vm9, %v3131_v58, 0.0 }
 0xb48   : > { %1911 = vadd.xlane.f32.xlu0 %v1910_v59  ;;  %v3156_v59 = vld [vmem:[#allocation2 + $0x8] sm:$0xff] }
 0xb4a   : > { %v3133_v60 = vpop.eup %3132 }
 0xb4b   : > { %v3135_v61 = vpop.eup %3134  ;;  %v1913_v62 = vsel %vm988_vm9, %v3133_v60, 0.0 }
 0xb4c   : > { %1914 = vadd.xlane.f32.xlu1 %v1913_v62  ;;  %v1916_v63 = vsel %vm995_vm10, %v3135_v61, 0.0 }
 0xb4d   : > { %1917 = vadd.xlane.f32.xlu0 %v1916_v63 }
 0xb5d   : > { %3072 = vrot.lane.b32.xlu1 %v3439_v19, %s3213_s8 }
 0xb63   : > { %1929 = vrot.lane.b32.xlu0 %v3430_v13, %s3213_s8 }
 0xbd5   : > { %v1912_v3 = vpop.xlane.xlu0 %1911 }
 0xbd6   : > { %3136 = vrcp.f32 %v1912_v3 }
 0xbd9   : > { %v1915_v1 = vpop.xlane.xlu1 %1914 }
 0xbda   : > { %3138 = vrcp.f32 %v1915_v1  ;;  %v1918_v10 = vpop.xlane.xlu0 %1917 }
 0xbdb   : > { %3140 = vrcp.f32 %v1918_v10 }
 0xbdd   : > { %v3073_v5 = vpop.permute.xlu1 %3072 }
 0xbde   : > { %v3075_v8 = vunpack.i.h.bf16 %v3073_v5  ;;  %v3074_v13 = vunpack.i.l.bf16 %v3073_v5  ;;  %v1930_v16 = vpop.permute.xlu0 %1929 }
 0xbe0   : > { %v2969_v15 = vpack.c.bf16 %v3075_v8, %v3074_v13  ;;  %v3137_v11 = vpop.eup %3136 }
 0xbe1   : > { %v1920_v21 = vmul.f32 %v3137_v11, %v3131_v58 }
 0xbe3   : > { %v1708_v2 = vpop.f32.mrb[22].mxu0 }
 0xbe4   : > { %v2866_v4 = vpop.f32.mrb[23].mxu0  ;;  %v3139_v22 = vpop.eup %3138 }
 0xbe5   : > { %v1922_v23 = vmul.f32 %v3139_v22, %v3133_v60  ;;  %v3141_v25 = vpop.eup %3140 }
 0xbe6   : > { %v1924_v26 = vmul.f32 %v3141_v25, %v3135_v61 }
 0xbe7   : > { %v1713_v6 = vpop.f32.mrb[28].mxu0 }
 0xbe8   : > { %v1722_v7 = vpack.c.bf16 %v1713_v6, %v1708_v2  ;;  %v2869_v19 = vpop.f32.mrb[29].mxu0 }
 0xbea   : > { %2875 = vmatprep.mubr.msk.bf16.mxu0 %vm892_vm7, %v1722_v7 }
 0xbeb   : > { %v1718_v9 = vpop.f32.mrb[30].mxu0 }
 0xbec   : > { %v1723_v12 = vpack.c.bf16 %v1718_v9, %v1718_v9  ;;  %v2872_v14 = vpop.f32.mrb[31].mxu0 }
 0xbed   : > { %v3079_v14 = vld [vmem:[%s3359_s15 + $0x8] sm:$0xff]  }
 0xbee   : > { %2876 = vmatmul.mubr.msk.bf16.vlgmr.msra.gmra.mrb[32].mxu0 %vm892_vm7, %v1723_v12  ;;  %v3078_v12 = vld [vmem:[%s3359_s15] sm:$0xff]  }
 0xbef   : > { %2970 = vmatpush3.bf16.msra.mxu0 %v2969_v15  ;;  %2900 = vmatprep.mubr.msk.f32.mxu0 %vm3202_vm6, %v3203_v20 }
 0xbf0   : > { %2898 = vmatprep.subr.mxu0 %v3203_v20 }
 0xbf3   : > { %2899 = vmatpush3.msk.msra.mxu0 %vm1040_vm11, %v1930_v16 }
 0xbf4   : > { %2915 = vmatprep.subr.bf16.mxu0 %v3078_v12 }
 0xbf6   : > { %2901 = vmatmul.mubr.msk.f32.vlgmr.msra.gmra.mrb[36].mxu0 %vm988_vm9, %v1920_v21 }
 0xbf7   : > { %2903 = vmatprep.mubr.msk.f32.mxu0 %vm3202_vm6, %v3203_v20  ;;  %2916 = vmatpush3.bf16.msra.mxu0 %v3078_v12 }
 0xbf8   : > { %2917 = vmatprep.subr.bf16.mxu0 %v3079_v14 }
 0xbfa   : > { %2904 = vmatmul.mubr.msk.f32.gmra.mrb[38].mxu0 %vm988_vm9, %v1922_v23 }
 0xbfb   : > { %2906 = vmatprep.mubr.msk.f32.mxu0 %vm3202_vm6, %v3203_v20  ;;  %2918 = vmatpush3.bf16.msra.mxu0 %v3079_v14 }
 0xbfe   : > { %2907 = vmatmul.mubr.msk.f32.gmra.mrb[40].mxu0 %vm988_vm9, %v1924_v26 }
 0xcc1   : > { %v2877_v30 = vpop.f32.mrb[32].mxu0 }
 0xcc2   : > { %v1784_v31 = vadd.f32 %v2877_v30, %v3586_v45  ;;  %v1768_v32 = vpop.f32.mrb[33].mxu0  ;;  %v2141_v30 = vrot.slane %v3157_v29, %v2140_v28 }
 0xcc3   : > { %v1782_v33 = vadd.f32 %v1768_v32, %v3588_v47  ;;  %v2878_v34 = vpop.f32.mrb[34].mxu0  ;;  %v2649_v47 = vld [vmem:[%s3761_s29] ss:$0 sm:$0xff] }
 0xcc4   : > { %v1771_v35 = vpop.f32.mrb[35].mxu0 }
 0xcc5   : > { %v1783_v20 = vadd.f32 %v1771_v35, %v3590_v50 }
 0xcc9   : > { %v2010_v36 = vpop.f32.mrb[36].mxu0 }
 0xcca   : > { %v2902_v37 = vpop.f32.mrb[37].mxu0 }
 0xccd   : > { %v2015_v38 = vpop.f32.mrb[38].mxu0 }
 0xcce   : > { %v2024_v39 = vpack.c.bf16 %v2015_v38, %v2010_v36  ;;  %v2905_v40 = vpop.f32.mrb[39].mxu0 }
 0xcd0   : > { %2911 = vmatprep.mubr.msk.bf16.mxu1 %vm892_vm7, %v2024_v39 }
 0xcd1   : > { %v2020_v41 = vpop.f32.mrb[40].mxu0 }
 0xcd2   : > { %v2025_v24 = vpack.c.bf16 %v2020_v41, %v2020_v41  ;;  %v2908_v42 = vpop.f32.mrb[41].mxu0 }
 0xcd4   : > { %2912 = vmatmul.mubr.msk.bf16.vlgmr.msra.gmra.mrb[24].mxu1 %vm892_vm7, %v2025_v24 }
 0xda7   : > { %v2913_v45 = vpop.f32.mrb[24].mxu1 }
 0xda8   : > { %v2086_v43 = vadd.f32 %v2913_v45, %v1784_v31  ;;  %v2070_v50 = vpop.f32.mrb[25].mxu1  ;;  %v2147_v31 = vsub.s32 3, %v3416_v54 }
 0xda9   : > { %v2084_v44 = vadd.f32 %v2070_v50, %v1782_v33  ;;  %v2914_v46 = vpop.f32.mrb[26].mxu1  ;;  %v3082_v50 = vld [vmem:[%s3369_s23 + $0x10] sm:$0xff]  }
 0xdaa   : > { %v2073_v48 = vpop.f32.mrb[27].mxu1  ;;  %v2095_v49 = vadd.f32 %v2649_v47, %v2086_v43  ;;  %v2148_v36 = vrot.slane %v3157_v29, %v2147_v31  ;;  %v3081_v43 = vld [vmem:[%s3369_s23 + $0x8] sm:$0xff]   ;;  %v3084_v46 = vld [vmem:[%s3369_s23 + $0x20] sm:$0xff]  }
 0xdab   : > { %v2093_v51 = vadd.f32 %v2649_v47, %v2084_v44  ;;  %v2085_v52 = vadd.f32 %v2073_v48, %v1783_v20  ;;  %v3083_v44 = vld [vmem:[%s3369_s23 + $0x18] sm:$0xff]   ;;  %v3085_v48 = vld [vmem:[%s3369_s23 + $0x28] sm:$0xff]  }
 0xdac   : > { %v3649_v58 = vadd.f32 %v3155_v57, %v2095_v49  ;;  %v3086_v49 = vld [vmem:[%s3369_s23 + $0x30] sm:$0xff]  }
 0xdad   : > { %v3647_v55 = vadd.f32 %v3154_v53, %v2093_v51  ;;  %v2094_v56 = vadd.f32 %v2649_v47, %v2085_v52  ;;  %v3080_v47 = vld [vmem:[%s3369_s23] sm:$0xff]   ;;  %v3087_v51 = vld [vmem:[%s3369_s23 + $0x38] sm:$0xff]  }
 0xdae   : > { %v2105_v63 = vsel %vm750_vm5, %v3649_v58, 0.0  ;;  %2923 = vmatprep.subr.bf16.mxu1 %v3080_v47  ;;  %v2650_v52 = vld [vmem:[%s625_s2] ss:$0 sm:$0xff] }
 0xdaf   : > { %v3651_v60 = vadd.f32 %v3156_v59, %v2094_v56  ;;  %v2099_v61 = vsel %vm743_vm4, %v3647_v55, 0.0  ;;  %2924 = vmatpush3.bf16.msra.mxu1 %v3080_v47 }
 0xdb0   : > { %2100 = vadd.xlane.f32.xlu1 %v2099_v61  ;;  %2925 = vmatprep.subr.bf16.mxu1 %v3081_v43 }
 0xdb1   : > { %v2102_v62 = vsel %vm743_vm4, %v3651_v60, 0.0 }
 0xdb2   : > { %2103 = vadd.xlane.f32.xlu0 %v2102_v62 }
 0xdb3   : > { %2926 = vmatpush3.bf16.msra.mxu1 %v3081_v43 }
 0xdb4   : > { %2106 = vadd.xlane.f32.xlu1 %v2105_v63  ;;  %2927 = vmatprep.subr.bf16.mxu1 %v3082_v50 }
 0xdb7   : > { %2928 = vmatpush3.bf16.msra.mxu1 %v3082_v50 }
 0xdb8   : > { %2929 = vmatprep.subr.bf16.mxu1 %v3083_v44 }
 0xdbb   : > { %2930 = vmatpush3.bf16.msra.mxu1 %v3083_v44 }
 0xdbc   : > { %2931 = vmatprep.subr.bf16.mxu1 %v3084_v46 }
 0xdbf   : > { %2932 = vmatpush3.bf16.msra.mxu1 %v3084_v46 }
 0xdc0   : > { %2933 = vmatprep.subr.bf16.mxu1 %v3085_v48 }
 0xdc3   : > { %2934 = vmatpush3.bf16.msra.mxu1 %v3085_v48 }
 0xdc4   : > { %2935 = vmatprep.subr.bf16.mxu1 %v3086_v49 }
 0xdc7   : > { %2936 = vmatpush3.bf16.msra.mxu1 %v3086_v49 }
 0xdc8   : > { %2937 = vmatprep.subr.bf16.mxu1 %v3087_v51 }
 0xdcb   : > { %2938 = vmatpush3.bf16.msra.mxu1 %v3087_v51 }
 0xe3d   : > { %v2101_v0 = vpop.xlane.xlu1 %2100 }
 0xe3e   : > { %v2108_v17 = vmul.f32 0.03125, %v2101_v0 }
 0xe3f   : > { %v2104_v18 = vpop.xlane.xlu0 %2103 }
 0xe40   : > { %v2111_v1 = vsub.f32 %v3647_v55, %v2108_v17  ;;  %v2109_v2 = vmul.f32 0.03125, %v2104_v18 }
 0xe41   : > { %v2107_v3 = vpop.xlane.xlu1 %2106 }
 0xe42   : > { %v2112_v4 = vsub.f32 %v3651_v60, %v2109_v2  ;;  %v2110_v5 = vmul.f32 0.03125, %v2107_v3  ;;  %v2114_v6 = vmul.f32 %v2111_v1, %v2111_v1 }
 0xe44   : > { %v2113_v7 = vsub.f32 %v3649_v58, %v2110_v5  ;;  %v2117_v19 = vsel %vm743_vm4, %v2114_v6, 0.0  ;;  %v2115_v8 = vmul.f32 %v2112_v4, %v2112_v4 }
 0xe45   : > { %2118 = vadd.xlane.f32.xlu0 %v2117_v19 }
 0xe46   : > { %v2120_v13 = vsel %vm743_vm4, %v2115_v8, 0.0  ;;  %v2116_v9 = vmul.f32 %v2113_v7, %v2113_v7 }
 0xe47   : > { %2121 = vadd.xlane.f32.xlu1 %v2120_v13 }
 0xe48   : > { %v2123_v10 = vsel %vm750_vm5, %v2116_v9, 0.0 }
 0xe49   : > { %2124 = vadd.xlane.f32.xlu0 %v2123_v10 }
 0xed2   : > { %v2119_v15 = vpop.xlane.xlu0 %2118 }
 0xed3   : > { %v2126_v11 = vmul.f32 0.03125, %v2119_v15 }
 0xed4   : > { %v2122_v16 = vpop.xlane.xlu1 %2121 }
 0xed5   : > { %v2129_v21 = vadd.f32 1e-05, %v2126_v11  ;;  %v2127_v22 = vmul.f32 0.03125, %v2122_v16 }
 0xed6   : > { %v2125_v23 = vpop.xlane.xlu0 %2124 }
 0xed7   : > { %3142 = vrsqrt.f32 %v2129_v21  ;;  %v2130_v25 = vadd.f32 1e-05, %v2127_v22  ;;  %v2128_v26 = vmul.f32 0.03125, %v2125_v23 }
 0xed9   : > { %3144 = vrsqrt.f32 %v2130_v25  ;;  %v2131_v27 = vadd.f32 1e-05, %v2128_v26 }
 0xedb   : > { %3146 = vrsqrt.f32 %v2131_v27 }
 0xee1   : > { %v3143_v32 = vpop.eup %3142 }
 0xee2   : > { %v2135_v33 = vmul.f32 %v3143_v32, %v2111_v1  ;;  %v2663_v32 = vld [vmem:[%s633_s0] ss:$0 sm:$0xff] }
 0xee3   : > { %v3145_v34 = vpop.eup %3144 }
 0xee4   : > { %v2136_v35 = vmul.f32 %v3145_v34, %v2112_v4  ;;  %v2142_v20 = vmul.f32 %v2141_v30, %v2135_v33 }
 0xee5   : > { %v3147_v37 = vpop.eup %3146 }
 0xee6   : > { %v2137_v38 = vmul.f32 %v3147_v37, %v2113_v7  ;;  %v2143_v39 = vmul.f32 %v2141_v30, %v2136_v35  ;;  %v2149_v41 = vadd.f32 %v2148_v36, %v2142_v20 }
 0xee8   : > { %v2144_v40 = vmul.f32 %v2141_v30, %v2137_v38  ;;  %v2150_v24 = vadd.f32 %v2148_v36, %v2143_v39 }
 0xeea   : > { %v2156_v42 = vpack.c.bf16 %v2150_v24, %v2149_v41  ;;  %v2151_v45 = vadd.f32 %v2148_v36, %v2144_v40 }
 0xeec   : > { %2919 = vmatprep.mubr.msk.bf16.mxu0 %vm743_vm4, %v2156_v42  ;;  %v2157_v54 = vpack.c.bf16 %v2151_v45, %v2151_v45 }
 0xeee   : > { %2920 = vmatmul.mubr.msk.bf16.vlgmr.msra.gmra.mrb[44].mxu0 %vm743_vm4, %v2157_v54 }
 0xfc1   : > { %v2921_v53 = vpop.f32.mrb[44].mxu0 }
 0xfc2   : > { %v2226_v56 = vadd.f32 %v2921_v53, %v2650_v52  ;;  %v2217_v57 = vpop.f32.mrb[45].mxu0 }
 0xfc3   : > { %v2218_v59 = vadd.f32 %v2650_v52, %v2217_v57  ;;  %v2922_v61 = vpop.f32.mrb[46].mxu0 }
 0xfc4   : > { %v2236_v62 = vmul.f32 0.044715, %v2226_v56  ;;  %v2220_v63 = vpop.f32.mrb[47].mxu0  ;;  %v2233_v21 = vmul.f32 0.5, %v2226_v56 }
 0xfc5   : > { %v2234_v0 = vmul.f32 0.044715, %v2218_v59  ;;  %v2221_v17 = vadd.f32 %v2650_v52, %v2220_v63  ;;  %v2231_v22 = vmul.f32 0.5, %v2218_v59 }
 0xfc6   : > { %v2239_v18 = vmul.f32 %v2236_v62, %v2226_v56 }
 0xfc7   : > { %v2237_v1 = vmul.f32 %v2234_v0, %v2218_v59  ;;  %v2235_v2 = vmul.f32 0.044715, %v2221_v17  ;;  %v2232_v23 = vmul.f32 0.5, %v2221_v17 }
 0xfc8   : > { %v2242_v3 = vmul.f32 %v2239_v18, %v2226_v56 }
 0xfc9   : > { %v2240_v4 = vmul.f32 %v2237_v1, %v2218_v59  ;;  %v2238_v5 = vmul.f32 %v2235_v2, %v2221_v17 }
 0xfca   : > { %v2245_v6 = vadd.f32 %v2242_v3, %v2226_v56 }
 0xfcb   : > { %v2241_v7 = vmul.f32 %v2238_v5, %v2221_v17  ;;  %v2243_v19 = vadd.f32 %v2240_v4, %v2218_v59 }
 0xfcc   : > { %v2248_v8 = vmul.f32 0.7978846, %v2245_v6 }
 0xfcd   : > { %v2244_v13 = vadd.f32 %v2241_v7, %v2221_v17  ;;  %v2246_v9 = vmul.f32 0.7978846, %v2243_v19 }
 0xfce   : > { %3148 = vtanh.f32 %v2248_v8 }
 0xfcf   : > { %v2247_v10 = vmul.f32 0.7978846, %v2244_v13  ;;  %3150 = vtanh.f32 %v2246_v9 }
 0xfd1   : > { %3152 = vtanh.f32 %v2247_v10 }
 0xfd8   : > { %v3149_v12 = vpop.eup %3148 }
 0xfd9   : > { %v3151_v14 = vpop.eup %3150  ;;  %v2254_v15 = vadd.f32 1.0, %v3149_v12 }
 0xfda   : > { %v2252_v11 = vadd.f32 1.0, %v3151_v14 }
 0xfdb   : > { %v3153_v16 = vpop.eup %3152  ;;  %v2257_v26 = vmul.f32 %v2254_v15, %v2233_v21 }
 0xfdc   : > { %v2253_v25 = vadd.f32 1.0, %v3153_v16  ;;  %v2255_v27 = vmul.f32 %v2252_v11, %v2231_v22 }
 0xfdd   : > { %v2275_v30 = vpack.c.bf16 %v2257_v26, %v2257_v26 }
 0xfde   : > { %v2256_v28 = vmul.f32 %v2253_v25, %v2232_v23 }
 0xfe0   : > { %v2274_v29 = vpack.c.bf16 %v2256_v28, %v2255_v27 }
 0xfe2   : > { %2939 = vmatprep.mubr.bf16.mxu1 %v2274_v29 }
 0xfe3   : > { %2940 = vmatmul.mubr.bf16.vlgmr.msra.gmra.mrb[28].mxu1 %v2275_v30 }
0x10b6   : > { %v2941_v31 = vpop.f32.mrb[28].mxu1 }
0x10b7   : > { %v2374_v33 = vadd.f32 %v2941_v31, %v3649_v58  ;;  %v2358_v34 = vpop.f32.mrb[29].mxu1 }
0x10b8   : > { %v2372_v35 = vadd.f32 %v2358_v34, %v3647_v55  ;;  %v2942_v20 = vpop.f32.mrb[30].mxu1 }
0x10b9   : > { %v2384_v36 = vadd.f32 %v2663_v32, %v2374_v33  ;;  %v2361_v37 = vpop.f32.mrb[31].mxu1 }
0x10ba   : > { %v2382_v38 = vadd.f32 %v2663_v32, %v2372_v35  ;;  %v2373_v39 = vadd.f32 %v2361_v37, %v3651_v60 }
0x10bb   : > { %2387 = vst.msk [vmem:[#allocation2 + $0x10] sm:$0x1] %vm750_vm5, %v2384_v36  ;;  %2390 = vst.msk [vmem:[%s3379_s28 + $0x10] sm:$0x1] %vm750_vm5, %v2384_v36 }
0x10bc   : > { %2385 = vst.msk [vmem:[#allocation2] sm:$0xff] %vm743_vm4, %v2382_v38  ;;  %2388 = vst.msk [vmem:[%s3379_s28] sm:$0xff] %vm743_vm4, %v2382_v38  ;;  %v2383_v40 = vadd.f32 %v2663_v32, %v2373_v39 }
0x10be   : > { %2386 = vst.msk [vmem:[#allocation2 + $0x8] sm:$0xff] %vm743_vm4, %v2383_v40  ;;  %2389 = vst.msk [vmem:[%s3379_s28 + $0x8] sm:$0xff] %vm743_vm4, %v2383_v40 }
0x10bf PF: > { %s3762_s20 = sld [smem:[#allocation5_spill]]  ;;  %s3763_s29 = sld [smem:[#allocation3_spill]] }
0x10c0   : > { %s3764_s30 = sld [smem:[#allocation4_spill]]  ;;  %s3765_s15 = sld [smem:[#allocation6_spill]] }
0x10c1   : > { %s3766_s16 = sld [smem:[#allocation7_spill]] }
0x10c5   : > { %s24_s17 = sadd.s32 1, %s3762_s20  }
0x10c6   : > { %p21_p8 = scmp.ge.s32.totalorder %s24_s17, 8  }
0x10c8   :  { %23 = sbr.rel (!%p21_p8) target bundleno = 8 (0x8), region = 137 }

// kernel: forward.5
= control target key start
LH: loop header
LB: loop body
LE: loop exit
PB: predicated region body
PF: predicated region fallthrough
CT: control target
= control target key end

     0   :  { %s358_s9 = smov 0   ;;  %s386_s0 = inlined_call_operand.vmem [shape: f32[2,8,8], index: 0, kind: input, shape index: {}]   ;;  %s387_s1 = inlined_call_operand.vmem [shape: f32[2,8,256], index: 1, kind: input, shape index: {}]   ;;  %s388_s2 = inlined_call_operand.vmem [shape: f32[2,8,256], index: 2, kind: output, shape index: {}]  }
   0x1 LB: > { %s301_s10 = sadd.s32 4294967295, %s340_s9   ;;  %p305_p0 = scmp.ge.s32.totalorder %s340_s9, 1  ;;  %s340_s9 = sphi %s358_s9, %s12_s9  }
   0x2   : > { %p121_p1 = scmp.lt.s32.totalorder %s340_s9, 3 }
   0x4   : > { %p122_p2 = pnand %p305_p0, %p121_p1 }
   0x5   : > { %p147_p3 = scmp.lt.s32.totalorder (!%p122_p2), %s301_s10, 1  ;;  %v342_v0 = vmov (!%p122_p2), 0   ;;  %vm184_vm0 = vcmask (!%p122_p2), 1043456   ;;  %vm180_vm1 = vcmask (!%p122_p2), 64512  }
   0x6   : > { %125 = sbr.rel (%p122_p2) target bundleno = 267 (0x10b), region = 28  ;;  %223 = vmatprep.mubr.bf16.mxu0 (!%p122_p2), %v342_v0 }
   0xd   : > { %s390_s10 = smov (!%p147_p3, %s301_s10), 1 }
   0xe   : > { %s315_s11 = sshll.u32 %s390_s10, 4  ;;  %s306_s15 = sshll.u32 %s390_s10, 3 }
   0xf   : > { %s155_s14 = scalar_lea.vmem %s387_s1, %s315_s11  ;;  %s150_s18 = scalar_lea.vmem %s386_s0, %s306_s15 }
  0x10   : > { %v164_v1 = vld [vmem:[%s155_s14 + $0x8] sm:$0xff]  ;;  %v163_v2 = vld [vmem:[%s155_s14] sm:$0xff]  ;;  %s160_s21 = scalar_lea.vmem %s388_s2, %s315_s11 }
  0x11   : > { %v166_v3 = vsub.f32 0.0, %v164_v1  ;;  %v165_v4 = vsub.f32 0.0, %v163_v2  ;;  %v162_v14 = vld [vmem:[%s150_s18] sm:$0xff] }
  0x12   : > { %v177_v17 = vpack.c.bf16 %v162_v14, %v162_v14 }
  0x13   : > { %v169_v5 = vmul.f32 1.442695, %v166_v3  ;;  %v167_v6 = vmul.f32 1.442695, %v165_v4 }
  0x15   : > { %326 = vpow2.f32 %v169_v5 }
  0x16   : > { %328 = vpow2.f32 %v167_v6 }
  0x1f   : > { %v327_v7 = vpop.eup %326 }
  0x20   : > { %v329_v8 = vpop.eup %328  ;;  %v172_v9 = vadd.f32 1.0, %v327_v7 }
  0x21   : > { %v171_v10 = vadd.f32 1.0, %v329_v8 }
  0x22   : > { %330 = vrcp.f32 %v172_v9 }
  0x23   : > { %332 = vrcp.f32 %v171_v10 }
  0x2c   : > { %v331_v11 = vpop.eup %330 }
  0x2d   : > { %v333_v12 = vpop.eup %332  ;;  %v179_v13 = vpack.c.bf16 %v331_v11, %v331_v11 }
  0x2e   : > { %v178_v15 = vpack.c.bf16 %v333_v12, %v333_v12 }
  0x2f   : > { %311 = vmatprep.subr.msk.bf16.mxu0 %vm184_vm0, %v179_v13 }
  0x30   : > { %v186_v16 = vsel %vm184_vm0, %v178_v15, 0 }
  0x31   : > { %192 = vmatpush1.bf16.msra.mxu0 %v186_v16 }
  0x34   : > { %312 = vmatmul.mubr.msk.bf16.vlgmr.msra.gmra.mrb[0].mxu0 %vm180_vm1, %v177_v17 }
 0x107   : > { %v225_v18 = vpop.f32.mrb[0].mxu0 }
 0x108   : > { %232 = vst [vmem:[%s160_s21] sm:$0xff] %v225_v18  ;;  %v227_v19 = vpop.f32.mrb[1].mxu0 }
 0x109   : > { %233 = vst [vmem:[%s160_s21 + $0x8] sm:$0xff] %v227_v19  ;;  %v229_v20 = vpop.f32.mrb[2].mxu0 }
 0x10a   : > { %v230_v21 = vpop.f32.mrb[3].mxu0 }
 0x10b PF: > { %s12_s9 = sadd.s32 1, %s340_s9  }
 0x10c   : > { %p9_p4 = scmp.ge.s32.totalorder %s12_s9, 4  }
 0x10e   :  { %11 = sbr.rel (!%p9_p4) target bundleno = 1 (0x1), region = 61 }

// kernel: forward.4
= control target key start
LH: loop header
LB: loop body
LE: loop exit
PB: predicated region body
PF: predicated region fallthrough
CT: control target
= control target key end

     0   :  { %s4692_s22 = smov 0   ;;  %s4694_s23 = smov 0   ;;  %s5224_s0 = inlined_call_operand.vmem [shape: f32[3,2,16,32], index: 0, kind: input, shape index: {}]   ;;  %s5225_s1 = inlined_call_operand.vmem [shape: bf16[3,32,32], index: 1, kind: input, shape index: {}]   ;;  %s5226_s2 = inlined_call_operand.vmem [shape: f32[3,3,32], index: 2, kind: input, shape index: {}]   ;;  %s5227_s3 = inlined_call_operand.vmem [shape: f32[8,32], index: 3, kind: input, shape index: {}]   ;;  %s5228_s4 = inlined_call_operand.vmem [shape: bf16[32,9], index: 4, kind: input, shape index: {}]   ;;  %s5229_s5 = inlined_call_operand.vmem [shape: f32[1,9], index: 5, kind: input, shape index: {}]   ;;  %s5230_s6 = inlined_call_operand.vmem [shape: bf16[3,1,32,96], index: 6, kind: input, shape index: {}]   ;;  %s5231_s7 = inlined_call_operand.vmem [shape: f32[3,1,1,96], index: 7, kind: input, shape index: {}]   ;;  %s5232_s8 = inlined_call_operand.vmem [shape: f32[3,1,32,32], index: 8, kind: input, shape index: {}]   ;;  %s5233_s9 = inlined_call_operand.vmem [shape: f32[3,1,1,32], index: 9, kind: input, shape index: {}]   ;;  %s5234_s10 = inlined_call_operand.vmem [shape: bf16[3,1,32,96], index: 10, kind: input, shape index: {}]   ;;  %s5235_s11 = inlined_call_operand.vmem [shape: f32[3,1,1,96], index: 11, kind: input, shape index: {}]   ;;  %s5236_s12 = inlined_call_operand.vmem [shape: f32[3,1,32,32], index: 12, kind: input, shape index: {}]   ;;  %s5237_s13 = inlined_call_operand.vmem [shape: f32[3,1,1,32], index: 13, kind: input, shape index: {}]   ;;  %s5238_s14 = inlined_call_operand.vmem [shape: bf16[3,1,32,128], index: 14, kind: input, shape index: {}]   ;;  %s5239_s15 = inlined_call_operand.vmem [shape: f32[3,1,1,128], index: 15, kind: input, shape index: {}]   ;;  %s5240_s16 = inlined_call_operand.vmem [shape: bf16[3,1,128,32], index: 16, kind: input, shape index: {}]   ;;  %s5241_s17 = inlined_call_operand.vmem [shape: f32[3,1,1,32], index: 17, kind: input, shape index: {}]   ;;  %s5242_s18 = inlined_call_operand.vmem [shape: f32[3,1,6,32], index: 18, kind: input, shape index: {}]   ;;  %s5243_s19 = inlined_call_operand.vmem [shape: f32[3,2,8,9], index: 19, kind: output, shape index: {0}]   ;;  %s5244_s20 = inlined_call_operand.vmem [shape: f32[3,2,8,16], index: 20, kind: output, shape index: {1}]  }
   0x1   :  { %5253 = sst [smem:[#allocation14_spill]] %s5224_s0  ;;  %s4696_s24 = smov 0  }
   0x2   :  { %5254 = sst [smem:[#allocation15_spill]] %s5225_s1  ;;  %s4690_s1 = smov 0  }
   0x3   :  { %5255 = sst [smem:[#allocation16_spill]] %s5226_s2  ;;  %s4698_s2 = smov 0  }
   0x4   :  { %5256 = sst [smem:[#allocation17_spill]] %s5227_s3 }
   0x5   :  { %5257 = sst [smem:[#allocation18_spill]] %s5228_s4 }
   0x6   :  { %5258 = sst [smem:[#allocation19_spill]] %s5229_s5 }
   0x7   :  { %5259 = sst [smem:[#allocation20_spill]] %s5230_s6 }
   0x8   :  { %5260 = sst [smem:[#allocation21_spill]] %s5232_s8 }
   0x9   :  { %5261 = sst [smem:[#allocation22_spill]] %s5234_s10 }
   0xa   :  { %5262 = sst [smem:[#allocation23_spill]] %s5236_s12 }
   0xb   :  { %5263 = sst [smem:[#allocation24_spill]] %s5238_s14 }
   0xc   :  { %5264 = sst [smem:[#allocation25_spill]] %s5239_s15 }
   0xd   :  { %5265 = sst [smem:[#allocation26_spill]] %s5240_s16 }
   0xe   :  { %5266 = sst [smem:[#allocation27_spill]] %s5242_s18 }
   0xf   :  { %5267 = sst [smem:[#allocation28_spill]] %s5243_s19 }
  0x10   :  { %5268 = sst [smem:[#allocation29_spill]] %s5244_s20 }
  0x11 LB: > { %5269 = sst [smem:[#allocation4_spill]] %s4553_s1  ;;  %s46_s25 = sadd.s32 1, %s4561_s23  ;;  %s4569_s2 = sphi %s4698_s2, %s31_s2   ;;  %s4565_s24 = sphi %s4696_s24, %s5313_s24   ;;  %s4561_s23 = sphi %s4694_s23, %s5312_s23   ;;  %s4557_s22 = sphi %s4692_s22, %s5311_s22   ;;  %s4553_s1 = sphi %s4690_s1, %s5310_s1  }
  0x12   : > { %5270 = sst [smem:[#allocation5_spill]] %s4561_s23  ;;  %s50_s3 = sadd.s32 1, %s4565_s24 }
  0x13   : > { %5271 = sst [smem:[#allocation6_spill]] %s4565_s24  ;;  %p48_p0 = scmp.ge.s32.totalorder %s46_s25, 3 }
  0x14   : > { %5272 = sst [smem:[#allocation7_spill]] %s4569_s2  ;;  %p3950_p1 = scmp.ge.s32.totalorder %s4569_s2, 1 }
  0x15   : > { %p801_p2 = scmp.lt.s32.totalorder %s4569_s2, 7  ;;  %s5315_s25 = smov (%p48_p0, %s46_s25), 0 }
  0x16   : > { %5273 = sst [smem:[#allocation8_spill]] %s5315_s25  ;;  %s5317_s3 = smov (!%p48_p0, %s50_s3), %s4565_s24 }
  0x17   : > { %p802_p3 = pnand %p3950_p1, %p801_p2  ;;  %p52_p4 = scmp.ge.s32.totalorder %s5317_s3, 2 }
  0x19   : > { %s5319_s3 = smov (%p52_p4, %s5317_s3), 0  ;;  %805 = sbr.rel (%p802_p3) target bundleno = 6829 (0x1aad), region = 96 }
  0x1a   : > { %5274 = sst [smem:[#allocation9_spill]] %s5319_s3 }
  0x20   : > { %p980_p5 = scmp.lt.s32.totalorder %s4553_s1, 2  ;;  %p982_p6 = scmp.lt.s32.totalorder %s4557_s22, 1 }
  0x21   : > { %p1112_p7 = scmp.eq.s32.totalorder %s4553_s1, 0  ;;  %s5275_s0 = sld [smem:[#allocation15_spill]] }
  0x22   : > { %s4725_s26 = scalar_select %p980_p5, %s4553_s1, 2 }
  0x23   : > { %s5321_s22 = smov (!%p982_p6, %s4557_s22), 1  ;;  %s5277_s23 = sld [smem:[#allocation16_spill]]  ;;  %vm1119_vm0 = vcmask (%p1112_p7), 261120  }
  0x24   : > { %s3952_s27 = sshll.u32 %s4725_s26, 2  ;;  %s4045_s28 = sshll.u32 %s4725_s26, 4 }
  0x25   : > { %s3951_s4 = sshll.u32 %s5321_s22, 1  ;;  %s5279_s6 = sld [smem:[#allocation20_spill]] }
  0x26   : > { %s986_s3 = sadd.s32 %s3952_s27, %s3951_s4  ;;  %s5281_s30 = sld [smem:[#allocation14_spill]] }
  0x27   : > { %s4732_s21 = scalar_lea.vmem %s5275_s0, %s4045_s28  ;;  %s3953_s5 = sshll.u32 %s986_s3, 3 }
  0x28   : > { %5276 = sst [smem:[#allocation10_spill]] %s4732_s21  ;;  %s5282_s8 = sld [smem:[#allocation21_spill]] }
  0x29   : > { %s4737_s2 = scalar_lea.vmem %s5277_s23, %s3952_s27  ;;  %s4047_s23 = sshll.u32 %s4725_s26, 5 }
  0x2a   : > { %5278 = sst [smem:[#allocation11_spill]] %s4737_s2  ;;  %s5283_s10 = sld [smem:[#allocation22_spill]] }
  0x2b   : > { %s4742_s19 = scalar_lea.vmem %s5279_s6, %s4045_s28  ;;  %s5284_s12 = sld [smem:[#allocation23_spill]] }
  0x2c   : > { %5280 = sst [smem:[#allocation12_spill]] %s4742_s19  ;;  %s4747_s0 = scalar_lea.vmem %s5281_s30, %s3953_s5 }
  0x2d   : > { %s5285_s14 = sld [smem:[#allocation24_spill]]  ;;  %s4051_s5 = sshll.u32 %s4725_s26, 6 }
  0x2e   : > { %s4761_s1 = scalar_lea.vmem %s5282_s8, %s4047_s23  ;;  %s5288_s16 = sld [smem:[#allocation26_spill]] }
  0x2f   : > { %s3969_s27 = sshll.u32 %s4725_s26, 3  ;;  %s3970_s2 = sshll.u32 %s4725_s26, 1 }
  0x30   : > { %s4766_s18 = scalar_lea.vmem %s5283_s10, %s4045_s28  ;;  %s5290_s15 = sld [smem:[#allocation28_spill]] }
  0x31   : > { %s4775_s24 = scalar_lea.vmem %s5284_s12, %s4047_s23  ;;  %s5291_s29 = sld [smem:[#allocation29_spill]] }
  0x32   : > { %s5293_s12 = sld [smem:[#allocation17_spill]] (%p1112_p7) }
  0x33   : > { %s4784_s8 = scalar_lea.vmem %s5285_s14, %s4045_s28  ;;  %s5289_s28 = sld [smem:[#allocation27_spill]] }
  0x34   : > { %5286 = sst [smem:[#allocation13_spill]] %s4784_s8  ;;  %s4794_s30 = scalar_lea.vmem %s5288_s16, %s4051_s5 }
  0x35   : > { %s1100_s14 = sadd.s32 %s3970_s2, %s5321_s22  ;;  %1117 = sbr.rel (!%p1112_p7) target bundleno = 60 (0x3c), region = 100 }
  0x36   : > { %s3971_s6 = sshll.u32 %s1100_s14, 3 }
  0x37   : > { %s4810_s8 = scalar_lea.vmem %s5290_s15, %s3971_s6  ;;  %s4815_s16 = scalar_lea.vmem %s5291_s29, %s3971_s6 }
  0x38   : > { %v1118_v0 = vld [vmem:[%s5293_s12] sm:$0xff] (%p1112_p7) }
  0x39   : > { %s4805_s20 = scalar_lea.vmem %s5289_s28, %s3969_s27  ;;  %1120 = vst.msk [vmem:[#allocation2] sm:$0xff] (%p1112_p7), %vm1119_vm0, %v1118_v0 }
  0x3c PF: > { %s5294_s14 = sld [smem:[#allocation10_spill]]  ;;  %s5295_s10 = sld [smem:[#allocation12_spill]]  ;;  %v4571_v2 = vmov 0.0   ;;  %vm4572_vm1 = vmmov 0   ;;  %v1125_v4 = vld [vmem:[%s4747_s0] sm:$0xff]  ;;  %v1126_v5 = vld [vmem:[%s4747_s0 + $0x8] sm:$0xff] }
  0x3d   : > { %4139 = vmatprep.subr.bf16.mxu1 %v4571_v2  ;;  %4155 = vmatprep.subr.mxu0 %v4571_v2  ;;  %v1131_v6 = vpack.c.bf16 %v1126_v5, %v1125_v4  ;;  %vm1148_vm2 = vcmask 261120   ;;  %s5296_s0 = scalar_lea.vmem %s5231_s7, %s4725_s26  ;;  %s4573_s2 = smov 120   ;;  %vm1314_vm3 = vcmask 64512   ;;  %v1307_v42 = vld [vmem:[%s4761_s1 + $0x8] sm:$0xff]  ;;  %vm1650_vm4 = vcmask 1043456   ;;  %v1306_v53 = vld [vmem:[%s4761_s1] sm:$0xff] }
  0x3e   : > { %4143 = vmatprep.mubr.msk.bf16.mxu1 %vm4572_vm1, %v4571_v2  ;;  %4157 = vmatprep.mubr.msk.f32.mxu0 %vm4572_vm1, %v4571_v2  ;;  %v3978_v15 = vld [vmem:[%s5296_s0] ss:$0 sm:$0xff]  ;;  %s4574_s25 = smov 96   ;;  %s4575_s27 = smov 88   ;;  %v1646_v43 = vpack.c.bf16 %v1307_v42, %v1307_v42  ;;  %v1478_v54 = vpack.c.bf16 %v1306_v53, %v1306_v53  ;;  %v1309_v53 = vld [vmem:[%s4761_s1 + $0x18] sm:$0xff]  ;;  %vm5026_vm5 = vmpackc.low %vm1314_vm3, %vm1314_vm3  ;;  %vm2459_vm6 = vcmask 130048  }
  0x3f   : > { %s4576_s3 = smov 56   ;;  %s4577_s28 = smov 64   ;;  %vm3567_vm7 = vcmask 72704  }
  0x40   : > { %v4836_v9 = vld [vmem:[#allocation2] sm:$0xff]  ;;  %s4578_s6 = smov 80   ;;  %s4579_s19 = smov 112   ;;  %v1652_v44 = vsel %vm1650_vm4, %v1646_v43, 0  ;;  %v1698_v55 = vsel %vm1650_vm4, %v1478_v54, 0  ;;  %v2122_v54 = vpack.c.bf16 %v1309_v53, %v1309_v53 }
  0x41   : > { %v1242_v10 = vpack.c.bf16 %v4836_v9, %v4836_v9  ;;  %s4580_s21 = smov 72   ;;  %s4581_s5 = smov 104  }
  0x42   : > { %v4471_v1 = vld [vmem:[%s5294_s14] sm:$0xff]   ;;  %v4472_v3 = vld [vmem:[%s5294_s14 + $0x8] sm:$0xff]   ;;  %s4582_s29 = smov 48   ;;  %s5297_s23 = sld [smem:[#allocation11_spill]] }
  0x43   : > { %4140 = vmatpush3.bf16.msra.mxu1 %v4471_v1  ;;  %v4473_v7 = vld [vmem:[%s5295_s10] sm:$0xff]   ;;  %v4474_v8 = vld [vmem:[%s5295_s10 + $0x8] sm:$0xff]   ;;  %s4583_s4 = smov 40   ;;  %s5298_s14 = scalar_lea.vmem %s5233_s9, %s4725_s26 }
  0x44   : > { %4141 = vmatprep.subr.bf16.mxu1 %v4571_v2  ;;  %s5299_s15 = scalar_lea.vmem %s5235_s11, %s4725_s26  ;;  %s5302_s22 = scalar_lea.vmem %s5237_s13, %s4725_s26 }
  0x47   : > { %4142 = vmatpush3.bf16.msra.mxu1 %v4472_v3 }
  0x48   : > { %4147 = vmatprep.subr.bf16.mxu1 %v4571_v2 }
  0x4a   : > { %4144 = vmatmul.mubr.msk.bf16.vlgmr.msra.gmra.mrb[0].mxu1 %vm1148_vm2, %v1131_v6 }
  0x4b   : > { %4148 = vmatpush3.bf16.msra.mxu1 %v4473_v7  ;;  %4151 = vmatprep.mubr.msk.bf16.mxu1 %vm4572_vm1, %v4571_v2 }
  0x4c   : > { %4149 = vmatprep.subr.bf16.mxu1 %v4571_v2 }
  0x4f   : > { %4150 = vmatpush3.bf16.msra.mxu1 %v4474_v8 }
  0x50   : > { %4160 = vmatprep.subr.mxu1 %v4571_v2 }
  0x52   : > { %4152 = vmatmul.mubr.msk.bf16.vlgmr.msra.gmra.mrb[4].mxu1 %vm1148_vm2, %v1242_v10 }
  0x53   : > { %4162 = vmatprep.mubr.msk.f32.mxu1 %vm4572_vm1, %v4571_v2 }
 0x11d   : > { %v4848_v11 = vpop.f32.mrb[0].mxu1 }
 0x11e   : > { %v4145_v12 = vpop.f32.mrb[1].mxu1 }
 0x11f   : > { %v4850_v13 = vpop.f32.mrb[2].mxu1 }
 0x120   : > { %v4146_v14 = vpop.f32.mrb[3].mxu1 }
 0x125   : > { %v1300_v16 = vpop.f32.mrb[4].mxu1 }
 0x126   : > { %v4857_v17 = vadd.f32 %v3978_v15, %v1300_v16  ;;  %v4153_v18 = vpop.f32.mrb[5].mxu1 }
 0x127   : > { %v1303_v19 = vpop.f32.mrb[6].mxu1 }
 0x128   : > { %1479 = vrot.lane.b32.xlu1 %v4857_v17, %s4573_s2  ;;  %1312 = vrot.lane.b32.xlu0 %v4857_v17, %s4574_s25  ;;  %v4154_v20 = vpop.f32.mrb[7].mxu1 }
 0x12c   : > { %1481 = vrot.lane.b32.xlu0 %v4857_v17, %s4575_s27 }
 0x19a   : > { %v1313_v21 = vpop.permute.xlu0 %1312  ;;  %v1480_v23 = vpop.permute.xlu1 %1479 }
 0x19b   : > { %4156 = vmatpush3.xpose.msk.msra.mxu0 %vm1314_vm3, %v1313_v21 }
 0x19c   : > { %4165 = vmatprep.subr.mxu0 %v4571_v2 }
 0x19e   : > { %4158 = vmatmul.mubr.msk.f32.vlgmr.msra.gmra.mrb[0].mxu0 %vm1314_vm3, %v4857_v17  ;;  %v1482_v22 = vpop.permute.xlu0 %1481 }
 0x19f   : > { %4166 = vmatpush3.xpose.msk.msra.mxu0 %vm1314_vm3, %v1482_v22  ;;  %4167 = vmatprep.mubr.msk.f32.mxu0 %vm4572_vm1, %v4571_v2 }
 0x1a0   : > { %4175 = vmatprep.subr.bf16.mxu0 %v4571_v2 }
 0x1a2   : > { %4168 = vmatmul.mubr.msk.f32.vlgmr.msra.gmra.mrb[2].mxu0 %vm1314_vm3, %v1480_v23 }
 0x1a3   : > { %4177 = vmatprep.mubr.msk.bf16.mxu0 %vm4572_vm1, %v4571_v2  ;;  %4176 = vmatpush3.bf16.msra.mxu0 %v1652_v44 }
 0x1a4   : > { %4187 = vmatprep.subr.mxu0 %v4571_v2 }
 0x271   : > { %v1385_v24 = vpop.f32.mrb[0].mxu0 }
 0x272   : > { %v1389_v25 = vmul.f32 0.35355338, %v1385_v24  ;;  %v4159_v26 = vpop.f32.mrb[1].mxu0 }
 0x274   : > { %v1390_v27 = vsel %vm1314_vm3, %v1389_v25, -inf }
 0x275   : > { %1391 = vmax.xlane.f32.xlu1 %v1390_v27  ;;  %v1553_v28 = vpop.f32.mrb[2].mxu0 }
 0x276   : > { %v1557_v29 = vmul.f32 0.35355338, %v1553_v28  ;;  %v4169_v30 = vpop.f32.mrb[3].mxu0 }
 0x278   : > { %v1558_v31 = vsel %vm1314_vm3, %v1557_v29, -inf }
 0x279   : > { %1559 = vmax.xlane.f32.xlu0 %v1558_v31 }
 0x302   : > { %v1392_v32 = vpop.xlane.xlu1 %1391 }
 0x303   : > { %v1393_v33 = vsub.f32 %v1389_v25, %v1392_v32 }
 0x305   : > { %v1394_v34 = vmul.f32 1.442695, %v1393_v33 }
 0x306   : > { %v1560_v35 = vpop.xlane.xlu0 %1559 }
 0x307   : > { %4489 = vpow2.f32 %v1394_v34  ;;  %v1561_v36 = vsub.f32 %v1557_v29, %v1560_v35  ;;  %v1308_v29 = vld [vmem:[%s4761_s1 + $0x10] sm:$0xff] }
 0x308   : > { %v1907_v30 = vpack.c.bf16 %v1308_v29, %v1308_v29 }
 0x309   : > { %v1562_v37 = vmul.f32 1.442695, %v1561_v36 }
 0x30a   : > { %v1912_v31 = vsel %vm1650_vm4, %v1907_v30, 0 }
 0x30b   : > { %4491 = vpow2.f32 %v1562_v37 }
 0x311   : > { %v4490_v38 = vpop.eup %4489 }
 0x312   : > { %v1396_v39 = vsel %vm1314_vm3, %v4490_v38, 0.0 }
 0x313   : > { %1397 = vadd.xlane.f32.xlu0 %v1396_v39  ;;  %v1132_v39 = vlaneseq }
 0x315   : > { %v4492_v40 = vpop.eup %4491  ;;  %v4935_v43 = vshrl.u32 %v1132_v39, 7 }
 0x316   : > { %v1564_v41 = vsel %vm1314_vm3, %v4492_v40, 0.0 }
 0x317   : > { %1565 = vadd.xlane.f32.xlu1 %v1564_v41  ;;  %v1222_v39 = vsub.s32 1, %v4935_v43 }
 0x328   : > { %1569 = vrot.lane.b32.xlu1 %v4857_v17, %s4576_s3 }
 0x329   : > { %1401 = vrot.lane.b32.xlu0 %v4857_v17, %s4577_s28 }
 0x32c   : > { %1742 = vrot.lane.b32.xlu1 %v4857_v17, %s4578_s6  ;;  %s5306_s6 = scalar_lea.vmem %s5241_s17, %s4725_s26 }
 0x32d   : > { %1740 = vrot.lane.b32.xlu0 %v4857_v17, %s4579_s19 }
 0x3a0   : > { %v1398_v45 = vpop.xlane.xlu0 %1397 }
 0x3a1   : > { %4493 = vrcp.f32 %v1398_v45  ;;  %v1134_v45 = vsub.s32 0, %v4935_v43 }
 0x3a4   : > { %v1566_v46 = vpop.xlane.xlu1 %1565  ;;  %v1402_v47 = vpop.permute.xlu0 %1401 }
 0x3a5   : > { %4495 = vrcp.f32 %v1566_v46  ;;  %4161 = vmatpush3.msra.mxu1 %v1402_v47  ;;  %v4940_v46 = vld [vmem:[%s5297_s23] sm:$0x7] }
 0x3a6   : > { %4170 = vmatprep.subr.mxu1 %v4571_v2 }
 0x3a8   : > { %v1570_v50 = vpop.permute.xlu1 %1569  ;;  %v1741_v63 = vpop.permute.xlu0 %1740 }
 0x3ab   : > { %v4494_v48 = vpop.eup %4493 }
 0x3ac   : > { %v1400_v49 = vmul.f32 %v4494_v48, %v4490_v38  ;;  %v1743_v62 = vpop.permute.xlu1 %1742 }
 0x3ae   : > { %4163 = vmatmul.mubr.msk.f32.vlgmr.msra.gmra.mrb[8].mxu1 %vm1314_vm3, %v1400_v49 }
 0x3af   : > { %v4496_v51 = vpop.eup %4495  ;;  %4171 = vmatpush3.msra.mxu1 %v1570_v50  ;;  %4172 = vmatprep.mubr.msk.f32.mxu1 %vm4572_vm1, %v4571_v2 }
 0x3b0   : > { %v1568_v52 = vmul.f32 %v4496_v51, %v4492_v40  ;;  %4181 = vmatprep.subr.bf16.mxu1 %v4571_v2 }
 0x3b2   : > { %4173 = vmatmul.mubr.msk.f32.vlgmr.msra.gmra.mrb[10].mxu1 %vm1314_vm3, %v1568_v52 }
 0x3b3   : > { %4183 = vmatprep.mubr.msk.bf16.mxu1 %vm4572_vm1, %v4571_v2  ;;  %4182 = vmatpush3.bf16.msra.mxu1 %v1698_v55  ;;  %v2127_v55 = vsel %vm1650_vm4, %v2122_v54, 0 }
 0x3b4   : > { %4192 = vmatprep.subr.mxu1 %v4571_v2 }
 0x481   : > { %v1473_v56 = vpop.f32.mrb[8].mxu1 }
 0x482   : > { %v1477_v57 = vpack.c.bf16 %v1473_v56, %v1473_v56  ;;  %v4164_v58 = vpop.f32.mrb[9].mxu1 }
 0x484   : > { %4184 = vmatmul.mubr.msk.bf16.vlgmr.msra.gmra.mrb[12].mxu1 %vm1314_vm3, %v1477_v57 }
 0x485   : > { %v1641_v59 = vpop.f32.mrb[10].mxu1  ;;  %4194 = vmatprep.mubr.msk.f32.mxu1 %vm4572_vm1, %v4571_v2 }
 0x486   : > { %v1645_v60 = vpack.c.bf16 %v1641_v59, %v1641_v59  ;;  %v4174_v61 = vpop.f32.mrb[11].mxu1 }
 0x488   : > { %4178 = vmatmul.mubr.msk.bf16.vlgmr.msra.gmra.mrb[4].mxu0 %vm1314_vm3, %v1645_v60 }
 0x489   : > { %4188 = vmatpush3.xpose.msk.msra.mxu0 %vm1314_vm3, %v1743_v62  ;;  %4189 = vmatprep.mubr.msk.f32.mxu0 %vm4572_vm1, %v4571_v2 }
 0x48a   : > { %4197 = vmatprep.subr.bf16.mxu0 %v4571_v2 }
 0x490   : > { %4190 = vmatmul.mubr.msk.f32.vlgmr.msra.gmra.mrb[8].mxu0 %vm1314_vm3, %v1741_v63 }
 0x491   : > { %4199 = vmatprep.mubr.msk.bf16.mxu0 %vm4572_vm1, %v4571_v2  ;;  %4198 = vmatpush3.bf16.msra.mxu0 %v1912_v31 }
 0x492   : > { %4213 = vmatprep.subr.bf16.mxu0 %v4571_v2 }
 0x557   : > { %v1734_v0 = vpop.f32.mrb[12].mxu1 }
 0x558   : > { %v4185_v1 = vpop.f32.mrb[13].mxu1 }
 0x559   : > { %v1737_v3 = vpop.f32.mrb[14].mxu1  ;;  %v4475_v1 = vld [vmem:[%s4766_s18] sm:$0xff]  }
 0x55a   : > { %v4186_v4 = vpop.f32.mrb[15].mxu1  ;;  %v4963_v3 = vld [vmem:[%s4766_s18 + $0x8] sm:$0xff]  }
 0x55b   : > { %v1688_v5 = vpop.f32.mrb[4].mxu0 }
 0x55c   : > { %v4910_v6 = vadd.f32 %v1734_v0, %v1688_v5  ;;  %v4179_v7 = vpop.f32.mrb[5].mxu0 }
 0x55d   : > { %v1691_v8 = vpop.f32.mrb[6].mxu0  ;;  %v3998_v7 = vld [vmem:[%s5298_s14] ss:$0 sm:$0xff] }
 0x55e   : > { %v4180_v10 = vpop.f32.mrb[7].mxu0 }
 0x563   : > { %v1814_v12 = vpop.f32.mrb[8].mxu0 }
 0x564   : > { %v1818_v14 = vmul.f32 0.35355338, %v1814_v12  ;;  %v4191_v15 = vpop.f32.mrb[9].mxu0 }
 0x566   : > { %v1819_v16 = vsel %vm1314_vm3, %v1818_v14, -inf }
 0x567   : > { %1820 = vmax.xlane.f32.xlu1 %v1819_v16 }
 0x578   : > { %1957 = vrot.lane.b32.xlu1 %v4857_v17, %s4580_s21  ;;  %s5307_s21 = sld [smem:[#allocation18_spill]] }
 0x57c   : > { %1955 = vrot.lane.b32.xlu1 %v4857_v17, %s4581_s5 }
 0x5f4   : > { %v1821_v18 = vpop.xlane.xlu1 %1820 }
 0x5f5   : > { %v1822_v19 = vsub.f32 %v1818_v14, %v1821_v18 }
 0x5f7   : > { %v1823_v20 = vmul.f32 1.442695, %v1822_v19 }
 0x5f8   : > { %v1958_v26 = vpop.permute.xlu1 %1957 }
 0x5f9   : > { %4497 = vpow2.f32 %v1823_v20 }
 0x5fc   : > { %v1956_v28 = vpop.permute.xlu1 %1955 }
 0x603   : > { %v4498_v21 = vpop.eup %4497 }
 0x604   : > { %v1825_v22 = vsel %vm1314_vm3, %v4498_v21, 0.0 }
 0x605   : > { %1826 = vadd.xlane.f32.xlu0 %v1825_v22 }
 0x61b   : > { %1830 = vrot.lane.b32.xlu0 %v4857_v17, %s4582_s29 }
 0x692   : > { %v1827_v23 = vpop.xlane.xlu0 %1826 }
 0x693   : > { %4499 = vrcp.f32 %v1827_v23 }
 0x696   : > { %v1831_v24 = vpop.permute.xlu0 %1830 }
 0x697   : > { %4193 = vmatpush3.msra.mxu1 %v1831_v24 }
 0x698   : > { %4203 = vmatprep.subr.mxu1 %v4571_v2 }
 0x69d   : > { %v4500_v25 = vpop.eup %4499 }
 0x69e   : > { %v1829_v27 = vmul.f32 %v4500_v25, %v4498_v21 }
 0x6a0   : > { %4195 = vmatmul.mubr.msk.f32.vlgmr.msra.gmra.mrb[16].mxu1 %vm1314_vm3, %v1829_v27 }
 0x6a1   : > { %4204 = vmatpush3.xpose.msk.msra.mxu1 %vm1314_vm3, %v1958_v26  ;;  %4205 = vmatprep.mubr.msk.f32.mxu1 %vm4572_vm1, %v4571_v2 }
 0x6a2   : > { %4208 = vmatprep.subr.mxu1 %v4571_v2 }
 0x6a4   : > { %4206 = vmatmul.mubr.msk.f32.vlgmr.msra.gmra.mrb[18].mxu1 %vm1314_vm3, %v1956_v28 }
 0x6a5   : > { %4210 = vmatprep.mubr.msk.f32.mxu1 %vm4572_vm1, %v4571_v2 }
 0x773   : > { %v1902_v32 = vpop.f32.mrb[16].mxu1 }
 0x774   : > { %v1906_v33 = vpack.c.bf16 %v1902_v32, %v1902_v32  ;;  %v4196_v34 = vpop.f32.mrb[17].mxu1 }
 0x776   : > { %4200 = vmatmul.mubr.msk.bf16.vlgmr.msra.gmra.mrb[12].mxu0 %vm1314_vm3, %v1906_v33 }
 0x777   : > { %v2029_v35 = vpop.f32.mrb[18].mxu1  ;;  %4215 = vmatprep.mubr.msk.bf16.mxu0 %vm4572_vm1, %v4571_v2  ;;  %4214 = vmatpush3.bf16.msra.mxu0 %v2127_v55 }
 0x778   : > { %v2033_v36 = vmul.f32 0.35355338, %v2029_v35  ;;  %v4207_v37 = vpop.f32.mrb[19].mxu1  ;;  %4227 = vmatprep.subr.bf16.mxu0 %v4571_v2 }
 0x77a   : > { %v2034_v38 = vsel %vm1314_vm3, %v2033_v36, -inf }
 0x77b   : > { %2035 = vmax.xlane.f32.xlu0 %v2034_v38 }
 0x791   : > { %2045 = vrot.lane.b32.xlu0 %v4857_v17, %s4583_s4  ;;  %v1135_v17 = vrot.slane %v4940_v46, %v1134_v45  ;;  %s5308_s4 = sld [smem:[#allocation19_spill]] }
 0x793   : > { %v1187_v48 = vadd.f32 %v4848_v11, %v1135_v17  ;;  %v1190_v50 = vadd.f32 %v4850_v13, %v1135_v17 }
 0x795   : > { %v1193_v51 = vsel %vm1148_vm2, %v1187_v48, 0.0  ;;  %v1196_v52 = vsel %vm1148_vm2, %v1190_v50, 0.0 }
 0x808   : > { %v2036_v40 = vpop.xlane.xlu0 %2035 }
 0x809   : > { %v2037_v41 = vsub.f32 %v2033_v36, %v2036_v40  ;;  %v1228_v40 = vsub.s32 2, %v4935_v43 }
 0x80b   : > { %v2038_v42 = vmul.f32 1.442695, %v2037_v41  ;;  %v1229_v17 = vrot.slane %v4940_v46, %v1228_v40 }
 0x80c   : > { %v2046_v44 = vpop.permute.xlu0 %2045 }
 0x80d   : > { %4501 = vpow2.f32 %v2038_v42  ;;  %4209 = vmatpush3.msra.mxu1 %v2046_v44  ;;  %v1223_v42 = vrot.slane %v4940_v46, %v1222_v39  ;;  %v4584_v46 = vmov 0.0|0.0  }
 0x80e   : > { %4219 = vmatprep.subr.bf16.mxu1 %v4571_v2 }
 0x817   : > { %v4502_v47 = vpop.eup %4501 }
 0x818   : > { %v2040_v49 = vsel %vm1314_vm3, %v4502_v47, 0.0 }
 0x819   : > { %2041 = vadd.xlane.f32.xlu1 %v2040_v49 }
 0x81d   : > { %1194 = vadd.xlane.f32.xlu1 %v1193_v51 }
 0x821   : > { %1197 = vadd.xlane.f32.xlu1 %v1196_v52 }
 0x849   : > { %v1948_v56 = vpop.f32.mrb[12].mxu0 }
 0x84a   : > { %v1954_v11 = vadd.f32 %v1948_v56, %v4910_v6  ;;  %v4201_v57 = vpop.f32.mrb[13].mxu0 }
 0x84b   : > { %v1951_v58 = vpop.f32.mrb[14].mxu0 }
 0x84c   : > { %v4202_v13 = vpop.f32.mrb[15].mxu0 }
 0x84d   : > { %v5006_v13 = vld [vmem:[%s4805_s20] sm:$0x3f] }
 0x8a6   : > { %v2042_v59 = vpop.xlane.xlu1 %2041 }
 0x8a7   : > { %4503 = vrcp.f32 %v2042_v59  ;;  %v2195_v59 = vrot.slane %v5006_v13, %v1134_v45 }
 0x8aa   : > { %v1195_v4 = vpop.xlane.xlu1 %1194 }
 0x8ab   : > { %v1200_v5 = vmul.f32 0.03125, %v1195_v4 }
 0x8ad   : > { %v1202_v15 = vsub.f32 %v1187_v48, %v1200_v5 }
 0x8ae   : > { %v1198_v6 = vpop.xlane.xlu1 %1197 }
 0x8af   : > { %v1201_v16 = vmul.f32 0.03125, %v1198_v6  ;;  %v1204_v23 = vmul.f32 %v1202_v15, %v1202_v15 }
 0x8b1   : > { %v4504_v60 = vpop.eup %4503  ;;  %v1203_v21 = vsub.f32 %v1190_v50, %v1201_v16  ;;  %v1206_v24 = vsel %vm1148_vm2, %v1204_v23, 0.0 }
 0x8b2   : > { %v2044_v61 = vmul.f32 %v4504_v60, %v4502_v47 }
 0x8b3   : > { %v1205_v25 = vmul.f32 %v1203_v21, %v1203_v21 }
 0x8b4   : > { %4211 = vmatmul.mubr.msk.f32.vlgmr.msra.gmra.mrb[20].mxu1 %vm1314_vm3, %v2044_v61  ;;  %v2200_v61 = vrot.slane %v5006_v13, %v1222_v39 }
 0x8b5   : > { %4223 = vmatprep.mubr.msk.bf16.mxu1 %vm4572_vm1, %v4571_v2  ;;  %4220 = vmatpush3.bf16.msra.mxu1 %v4475_v1  ;;  %v1209_v26 = vsel %vm1148_vm2, %v1205_v25, 0.0 }
 0x8b6   : > { %4221 = vmatprep.subr.bf16.mxu1 %v4571_v2 }
 0x8b9   : > { %4222 = vmatpush3.bf16.msra.mxu1 %v4963_v3 }
 0x8ba   : > { %4235 = vmatprep.subr.bf16.mxu1 %v4571_v2 }
 0x987   : > { %v2117_v62 = vpop.f32.mrb[20].mxu1 }
 0x988   : > { %v2121_v63 = vpack.c.bf16 %v2117_v62, %v2117_v62  ;;  %v4212_v0 = vpop.f32.mrb[21].mxu1 }
 0x98a   : > { %4216 = vmatmul.mubr.msk.bf16.vlgmr.msra.gmra.mrb[16].mxu0 %vm1314_vm3, %v2121_v63 }
 0x98b   : > { %4231 = vmatprep.mubr.msk.bf16.mxu0 %vm4572_vm1, %v4571_v2 }
 0xa5d   : > { %v2163_v8 = vpop.f32.mrb[16].mxu0 }
 0xa5e   : > { %v2169_v10 = vadd.f32 %v2163_v8, %v1954_v11  ;;  %v4217_v12 = vpop.f32.mrb[17].mxu0 }
 0xa5f   : > { %v2166_v14 = vpop.f32.mrb[18].mxu0 }
 0xa60   : > { %v2176_v18 = vadd.f32 %v3998_v7, %v2169_v10  ;;  %v4218_v19 = vpop.f32.mrb[19].mxu0 }
 0xa62   : > { %v2177_v20 = vadd.f32 %v2176_v18, %v4836_v9  ;;  %v4984_v9 = vld [vmem:[%s5299_s15] ss:$0 sm:$0xff] }
 0xa64   : > { %v2178_v22 = vsel %vm1148_vm2, %v2177_v20, 0.0 }
 0xa65   : > { %2179 = vadd.xlane.f32.xlu1 %v2178_v22 }
 0xa69   : > { %1207 = vadd.xlane.f32.xlu1 %v1206_v24 }
 0xa6d   : > { %1210 = vadd.xlane.f32.xlu1 %v1209_v26 }
 0xa7e   : > { %2270 = vrot.lane.b32.xlu1 %v4475_v1, %s4574_s25 }
 0xa82   : > { %2272 = vrot.lane.b32.xlu1 %v4963_v3, %s4574_s25 }
 0xa86   : > { %2276 = vrot.lane.b32.xlu1 %v4984_v9, %s4574_s25  ;;  %s5304_s25 = sld [smem:[#allocation25_spill]] }
 0xa8a   : > { %2323 = vrot.lane.b32.xlu1 %v4475_v1, %s4577_s28 }
 0xa8c   : > { %s5305_s27 = scalar_lea.vmem %s5304_s25, %s4725_s26 }
 0xaf2   : > { %v2180_v27 = vpop.xlane.xlu1 %2179 }
 0xaf3   : > { %v2182_v28 = vmul.f32 0.03125, %v2180_v27 }
 0xaf5   : > { %v2183_v29 = vsub.f32 %v2177_v20, %v2182_v28 }
 0xaf6   : > { %v1208_v30 = vpop.xlane.xlu1 %1207 }
 0xaf7   : > { %v1212_v31 = vmul.f32 0.03125, %v1208_v30  ;;  %v2184_v32 = vmul.f32 %v2183_v29, %v2183_v29 }
 0xaf9   : > { %v1214_v33 = vadd.f32 1e-05, %v1212_v31  ;;  %v2185_v34 = vsel %vm1148_vm2, %v2184_v32, 0.0 }
 0xafa   : > { %2186 = vadd.xlane.f32.xlu0 %v2185_v34  ;;  %v1211_v35 = vpop.xlane.xlu1 %1210 }
 0xafb   : > { %4505 = vrsqrt.f32 %v1214_v33  ;;  %v1213_v36 = vmul.f32 0.03125, %v1211_v35 }
 0xafd   : > { %v1215_v37 = vadd.f32 1e-05, %v1213_v36 }
 0xafe   : > { %v2271_v38 = vpop.permute.xlu1 %2270 }
 0xaff   : > { %4507 = vrsqrt.f32 %v1215_v37  ;;  %4228 = vmatpush3.bf16.msra.mxu0 %v2271_v38 }
 0xb00   : > { %4229 = vmatprep.subr.bf16.mxu0 %v4571_v2 }
 0xb02   : > { %v2273_v41 = vpop.permute.xlu1 %2272 }
 0xb03   : > { %4230 = vmatpush3.bf16.msra.mxu0 %v2273_v41 }
 0xb04   : > { %4359 = vmatprep.subr.bf16.mxu0 %v4584_v46 }
 0xb05   : > { %v4506_v44 = vpop.eup %4505 }
 0xb06   : > { %v1218_v47 = vmul.f32 %v4506_v44, %v1202_v15  ;;  %v2277_v63 = vpop.permute.xlu1 %2276 }
 0xb08   : > { %v1224_v48 = vmul.f32 %v1223_v42, %v1218_v47 }
 0xb09   : > { %v4508_v49 = vpop.eup %4507 }
 0xb0a   : > { %v1230_v50 = vadd.f32 %v1229_v17, %v1224_v48  ;;  %v1219_v51 = vmul.f32 %v4508_v49, %v1203_v21  ;;  %v2324_v4 = vpop.permute.xlu1 %2323 }
 0xb0c   : > { %1232 = vst.msk [vmem:[#allocation3] sm:$0xff] %vm1148_vm2, %v1230_v50  ;;  %v1225_v52 = vmul.f32 %v1223_v42, %v1219_v51 }
 0xb0e   : > { %v1231_v53 = vadd.f32 %v1229_v17, %v1225_v52 }
 0xb10   : > { %1233 = vst.msk [vmem:[#allocation3 + $0x8] sm:$0xff] %vm1148_vm2, %v1231_v53  ;;  %2325 = vrot.lane.b32.xlu0 %v4963_v3, %s4577_s28 }
 0xb13   : > { %v1235_v54 = vld [vmem:[#allocation3] sm:$0xff] }
 0xb17   : > { %v1236_v55 = vld [vmem:[#allocation3 + $0x8] sm:$0xff] }
 0xb18   : > { %v2269_v56 = vpack.c.bf16 %v1236_v55, %v1235_v54 }
 0xb1a   : > { %4232 = vmatmul.mubr.msk.bf16.vlgmr.msra.gmra.mrb[20].mxu0 %vm1148_vm2, %v2269_v56 }
 0xb1b   : > { %4247 = vmatprep.mubr.msk.f32.mxu0 %vm4572_vm1, %v4571_v2 }
 0xb87   : > { %v2187_v11 = vpop.xlane.xlu0 %2186 }
 0xb88   : > { %v2188_v57 = vmul.f32 0.03125, %v2187_v11 }
 0xb8a   : > { %v2189_v58 = vadd.f32 1e-05, %v2188_v57 }
 0xb8b   : > { %v2326_v5 = vpop.permute.xlu0 %2325 }
 0xb8c   : > { %4509 = vrsqrt.f32 %v2189_v58 }
 0xb96   : > { %v4510_v60 = vpop.eup %4509 }
 0xb97   : > { %v2191_v62 = vmul.f32 %v4510_v60, %v2183_v29 }
 0xb99   : > { %v2196_v0 = vmul.f32 %v2195_v59, %v2191_v62  ;;  %v2374_v59 = vld [vmem:[%s4775_s24 + $0x8] sm:$0xff] }
 0xb9a   : > { %v2723_v60 = vpack.c.bf16 %v2374_v59, %v2374_v59  ;;  %v2375_v59 = vld [vmem:[%s4775_s24 + $0x10] sm:$0xff] }
 0xb9b   : > { %v5012_v1 = vadd.f32 %v2200_v61, %v2196_v0 }
 0xb9c   : > { %v2728_v61 = vsel %vm1650_vm4, %v2723_v60, 0  ;;  %v2991_v60 = vpack.c.bf16 %v2375_v59, %v2375_v59 }
 0xb9d   : > { %v2207_v3 = vpack.c.bf16 %v5012_v1, %v5012_v1 }
 0xb9f   : > { %4224 = vmatmul.mubr.msk.bf16.vlgmr.msra.gmra.mrb[24].mxu1 %vm1148_vm2, %v2207_v3 }
 0xba0   : > { %4236 = vmatpush3.bf16.msra.mxu1 %v2324_v4  ;;  %4239 = vmatprep.mubr.msk.bf16.mxu1 %vm4572_vm1, %v4571_v2  ;;  %v2373_v4 = vld [vmem:[%s4775_s24] sm:$0xff] }
 0xba1   : > { %4237 = vmatprep.subr.bf16.mxu1 %v4571_v2 }
 0xba4   : > { %4238 = vmatpush3.bf16.msra.mxu1 %v2326_v5 }
 0xba5   : > { %4366 = vmatprep.subr.bf16.mxu1 %v4584_v46 }
 0xba7   : > { %4240 = vmatmul.mubr.msk.bf16.vlgmr.msra.gmra.mrb[28].mxu1 %vm1148_vm2, %v2269_v56 }
 0xba8   : > { %4261 = vmatprep.mubr.msk.f32.mxu1 %vm4572_vm1, %v4571_v2 }
 0xbed   : > { %v2316_v45 = vpop.f32.mrb[20].mxu0 }
 0xbee   : > { %v4233_v6 = vpop.f32.mrb[21].mxu0  ;;  %v2317_v8 = vadd.f32 %v2316_v45, %v2277_v63  ;;  %v2545_v45 = vpack.c.bf16 %v2373_v4, %v2373_v4 }
 0xbef   : > { %v2319_v7 = vpop.f32.mrb[22].mxu0 }
 0xbf0   : > { %v2320_v10 = vadd.f32 %v2319_v7, %v2277_v63  ;;  %v4234_v12 = vpop.f32.mrb[23].mxu0 }
 0xbf2   : > { %v4360_v15 = vpack.c.bf16 %v2320_v10, %v2317_v8  ;;  %v5030_v16 = vpack.i.bf16 %v2320_v10, %v2317_v8  ;;  %v2774_v8 = vsel %vm1650_vm4, %v2545_v45, 0 }
 0xbf4   : > { %4442 = vrot.lane.b32.xlu1 %v5030_v16, %s4573_s2  ;;  %4362 = vmatpush3.bf16.xpose.msk.msra.mxu0 %vm5026_vm5, %v4360_v15 }
 0xbf5   : > { %4363 = vmatprep.subr.bf16.mxu0 %v4584_v46 }
 0xc66   : > { %v4443_v18 = vpop.permute.xlu1 %4442 }
 0xc67   : > { %v4445_v19 = vunpack.i.h.bf16 %v4443_v18  ;;  %v4444_v20 = vunpack.i.l.bf16 %v4443_v18 }
 0xc69   : > { %v4367_v21 = vpack.c.bf16 %v4445_v19, %v4444_v20 }
 0xc6b   : > { %4369 = vmatpush3.bf16.xpose.msk.msra.mxu1 %vm5026_vm5, %v4367_v21 }
 0xc6c   : > { %4271 = vmatprep.subr.bf16.mxu1 %v4571_v2 }
 0xc72   : > { %v2263_v22 = vpop.f32.mrb[24].mxu1 }
 0xc73   : > { %v5041_v23 = vadd.f32 %v4984_v9, %v2263_v22  ;;  %v4225_v24 = vpop.f32.mrb[25].mxu1 }
 0xc74   : > { %v2266_v25 = vpop.f32.mrb[26].mxu1 }
 0xc75   : > { %v4226_v26 = vpop.f32.mrb[27].mxu1  ;;  %2546 = vrot.lane.b32.xlu1 %v5041_v23, %s4573_s2  ;;  %4248 = vmatmul.mubr.msk.f32.vlgmr.msra.gmra.mrb[10].mxu0 %vm1314_vm3, %v5041_v23 }
 0xc76   : > { %4254 = vmatprep.mubr.msk.f32.mxu0 %vm4572_vm1, %v4571_v2 }
 0xc7a   : > { %v2366_v27 = vpop.f32.mrb[28].mxu1 }
 0xc7b   : > { %v4241_v28 = vpop.f32.mrb[29].mxu1 }
 0xc7c   : > { %v2369_v29 = vpop.f32.mrb[30].mxu1 }
 0xc7d   : > { %v4242_v30 = vpop.f32.mrb[31].mxu1 }
 0xce7   : > { %v2547_v31 = vpop.permute.xlu1 %2546 }
 0xce8   : > { %4262 = vmatmul.mubr.msk.f32.vlgmr.msra.gmra.mrb[22].mxu1 %vm1314_vm3, %v2547_v31 }
 0xce9   : > { %4273 = vmatprep.mubr.msk.bf16.mxu1 %vm4572_vm1, %v4571_v2  ;;  %4272 = vmatpush3.bf16.msra.mxu1 %v2728_v61  ;;  %v2996_v61 = vsel %vm1650_vm4, %v2991_v60, 0 }
 0xcea   : > { %4373 = vmatprep.subr.bf16.mxu1 %v4584_v46 }
 0xd48   : > { %v2453_v32 = vpop.f32.mrb[10].mxu0 }
 0xd49   : > { %v5052_v33 = vmul.f32 0.35355338, %v2453_v32  ;;  %v4249_v34 = vpop.f32.mrb[11].mxu0 }
 0xd4b   : > { %v2460_v35 = vsel %vm2459_vm6, %v5052_v33, -inf }
 0xd4c   : > { %2461 = vmax.xlane.f32.xlu1 %v2460_v35 }
 0xd5d   : > { %2329 = vrot.lane.b32.xlu1 %v4984_v9, %s4577_s28 }
 0xd61   : > { %4452 = vrot.lane.b32.xlu1 %v5030_v16, %s4579_s19 }
 0xd65   : > { %2816 = vrot.lane.b32.xlu1 %v5041_v23, %s4579_s19 }
 0xdbb   : > { %v2624_v36 = vpop.f32.mrb[22].mxu1 }
 0xdbc   : > { %v5062_v37 = vmul.f32 0.35355338, %v2624_v36  ;;  %v4263_v38 = vpop.f32.mrb[23].mxu1 }
 0xdbe   : > { %v2630_v39 = vsel %vm2459_vm6, %v5062_v37, -inf }
 0xdbf   : > { %2631 = vmax.xlane.f32.xlu0 %v2630_v39 }
 0xdd9   : > { %v2462_v41 = vpop.xlane.xlu1 %2461 }
 0xdda   : > { %v2463_v42 = vsub.f32 %v5052_v33, %v2462_v41 }
 0xddc   : > { %v2464_v44 = vmul.f32 1.442695, %v2463_v42 }
 0xddd   : > { %v2330_v17 = vpop.permute.xlu1 %2329 }
 0xdde   : > { %4511 = vpow2.f32 %v2464_v44  ;;  %v2367_v9 = vadd.f32 %v2366_v27, %v2330_v17  ;;  %v2370_v47 = vadd.f32 %v2369_v29, %v2330_v17 }
 0xde0   : > { %v4364_v48 = vpack.c.bf16 %v2370_v47, %v2367_v9  ;;  %v5067_v49 = vpack.i.bf16 %v2370_v47, %v2367_v9 }
 0xde1   : > { %v4453_v18 = vpop.permute.xlu1 %4452 }
 0xde2   : > { %4365 = vmatpush3.bf16.msra.mxu0 %v4364_v48  ;;  %v4455_v19 = vunpack.i.h.bf16 %v4453_v18  ;;  %v4454_v20 = vunpack.i.l.bf16 %v4453_v18 }
 0xde3   : > { %4370 = vmatprep.subr.bf16.mxu0 %v4584_v46 }
 0xde4   : > { %v4374_v25 = vpack.c.bf16 %v4455_v19, %v4454_v20 }
 0xde5   : > { %v2817_v26 = vpop.permute.xlu1 %2816 }
 0xde8   : > { %v4512_v50 = vpop.eup %4511 }
 0xde9   : > { %v2466_v51 = vsel %vm2459_vm6, %v4512_v50, 0.0 }
 0xdea   : > { %2467 = vadd.xlane.f32.xlu0 %v2466_v51 }
 0xe4c   : > { %v2632_v52 = vpop.xlane.xlu0 %2631 }
 0xe4d   : > { %v2633_v53 = vsub.f32 %v5062_v37, %v2632_v52 }
 0xe4f   : > { %v2634_v54 = vmul.f32 1.442695, %v2633_v53 }
 0xe51   : > { %4513 = vpow2.f32 %v2634_v54 }
 0xe5b   : > { %v4514_v55 = vpop.eup %4513 }
 0xe5c   : > { %v2636_v56 = vsel %vm2459_vm6, %v4514_v55, 0.0 }
 0xe5d   : > { %2637 = vadd.xlane.f32.xlu0 %v2636_v56 }
 0xe73   : > { %4447 = vrot.lane.b32.xlu0 %v5067_v49, %s4573_s2 }
 0xe77   : > { %v2468_v11 = vpop.xlane.xlu0 %2467 }
 0xe78   : > { %4515 = vrcp.f32 %v2468_v11 }
 0xe82   : > { %v4516_v57 = vpop.eup %4515 }
 0xe83   : > { %v2470_v58 = vmul.f32 %v4516_v57, %v4512_v50 }
 0xe85   : > { %4255 = vmatmul.mubr.msk.f32.vlgmr.msra.gmra.mrb[24].mxu0 %vm2459_vm6, %v2470_v58 }
 0xe86   : > { %4268 = vmatprep.mubr.msk.f32.mxu0 %vm4572_vm1, %v4571_v2 }
 0xeea   : > { %v2638_v62 = vpop.xlane.xlu0 %2637 }
 0xeeb   : > { %4517 = vrcp.f32 %v2638_v62 }
 0xeee   : > { %v4448_v63 = vpop.permute.xlu0 %4447 }
 0xeef   : > { %v4450_v0 = vunpack.i.h.bf16 %v4448_v63  ;;  %v4449_v3 = vunpack.i.l.bf16 %v4448_v63 }
 0xef1   : > { %v4371_v5 = vpack.c.bf16 %v4450_v0, %v4449_v3  ;;  %v2629_v0 = vadd.f32 %v5062_v37, %v5052_v33 }
 0xef3   : > { %4372 = vmatpush3.bf16.msra.mxu0 %v4371_v5 }
 0xef4   : > { %4277 = vmatprep.subr.bf16.mxu0 %v4571_v2 }
 0xef5   : > { %v4518_v6 = vpop.eup %4517 }
 0xef6   : > { %v2640_v7 = vmul.f32 %v4518_v6, %v4514_v55 }
 0xef8   : > { %4269 = vmatmul.mubr.msk.f32.vlgmr.msra.gmra.mrb[26].mxu0 %vm2459_vm6, %v2640_v7 }
 0xef9   : > { %4278 = vmatpush3.bf16.msra.mxu0 %v2774_v8  ;;  %4279 = vmatprep.mubr.msk.bf16.mxu0 %vm4572_vm1, %v4571_v2 }
 0xefa   : > { %4377 = vmatprep.subr.bf16.mxu0 %v4584_v46 }
 0xf58   : > { %v2540_v10 = vpop.f32.mrb[24].mxu0 }
 0xf59   : > { %v2544_v12 = vpack.c.bf16 %v2540_v10, %v2540_v10  ;;  %v4256_v15 = vpop.f32.mrb[25].mxu0 }
 0xf5b   : > { %4280 = vmatmul.mubr.msk.bf16.vlgmr.msra.gmra.mrb[28].mxu0 %vm1314_vm3, %v2544_v12 }
 0xf5c   : > { %4294 = vmatprep.mubr.msk.f32.mxu0 %vm4572_vm1, %v4571_v2 }
 0xfcb   : > { %v2718_v21 = vpop.f32.mrb[26].mxu0 }
 0xfcc   : > { %v2722_v22 = vpack.c.bf16 %v2718_v21, %v2718_v21  ;;  %v4270_v24 = vpop.f32.mrb[27].mxu0 }
 0xfce   : > { %4274 = vmatmul.mubr.msk.bf16.vlgmr.msra.gmra.mrb[32].mxu1 %vm1314_vm3, %v2722_v22 }
 0xfcf   : > { %4376 = vmatpush3.bf16.xpose.msk.msra.mxu1 %vm5026_vm5, %v4374_v25  ;;  %4287 = vmatprep.mubr.msk.f32.mxu1 %vm4572_vm1, %v4571_v2 }
 0xfd0   : > { %4297 = vmatprep.subr.bf16.mxu1 %v4571_v2 }
 0xfd6   : > { %4288 = vmatmul.mubr.msk.f32.vlgmr.msra.gmra.mrb[36].mxu1 %vm1314_vm3, %v2817_v26 }
 0xfd7   : > { %4299 = vmatprep.mubr.msk.bf16.mxu1 %vm4572_vm1, %v4571_v2  ;;  %4298 = vmatpush3.bf16.msra.mxu1 %v2996_v61  ;;  %v3291_v61 = vsub.s32 3, %v4935_v43 }
 0xfd8   : > { %4384 = vmatprep.subr.bf16.mxu1 %v4584_v46 }
0x102e   : > { %v2810_v27 = vpop.f32.mrb[28].mxu0 }
0x102f   : > { %v4281_v28 = vpop.f32.mrb[29].mxu0 }
0x1030   : > { %v2813_v29 = vpop.f32.mrb[30].mxu0 }
0x1031   : > { %v4282_v30 = vpop.f32.mrb[31].mxu0  ;;  %v2376_v29 = vld [vmem:[%s4775_s24 + $0x18] sm:$0xff]  ;;  %s5303_s24 = sld [smem:[#allocation13_spill]] }
0x1032   : > { %v3214_v30 = vpack.c.bf16 %v2376_v29, %v2376_v29 }
0x10a1   : > { %v2764_v31 = vpop.f32.mrb[32].mxu1 }
0x10a2   : > { %v5100_v32 = vadd.f32 %v2810_v27, %v2764_v31  ;;  %v4275_v34 = vpop.f32.mrb[33].mxu1  ;;  %v3219_v31 = vsel %vm1650_vm4, %v3214_v30, 0  ;;  %v4487_v30 = vld [vmem:[%s5307_s21] sm:$0xff]  }
0x10a3   : > { %v2767_v35 = vpop.f32.mrb[34].mxu1 }
0x10a4   : > { %v4276_v36 = vpop.f32.mrb[35].mxu1 }
0x10a5   : > { %v4025_v36 = vld [vmem:[%s5302_s22] ss:$0 sm:$0xff] }
0x10a9   : > { %v2894_v38 = vpop.f32.mrb[36].mxu1 }
0x10aa   : > { %v2898_v39 = vmul.f32 0.35355338, %v2894_v38  ;;  %v4289_v41 = vpop.f32.mrb[37].mxu1 }
0x10ac   : > { %v2900_v42 = vsel %vm2459_vm6, %v2898_v39, -inf  ;;  %v2899_v4 = vadd.f32 %v2898_v39, %v2629_v0  ;;  %v3292_v0 = vrot.slane %v5006_v13, %v3291_v61 }
0x10ad   : > { %2901 = vmax.xlane.f32.xlu1 %v2900_v42 }
0x10be   : > { %4457 = vrot.lane.b32.xlu1 %v5067_v49, %s4579_s19 }
0x10c2   : > { %3039 = vrot.lane.b32.xlu1 %v5041_v23, %s4581_s5 }
0x113a   : > { %v2902_v44 = vpop.xlane.xlu1 %2901 }
0x113b   : > { %v2903_v17 = vsub.f32 %v2898_v39, %v2902_v44 }
0x113d   : > { %v2904_v9 = vmul.f32 1.442695, %v2903_v17 }
0x113e   : > { %v4458_v47 = vpop.permute.xlu1 %4457 }
0x113f   : > { %4519 = vpow2.f32 %v2904_v9  ;;  %v4460_v48 = vunpack.i.h.bf16 %v4458_v47  ;;  %v4459_v50 = vunpack.i.l.bf16 %v4458_v47 }
0x1141   : > { %v4378_v51 = vpack.c.bf16 %v4460_v48, %v4459_v50 }
0x1143   : > { %4379 = vmatpush3.bf16.msra.mxu0 %v4378_v51 }
0x1144   : > { %4380 = vmatprep.subr.bf16.mxu0 %v4584_v46 }
0x1149   : > { %v4520_v52 = vpop.eup %4519 }
0x114a   : > { %v2906_v53 = vsel %vm2459_vm6, %v4520_v52, 0.0 }
0x114b   : > { %2907 = vadd.xlane.f32.xlu0 %v2906_v53 }
0x1161   : > { %4462 = vrot.lane.b32.xlu0 %v5030_v16, %s4581_s5  ;;  %v3040_v16 = vpop.permute.xlu1 %3039 }
0x11d8   : > { %v2908_v23 = vpop.xlane.xlu0 %2907 }
0x11d9   : > { %4521 = vrcp.f32 %v2908_v23  ;;  %v4477_v23 = vld [vmem:[%s5303_s24] sm:$0xff]  }
0x11dc   : > { %v4463_v54 = vpop.permute.xlu0 %4462 }
0x11dd   : > { %v4465_v55 = vunpack.i.h.bf16 %v4463_v54  ;;  %v4464_v56 = vunpack.i.l.bf16 %v4463_v54  ;;  %v4478_v54 = vld [vmem:[%s5303_s24 + $0x8] sm:$0xff]  }
0x11df   : > { %v4381_v58 = vpack.c.bf16 %v4465_v55, %v4464_v56  ;;  %v4480_v55 = vld [vmem:[%s4794_s30 + $0x8] sm:$0xff]   ;;  %v4481_v56 = vld [vmem:[%s4794_s30 + $0x10] sm:$0xff]  }
0x11e3   : > { %v4522_v11 = vpop.eup %4521 }
0x11e4   : > { %v2910_v57 = vmul.f32 %v4522_v11, %v4520_v52  ;;  %v4482_v11 = vld [vmem:[%s4794_s30 + $0x18] sm:$0xff]  }
0x11e6   : > { %4295 = vmatmul.mubr.msk.f32.vlgmr.msra.gmra.mrb[32].mxu0 %vm2459_vm6, %v2910_v57  ;;  %v4483_v57 = vld [vmem:[%s4794_s30 + $0x20] sm:$0xff]  }
0x11e7   : > { %4383 = vmatpush3.bf16.xpose.msk.msra.mxu0 %vm5026_vm5, %v4381_v58  ;;  %4307 = vmatprep.mubr.msk.f32.mxu0 %vm4572_vm1, %v4571_v2  ;;  %v4484_v58 = vld [vmem:[%s4794_s30 + $0x28] sm:$0xff]  }
0x11e8   : > { %4317 = vmatprep.subr.bf16.mxu0 %v4571_v2 }
0x11ee   : > { %4308 = vmatmul.mubr.msk.f32.vlgmr.msra.gmra.mrb[34].mxu0 %vm1314_vm3, %v3040_v16 }
0x11ef   : > { %4319 = vmatprep.mubr.msk.bf16.mxu0 %vm4572_vm1, %v4571_v2  ;;  %4318 = vmatpush3.bf16.msra.mxu0 %v3219_v31  ;;  %v4488_v31 = vld [vmem:[%s5307_s21 + $0x8] sm:$0xff]  }
0x11f0   : > { %4331 = vmatprep.subr.bf16.mxu0 %v4571_v2 }
0x12b9   : > { %v2986_v14 = vpop.f32.mrb[32].mxu0 }
0x12ba   : > { %v2990_v62 = vpack.c.bf16 %v2986_v14, %v2986_v14  ;;  %v4296_v63 = vpop.f32.mrb[33].mxu0  ;;  %v3287_v14 = vrot.slane %v5006_v13, %v1228_v40  ;;  %v4026_v40 = vld [vmem:[%s5305_s27] ss:$0 sm:$0xff] }
0x12bc   : > { %4300 = vmatmul.mubr.msk.bf16.vlgmr.msra.gmra.mrb[40].mxu1 %vm1314_vm3, %v2990_v62 }
0x12bd   : > { %4314 = vmatprep.mubr.msk.f32.mxu1 %vm4572_vm1, %v4571_v2 }
0x12c1   : > { %v3117_v3 = vpop.f32.mrb[34].mxu0 }
0x12c2   : > { %v3121_v5 = vmul.f32 0.35355338, %v3117_v3  ;;  %v4309_v45 = vpop.f32.mrb[35].mxu0 }
0x12c3   : > { %v4485_v45 = vld [vmem:[%s4794_s30 + $0x30] sm:$0xff]  }
0x12c4   : > { %v3122_v6 = vadd.f32 %v3121_v5, %v2899_v4  ;;  %v3123_v7 = vsel %vm2459_vm6, %v3121_v5, -inf }
0x12c5   : > { %3124 = vmax.xlane.f32.xlu1 %v3123_v7 }
0x12c6   : > { %v3269_v46 = vmul.f32 0.25, %v3122_v6  ;;  %v4486_v6 = vld [vmem:[%s4794_s30 + $0x38] sm:$0xff]  }
0x12c8   : > { %3569 = vst.msk [vmem:[%s4815_s16] sm:$0xff] %vm2459_vm6, %v3269_v46 }
0x12d6   : > { %4467 = vrot.lane.b32.xlu1 %v5067_v49, %s4581_s5 }
0x1352   : > { %v3125_v8 = vpop.xlane.xlu1 %3124 }
0x1353   : > { %v3126_v10 = vsub.f32 %v3121_v5, %v3125_v8 }
0x1355   : > { %v3127_v12 = vmul.f32 1.442695, %v3126_v10 }
0x1356   : > { %v4468_v15 = vpop.permute.xlu1 %4467 }
0x1357   : > { %4523 = vpow2.f32 %v3127_v12  ;;  %v4470_v33 = vunpack.i.h.bf16 %v4468_v15  ;;  %v4469_v37 = vunpack.i.l.bf16 %v4468_v15 }
0x1359   : > { %v4385_v18 = vpack.c.bf16 %v4470_v33, %v4469_v37 }
0x135b   : > { %4386 = vmatpush3.bf16.msra.mxu1 %v4385_v18  ;;  %v4038_v18 = vld [vmem:[%s5306_s6] ss:$0 sm:$0xff] }
0x135c   : > { %4323 = vmatprep.subr.bf16.mxu1 %v4571_v2 }
0x1361   : > { %v4524_v19 = vpop.eup %4523 }
0x1362   : > { %v3129_v20 = vsel %vm2459_vm6, %v4524_v19, 0.0 }
0x1363   : > { %3130 = vadd.xlane.f32.xlu0 %v3129_v20 }
0x138f   : > { %v3032_v21 = vpop.f32.mrb[40].mxu1 }
0x1390   : > { %v3038_v22 = vadd.f32 %v3032_v21, %v5100_v32  ;;  %v4301_v49 = vpop.f32.mrb[41].mxu1 }
0x1391   : > { %v3035_v24 = vpop.f32.mrb[42].mxu1 }
0x1392   : > { %v4302_v25 = vpop.f32.mrb[43].mxu1 }
0x13f0   : > { %v3131_v26 = vpop.xlane.xlu0 %3130 }
0x13f1   : > { %4525 = vrcp.f32 %v3131_v26 }
0x13fb   : > { %v4526_v27 = vpop.eup %4525 }
0x13fc   : > { %v3133_v28 = vmul.f32 %v4526_v27, %v4524_v19 }
0x13fe   : > { %4315 = vmatmul.mubr.msk.f32.vlgmr.msra.gmra.mrb[38].mxu1 %vm2459_vm6, %v3133_v28 }
0x13ff   : > { %4327 = vmatprep.mubr.msk.bf16.mxu1 %vm4572_vm1, %v4571_v2  ;;  %4324 = vmatpush3.bf16.msra.mxu1 %v4477_v23 }
0x1400   : > { %4325 = vmatprep.subr.bf16.mxu1 %v4571_v2 }
0x1403   : > { %4326 = vmatpush3.bf16.msra.mxu1 %v4478_v54 }
0x1404   : > { %4351 = vmatprep.subr.bf16.mxu1 %v4571_v2 }
0x14d1   : > { %v3209_v32 = vpop.f32.mrb[38].mxu1 }
0x14d2   : > { %v3213_v34 = vpack.c.bf16 %v3209_v32, %v3209_v32  ;;  %v4316_v35 = vpop.f32.mrb[39].mxu1 }
0x14d4   : > { %4320 = vmatmul.mubr.msk.bf16.vlgmr.msra.gmra.mrb[36].mxu0 %vm1314_vm3, %v3213_v34 }
0x14d5   : > { %4347 = vmatprep.mubr.msk.bf16.mxu0 %vm4572_vm1, %v4571_v2 }
0x15a7   : > { %v3255_v38 = vpop.f32.mrb[36].mxu0 }
0x15a8   : > { %v3261_v39 = vadd.f32 %v3255_v38, %v3038_v22  ;;  %v4321_v41 = vpop.f32.mrb[37].mxu0  ;;  %v3496_v38 = vsub.s32 5, %v4935_v43 }
0x15a9   : > { %v3258_v42 = vpop.f32.mrb[38].mxu0 }
0x15aa   : > { %v3268_v44 = vadd.f32 %v4025_v36, %v3261_v39  ;;  %v4322_v17 = vpop.f32.mrb[39].mxu0  ;;  %v3491_v36 = vsub.s32 4, %v4935_v43 }
0x15ac   : > { %v3270_v9 = vadd.f32 %v3268_v44, %v5012_v1  ;;  %v4479_v1 = vld [vmem:[%s4794_s30] sm:$0xff]   ;;  %v3492_v39 = vrot.slane %v5006_v13, %v3491_v36 }
0x15ad   : > { %4332 = vmatpush3.bf16.msra.mxu0 %v4479_v1 }
0x15ae   : > { %v3271_v47 = vsel %vm1148_vm2, %v3270_v9, 0.0  ;;  %4333 = vmatprep.subr.bf16.mxu0 %v4571_v2 }
0x15af   : > { %3272 = vadd.xlane.f32.xlu0 %v3271_v47  ;;  %v4039_v47 = vld [vmem:[%s5308_s4] ss:$0 sm:$0xff] }
0x15b1   : > { %4334 = vmatpush3.bf16.msra.mxu0 %v4480_v55 }
0x15b2   : > { %4335 = vmatprep.subr.bf16.mxu0 %v4571_v2 }
0x15b5   : > { %4336 = vmatpush3.bf16.msra.mxu0 %v4481_v56 }
0x15b6   : > { %4337 = vmatprep.subr.bf16.mxu0 %v4571_v2 }
0x15b9   : > { %4338 = vmatpush3.bf16.msra.mxu0 %v4482_v11 }
0x15ba   : > { %4339 = vmatprep.subr.bf16.mxu0 %v4571_v2 }
0x15bd   : > { %4340 = vmatpush3.bf16.msra.mxu0 %v4483_v57 }
0x15be   : > { %4341 = vmatprep.subr.bf16.mxu0 %v4571_v2 }
0x15c1   : > { %4342 = vmatpush3.bf16.msra.mxu0 %v4484_v58 }
0x15c2   : > { %4343 = vmatprep.subr.bf16.mxu0 %v4571_v2 }
0x15c5   : > { %4344 = vmatpush3.bf16.msra.mxu0 %v4485_v45 }
0x15c6   : > { %4345 = vmatprep.subr.bf16.mxu0 %v4571_v2 }
0x15c9   : > { %4346 = vmatpush3.bf16.msra.mxu0 %v4486_v6 }
0x163c   : > { %v3273_v48 = vpop.xlane.xlu0 %3272 }
0x163d   : > { %v3274_v50 = vmul.f32 0.03125, %v3273_v48 }
0x163f   : > { %v3275_v51 = vsub.f32 %v3270_v9, %v3274_v50 }
0x1641   : > { %v3276_v52 = vmul.f32 %v3275_v51, %v3275_v51 }
0x1643   : > { %v3277_v53 = vsel %vm1148_vm2, %v3276_v52, 0.0 }
0x1644   : > { %3278 = vadd.xlane.f32.xlu0 %v3277_v53 }
0x16d1   : > { %v3279_v16 = vpop.xlane.xlu0 %3278 }
0x16d2   : > { %v3280_v59 = vmul.f32 0.03125, %v3279_v16 }
0x16d4   : > { %v3281_v60 = vadd.f32 1e-05, %v3280_v59 }
0x16d6   : > { %4527 = vrsqrt.f32 %v3281_v60 }
0x16e0   : > { %v4528_v62 = vpop.eup %4527 }
0x16e1   : > { %v3283_v63 = vmul.f32 %v4528_v62, %v3275_v51 }
0x16e3   : > { %v3288_v3 = vmul.f32 %v3287_v14, %v3283_v63 }
0x16e5   : > { %v3293_v4 = vadd.f32 %v3292_v0, %v3288_v3 }
0x16e7   : > { %v3298_v5 = vpack.c.bf16 %v3293_v4, %v3293_v4 }
0x16e9   : > { %4328 = vmatmul.mubr.msk.bf16.vlgmr.msra.gmra.mrb[44].mxu1 %vm1148_vm2, %v3298_v5 }
0x16ea   : > { %4355 = vmatprep.mubr.msk.bf16.mxu1 %vm4572_vm1, %v4571_v2  ;;  %4352 = vmatpush3.bf16.msra.mxu1 %v4487_v30 }
0x16eb   : > { %4353 = vmatprep.subr.bf16.mxu1 %v4571_v2  ;;  %v3497_v2 = vrot.slane %v5006_v13, %v3496_v38 }
0x16ee   : > { %4354 = vmatpush3.bf16.msra.mxu1 %v4488_v31 }
0x17bc   : > { %v3355_v7 = vpop.f32.mrb[44].mxu1 }
0x17bd   : > { %v3356_v46 = vadd.f32 %v4026_v40, %v3355_v7  ;;  %v4329_v8 = vpop.f32.mrb[45].mxu1 }
0x17be   : > { %v3358_v10 = vpop.f32.mrb[46].mxu1 }
0x17bf   : > { %v3361_v12 = vmax.f32 %v3356_v46, 0.0  ;;  %v4330_v15 = vpop.f32.mrb[47].mxu1 }
0x17c1   : > { %v3378_v33 = vpack.c.bf16 %v3361_v12, %v3361_v12 }
0x17c3   : > { %4348 = vmatmul.mubr.bf16.vlgmr.msra.gmra.mrb[40].mxu0 %v3378_v33 }
0x1896   : > { %v3461_v37 = vpop.f32.mrb[40].mxu0 }
0x1897   : > { %v3467_v19 = vadd.f32 %v3461_v37, %v3293_v4  ;;  %v4349_v20 = vpop.f32.mrb[41].mxu0 }
0x1898   : > { %v3464_v21 = vpop.f32.mrb[42].mxu0 }
0x1899   : > { %v4350_v22 = vpop.f32.mrb[43].mxu0  ;;  %v3475_v49 = vadd.f32 %v4038_v18, %v3467_v19 }
0x189b   : > { %v3476_v24 = vsel %vm1148_vm2, %v3475_v49, 0.0 }
0x189c   : > { %3477 = vadd.xlane.f32.xlu0 %v3476_v24 }
0x1929   : > { %v3478_v25 = vpop.xlane.xlu0 %3477 }
0x192a   : > { %v3479_v26 = vmul.f32 0.03125, %v3478_v25 }
0x192c   : > { %v3480_v27 = vsub.f32 %v3475_v49, %v3479_v26 }
0x192e   : > { %v3481_v28 = vmul.f32 %v3480_v27, %v3480_v27 }
0x1930   : > { %v3482_v29 = vsel %vm1148_vm2, %v3481_v28, 0.0 }
0x1931   : > { %3483 = vadd.xlane.f32.xlu0 %v3482_v29 }
0x19be   : > { %v3484_v32 = vpop.xlane.xlu0 %3483 }
0x19bf   : > { %v3485_v34 = vmul.f32 0.03125, %v3484_v32 }
0x19c1   : > { %v3486_v35 = vadd.f32 1e-05, %v3485_v34 }
0x19c3   : > { %4529 = vrsqrt.f32 %v3486_v35 }
0x19cd   : > { %v4530_v41 = vpop.eup %4529 }
0x19ce   : > { %v3488_v42 = vmul.f32 %v4530_v41, %v3480_v27 }
0x19d0   : > { %v3493_v44 = vmul.f32 %v3492_v39, %v3488_v42 }
0x19d2   : > { %v3498_v17 = vadd.f32 %v3497_v2, %v3493_v44 }
0x19d4   : > { %3499 = vst.msk [vmem:[#allocation2] sm:$0xff] %vm1148_vm2, %v3498_v17  ;;  %v3504_v9 = vpack.c.bf16 %v3498_v17, %v3498_v17 }
0x19d6   : > { %4356 = vmatmul.mubr.msk.bf16.vlgmr.msra.gmra.mrb[48].mxu1 %vm1148_vm2, %v3504_v9 }
0x1aa9   : > { %v3561_v48 = vpop.f32.mrb[48].mxu1 }
0x1aaa   : > { %v3562_v43 = vadd.f32 %v4039_v47, %v3561_v48  ;;  %v4357_v50 = vpop.f32.mrb[49].mxu1 }
0x1aab   : > { %v3564_v51 = vpop.f32.mrb[50].mxu1 }
0x1aac   : > { %3568 = vst.msk [vmem:[%s4810_s8] sm:$0xff] %vm3567_vm7, %v3562_v43  ;;  %v4358_v52 = vpop.f32.mrb[51].mxu1 }
0x1aad PF: > { %s5309_s1 = sld [smem:[#allocation7_spill]]  ;;  %s5311_s22 = sld [smem:[#allocation6_spill]] }
0x1aae   : > { %s5312_s23 = sld [smem:[#allocation8_spill]]  ;;  %s5313_s24 = sld [smem:[#allocation9_spill]] }
0x1ab3   : > { %s31_s2 = sadd.s32 1, %s5309_s1   ;;  %s5310_s1 = sld [smem:[#allocation5_spill]] }
0x1ab4   : > { %p28_p8 = scmp.ge.s32.totalorder %s31_s2, 8  }
0x1ab6   :  { %30 = sbr.rel (!%p28_p8) target bundleno = 17 (0x11), region = 191 }

</bundles_post_ra>
